<compile_context>
chip_gen: v7x
topology: tpu7x:2x2x1
jax: 0.10.0
libtpu: 0.0.40
codegen_flags: <defaults>
</compile_context>

<pallas_src>
import jax
import jax.numpy as jnp
from jax.experimental import pallas as pl
from jax.experimental.pallas import tpu as pltpu


# ---------------------------------------------------------------------------
# Kernel 1: fused TDNN1 + TDNN2 (one grid step per batch element)
# ---------------------------------------------------------------------------
def _tdnn_fused_kernel(x_ref, w1_ref, b1_ref, s1_ref, t1_ref,
                       w2_ref, b2_ref, s2_ref, t2_ref, o_ref, h1_ref):
    # x_ref: (1, 42, 32); o_ref: (1, 38, 128); h1_ref: VMEM scratch (40, 64).
    D1, D2 = 32, 64
    T1, T2 = 40, 38  # time lengths after each context-3 layer

    # TDNN1: Linear(96->64) on [x_t, x_{t+1}, x_{t+2}] == sum of 3 shifted dots.
    h1 = jnp.zeros((T1, 64), jnp.float32)
    for c in range(3):
        h1 = h1 + jnp.dot(x_ref[0, c:c + T1, :],
                          w1_ref[c * D1:(c + 1) * D1, :],
                          preferred_element_type=jnp.float32)
    # Linear -> ReLU -> BN(affine-folded)
    h1 = jnp.maximum(h1 + b1_ref[...], 0.0) * s1_ref[...] + t1_ref[...]
    h1_ref[...] = h1  # keep intermediate in VMEM (never touches HBM)

    # TDNN2: Linear(192->128), same decomposition on the VMEM-resident h1.
    h2 = jnp.zeros((T2, 128), jnp.float32)
    for c in range(3):
        h2 = h2 + jnp.dot(h1_ref[c:c + T2, :],
                          w2_ref[c * D2:(c + 1) * D2, :],
                          preferred_element_type=jnp.float32)
    h2 = jnp.maximum(h2 + b2_ref[...], 0.0) * s2_ref[...] + t2_ref[...]
    o_ref[0] = h2.astype(o_ref.dtype)


def tdnn_fused(x, p1, p2):
    """x: (B, 42, 32) f32 -> (B, 38, 128) f32, both TDNN layers in one kernel."""
    B, T, D = x.shape
    assert (T, D) == (42, 32)
    s1, t1 = _fold_bn(p1["bn_gamma"], p1["bn_beta"], p1["bn_mean"], p1["bn_var"])
    s2, t2 = _fold_bn(p2["bn_gamma"], p2["bn_beta"], p2["bn_mean"], p2["bn_var"])

    return pl.pallas_call(
        _tdnn_fused_kernel,
        out_shape=jax.ShapeDtypeStruct((B, 38, 128), jnp.float32),
        grid_spec=pltpu.PrefetchScalarGridSpec(
            num_scalar_prefetch=0,
            grid=(B,),
            in_specs=[
                pl.BlockSpec((1, 42, 32), lambda b: (b, 0, 0)),   # x_b
                pl.BlockSpec((96, 64), lambda b: (0, 0)),         # w1
                pl.BlockSpec((1, 64), lambda b: (0, 0)),          # b1
                pl.BlockSpec((1, 64), lambda b: (0, 0)),          # bn1 scale
                pl.BlockSpec((1, 64), lambda b: (0, 0)),          # bn1 shift
                pl.BlockSpec((192, 128), lambda b: (0, 0)),       # w2
                pl.BlockSpec((1, 128), lambda b: (0, 0)),         # b2
                pl.BlockSpec((1, 128), lambda b: (0, 0)),         # bn2 scale
                pl.BlockSpec((1, 128), lambda b: (0, 0)),         # bn2 shift
            ],
            out_specs=pl.BlockSpec((1, 38, 128), lambda b: (b, 0, 0)),
            scratch_shapes=[pltpu.VMEM((40, 64), jnp.float32)],
        ),
        compiler_params=pltpu.CompilerParams(
            dimension_semantics=("parallel",),
        ),
    )(x,
      p1["w"], p1["b"].reshape(1, -1), s1.reshape(1, -1), t1.reshape(1, -1),
      p2["w"], p2["b"].reshape(1, -1), s2.reshape(1, -1), t2.reshape(1, -1))


# ---------------------------------------------------------------------------
# Kernel 2: head Linear(4864 -> 1776) + BN + ReLU, N-tiled, bf16 weights
# ---------------------------------------------------------------------------
def _head_kernel(x_ref, w_ref, s_ref, t_ref, o_ref):
    # Full-K dot per N-tile; no accumulator scratch needed.
    # Weight stored bf16 (bandwidth-bound layer), upcast in-kernel, f32 accum.
    acc = jnp.dot(x_ref[...], w_ref[...].astype(jnp.float32),
                  preferred_element_type=jnp.float32)
    # Linear bias already folded into shift t; BN-affine then ReLU.
    o_ref[...] = jnp.maximum(acc * s_ref[...] + t_ref[...], 0.0)


def head_linear(x, w, scale, shift, *, n_tile=256):
    """x: (M, K) f32, w: (K, N) bf16, scale/shift: (N,) f32 -> (M, N) f32."""
    M, K = x.shape
    Kw, N = w.shape
    assert K == Kw and M % 8 == 0 and K % 128 == 0 and N % n_tile == 0
    return pl.pallas_call(
        _head_kernel,
        out_shape=jax.ShapeDtypeStruct((M, N), jnp.float32),
        grid_spec=pltpu.PrefetchScalarGridSpec(
            num_scalar_prefetch=0,
            grid=(N // n_tile,),
            in_specs=[
                pl.BlockSpec((M, K), lambda n: (0, 0)),        # activations (resident)
                pl.BlockSpec((K, n_tile), lambda n: (0, n)),   # bf16 weight tile
                pl.BlockSpec((1, n_tile), lambda n: (0, n)),   # bn scale tile
                pl.BlockSpec((1, n_tile), lambda n: (0, n)),   # bn shift (+bias) tile
            ],
            out_specs=pl.BlockSpec((M, n_tile), lambda n: (0, n)),
        ),
        compiler_params=pltpu.CompilerParams(
            dimension_semantics=("parallel",),   # lets v7x shard N tiles over 2 TCs
        ),
    )(x, w, scale.reshape(1, -1), shift.reshape(1, -1))


# ---------------------------------------------------------------------------
# Model glue (parameter folding / padding) in plain JAX
# ---------------------------------------------------------------------------
def _fold_bn(gamma, beta, running_mean, running_var, eps=1e-5):
    scale = gamma / jnp.sqrt(running_var + eps)
    shift = beta - running_mean * scale
    return scale, shift


def classifier_forward(x, params):
    B = x.shape[0]
    out2 = tdnn_fused(x, params["tdnn1"], params["tdnn2"])   # (B, 38, 128)
    flat = out2.reshape(B, 38 * 128)                         # (B, 4864) row-major

    # Round M up to a multiple of 8 (sublane-aligned head input).
    m_pad = -(-B // 8) * 8
    flat = jnp.pad(flat, ((0, m_pad - B), (0, 0)))

    ph = params["head"]
    scale, shift = _fold_bn(ph["bn_gamma"], ph["bn_beta"], ph["bn_mean"], ph["bn_var"])
    shift = shift + scale * ph["b"]          # fold linear bias into BN shift (BN precedes ReLU)

    N = ph["w"].shape[1]                     # 1776
    n_tile = 256
    n_pad = -(-N // n_tile) * n_tile         # 1792 (lane-dense tiles)
    # bf16 weight storage is a deliberate precision/bandwidth trade (f32 accum kept).
    w = jnp.pad(ph["w"], ((0, 0), (0, n_pad - N))).astype(jnp.bfloat16)
    scale = jnp.pad(scale, (0, n_pad - N))
    shift = jnp.pad(shift, (0, n_pad - N))

    out = head_linear(flat, w, scale, shift, n_tile=n_tile)  # (m_pad, 1792)
    return out[:B, :N]                                       # (B, 1776)


# ---------------------------------------------------------------------------
# Deterministic parameter initialization (synthetic; shapes from __init__)
# ---------------------------------------------------------------------------
def _init_layer(key, in_dim, out_dim):
    kw, kb, kg, kbe, km, kv = jax.random.split(key, 6)
    return {
        "w": 0.05 * jax.random.normal(kw, (in_dim, out_dim), jnp.float32),
        "b": 0.05 * jax.random.normal(kb, (out_dim,), jnp.float32),
        "bn_gamma": 1.0 + 0.1 * jax.random.normal(kg, (out_dim,), jnp.float32),
        "bn_beta": 0.1 * jax.random.normal(kbe, (out_dim,), jnp.float32),
        "bn_mean": 0.1 * jax.random.normal(km, (out_dim,), jnp.float32),
        "bn_var": 1.0 + 0.1 * jax.nn.softplus(
            jax.random.normal(kv, (out_dim,), jnp.float32)),
    }


def init_params(key):
    k1, k2, k3 = jax.random.split(key, 3)
    return {
        "tdnn1": _init_layer(k1, 32 * 3, 64),      # TDNN(32 -> 64, ctx=3)
        "tdnn2": _init_layer(k2, 64 * 3, 128),     # TDNN(64 -> 128, ctx=3)
        "head": _init_layer(k3, 38 * 128, 1776),   # Linear(4864 -> 1776) + BN
    }


if __name__ == "__main__":
    key = jax.random.PRNGKey(0)
    kx, kp = jax.random.split(key)

    # Shapes fixed by the module: Linear(38*128, ...) after two ctx-3 TDNNs
    # implies seq_len = 42, input_dim = 32. Small batch of 2.
    B, T, D = 2, 42, 32
    x = jax.random.normal(kx, (B, T, D), jnp.float32)
    params = init_params(kp)

    fwd = jax.jit(classifier_forward)
    out = jax.block_until_ready(fwd(x, params))
    assert out.shape == (B, 1776), out.shape
    assert bool(jnp.all(jnp.isfinite(out)))
    print("KERNEL_OK")
</pallas_src>

<mosaic_0001>
module attributes {stable_mosaic.version = 11 : i64} {
  func.func @_tdnn_fused_kernel(%arg0: i32, %arg1: memref<1x42x32xf32, #tpu.memory_space<vmem>>, %arg2: memref<96x64xf32, #tpu.memory_space<vmem>>, %arg3: memref<1x64xf32, #tpu.memory_space<vmem>>, %arg4: memref<1x64xf32, #tpu.memory_space<vmem>>, %arg5: memref<1x64xf32, #tpu.memory_space<vmem>>, %arg6: memref<192x128xf32, #tpu.memory_space<vmem>>, %arg7: memref<1x128xf32, #tpu.memory_space<vmem>>, %arg8: memref<1x128xf32, #tpu.memory_space<vmem>>, %arg9: memref<1x128xf32, #tpu.memory_space<vmem>>, %arg10: memref<1x38x128xf32, #tpu.memory_space<vmem>>, %arg11: memref<40x64xf32, #tpu.memory_space<vmem>>) attributes {dimension_semantics = [#tpu.dimension_semantics<parallel>], iteration_bounds = array<i64: 2>, scalar_prefetch = 0 : i64, scratch_operands = 1 : i64, tpu.core_type = #tpu.core_type<tc>, window_params = [{transform_indices = @transform_0, window_bounds = array<i64: 1, 42, 32>}, {pipeline_mode = #tpu.pipeline_mode<synchronous>, transform_indices = @transform_1, window_bounds = array<i64: 96, 64>}, {pipeline_mode = #tpu.pipeline_mode<synchronous>, transform_indices = @transform_2, window_bounds = array<i64: 1, 64>}, {pipeline_mode = #tpu.pipeline_mode<synchronous>, transform_indices = @transform_3, window_bounds = array<i64: 1, 64>}, {pipeline_mode = #tpu.pipeline_mode<synchronous>, transform_indices = @transform_4, window_bounds = array<i64: 1, 64>}, {pipeline_mode = #tpu.pipeline_mode<synchronous>, transform_indices = @transform_5, window_bounds = array<i64: 192, 128>}, {pipeline_mode = #tpu.pipeline_mode<synchronous>, transform_indices = @transform_6, window_bounds = array<i64: 1, 128>}, {pipeline_mode = #tpu.pipeline_mode<synchronous>, transform_indices = @transform_7, window_bounds = array<i64: 1, 128>}, {pipeline_mode = #tpu.pipeline_mode<synchronous>, transform_indices = @transform_8, window_bounds = array<i64: 1, 128>}, {transform_indices = @transform_9, window_bounds = array<i64: 1, 38, 128>}]} {
    %cst = arith.constant 0.000000e+00 : f32
    %0 = vector.broadcast %cst : f32 to vector<40x64xf32>
    %c0 = arith.constant 0 : index
    %c0_0 = arith.constant 0 : index
    %c0_1 = arith.constant 0 : index
    %1 = vector.load %arg1[%c0, %c0_0, %c0_1] : memref<1x42x32xf32, #tpu.memory_space<vmem>>, vector<1x40x32xf32>
    %2 = vector.shape_cast %1 : vector<1x40x32xf32> to vector<40x32xf32>
    %c0_2 = arith.constant 0 : index
    %c0_3 = arith.constant 0 : index
    %3 = vector.load %arg2[%c0_2, %c0_3] : memref<96x64xf32, #tpu.memory_space<vmem>>, vector<32x64xf32>
    %cst_4 = arith.constant dense<0.000000e+00> : vector<40x64xf32>
    %4 = tpu.matmul %2, %3, %cst_4 {dimension_numbers = #tpu.dot_dimension_numbers<[1], [0], [0], [1], [0, 0, 1, 1], [], []>} : vector<40x32xf32>, vector<32x64xf32>, vector<40x64xf32> -> vector<40x64xf32>
    %5 = arith.addf %0, %4 : vector<40x64xf32>
    %c0_5 = arith.constant 0 : index
    %c1 = arith.constant 1 : index
    %c0_6 = arith.constant 0 : index
    %6 = vector.load %arg1[%c0_5, %c1, %c0_6] : memref<1x42x32xf32, #tpu.memory_space<vmem>>, vector<1x40x32xf32>
    %7 = vector.shape_cast %6 : vector<1x40x32xf32> to vector<40x32xf32>
    %c32 = arith.constant 32 : index
    %c0_7 = arith.constant 0 : index
    %8 = vector.load %arg2[%c32, %c0_7] : memref<96x64xf32, #tpu.memory_space<vmem>>, vector<32x64xf32>
    %cst_8 = arith.constant dense<0.000000e+00> : vector<40x64xf32>
    %9 = tpu.matmul %7, %8, %cst_8 {dimension_numbers = #tpu.dot_dimension_numbers<[1], [0], [0], [1], [0, 0, 1, 1], [], []>} : vector<40x32xf32>, vector<32x64xf32>, vector<40x64xf32> -> vector<40x64xf32>
    %10 = arith.addf %5, %9 : vector<40x64xf32>
    %c0_9 = arith.constant 0 : index
    %c2 = arith.constant 2 : index
    %c0_10 = arith.constant 0 : index
    %11 = vector.load %arg1[%c0_9, %c2, %c0_10] : memref<1x42x32xf32, #tpu.memory_space<vmem>>, vector<1x40x32xf32>
    %12 = vector.shape_cast %11 : vector<1x40x32xf32> to vector<40x32xf32>
    %c64 = arith.constant 64 : index
    %c0_11 = arith.constant 0 : index
    %13 = vector.load %arg2[%c64, %c0_11] : memref<96x64xf32, #tpu.memory_space<vmem>>, vector<32x64xf32>
    %cst_12 = arith.constant dense<0.000000e+00> : vector<40x64xf32>
    %14 = tpu.matmul %12, %13, %cst_12 {dimension_numbers = #tpu.dot_dimension_numbers<[1], [0], [0], [1], [0, 0, 1, 1], [], []>} : vector<40x32xf32>, vector<32x64xf32>, vector<40x64xf32> -> vector<40x64xf32>
    %15 = arith.addf %10, %14 : vector<40x64xf32>
    %c0_13 = arith.constant 0 : index
    %c0_14 = arith.constant 0 : index
    %16 = vector.load %arg3[%c0_13, %c0_14] : memref<1x64xf32, #tpu.memory_space<vmem>>, vector<1x64xf32>
    %17 = vector.broadcast %16 : vector<1x64xf32> to vector<40x64xf32>
    %18 = arith.addf %15, %17 : vector<40x64xf32>
    %cst_15 = arith.constant 0.000000e+00 : f32
    %19 = vector.broadcast %cst_15 : f32 to vector<40x64xf32>
    %20 = arith.maximumf %18, %19 : vector<40x64xf32>
    %c0_16 = arith.constant 0 : index
    %c0_17 = arith.constant 0 : index
    %21 = vector.load %arg4[%c0_16, %c0_17] : memref<1x64xf32, #tpu.memory_space<vmem>>, vector<1x64xf32>
    %22 = vector.broadcast %21 : vector<1x64xf32> to vector<40x64xf32>
    %23 = arith.mulf %20, %22 : vector<40x64xf32>
    %c0_18 = arith.constant 0 : index
    %c0_19 = arith.constant 0 : index
    %24 = vector.load %arg5[%c0_18, %c0_19] : memref<1x64xf32, #tpu.memory_space<vmem>>, vector<1x64xf32>
    %25 = vector.broadcast %24 : vector<1x64xf32> to vector<40x64xf32>
    %26 = arith.addf %23, %25 : vector<40x64xf32>
    %c0_20 = arith.constant 0 : index
    %c0_21 = arith.constant 0 : index
    %27 = vector.load %arg11[%c0_20, %c0_21] : memref<40x64xf32, #tpu.memory_space<vmem>>, vector<40x64xf32>
    tpu.vector_store %arg11[%c0_20, %c0_21], %26 {strides = array<i32>} : memref<40x64xf32, #tpu.memory_space<vmem>>, vector<40x64xf32>,
    %cst_22 = arith.constant 0.000000e+00 : f32
    %28 = vector.broadcast %cst_22 : f32 to vector<38x128xf32>
    %c0_23 = arith.constant 0 : index
    %c0_24 = arith.constant 0 : index
    %29 = vector.load %arg11[%c0_23, %c0_24] : memref<40x64xf32, #tpu.memory_space<vmem>>, vector<38x64xf32>
    %c0_25 = arith.constant 0 : index
    %c0_26 = arith.constant 0 : index
    %30 = vector.load %arg6[%c0_25, %c0_26] : memref<192x128xf32, #tpu.memory_space<vmem>>, vector<64x128xf32>
    %cst_27 = arith.constant dense<0.000000e+00> : vector<38x128xf32>
    %31 = tpu.matmul %29, %30, %cst_27 {dimension_numbers = #tpu.dot_dimension_numbers<[1], [0], [0], [1], [0, 0, 1, 1], [], []>} : vector<38x64xf32>, vector<64x128xf32>, vector<38x128xf32> -> vector<38x128xf32>
    %32 = arith.addf %28, %31 : vector<38x128xf32>
    %c1_28 = arith.constant 1 : index
    %c0_29 = arith.constant 0 : index
    %33 = vector.load %arg11[%c1_28, %c0_29] : memref<40x64xf32, #tpu.memory_space<vmem>>, vector<38x64xf32>
    %c64_30 = arith.constant 64 : index
    %c0_31 = arith.constant 0 : index
    %34 = vector.load %arg6[%c64_30, %c0_31] : memref<192x128xf32, #tpu.memory_space<vmem>>, vector<64x128xf32>
    %cst_32 = arith.constant dense<0.000000e+00> : vector<38x128xf32>
    %35 = tpu.matmul %33, %34, %cst_32 {dimension_numbers = #tpu.dot_dimension_numbers<[1], [0], [0], [1], [0, 0, 1, 1], [], []>} : vector<38x64xf32>, vector<64x128xf32>, vector<38x128xf32> -> vector<38x128xf32>
    %36 = arith.addf %32, %35 : vector<38x128xf32>
    %c2_33 = arith.constant 2 : index
    %c0_34 = arith.constant 0 : index
    %37 = vector.load %arg11[%c2_33, %c0_34] : memref<40x64xf32, #tpu.memory_space<vmem>>, vector<38x64xf32>
    %c128 = arith.constant 128 : index
    %c0_35 = arith.constant 0 : index
    %38 = vector.load %arg6[%c128, %c0_35] : memref<192x128xf32, #tpu.memory_space<vmem>>, vector<64x128xf32>
    %cst_36 = arith.constant dense<0.000000e+00> : vector<38x128xf32>
    %39 = tpu.matmul %37, %38, %cst_36 {dimension_numbers = #tpu.dot_dimension_numbers<[1], [0], [0], [1], [0, 0, 1, 1], [], []>} : vector<38x64xf32>, vector<64x128xf32>, vector<38x128xf32> -> vector<38x128xf32>
    %40 = arith.addf %36, %39 : vector<38x128xf32>
    %c0_37 = arith.constant 0 : index
    %c0_38 = arith.constant 0 : index
    %41 = vector.load %arg7[%c0_37, %c0_38] : memref<1x128xf32, #tpu.memory_space<vmem>>, vector<1x128xf32>
    %42 = vector.broadcast %41 : vector<1x128xf32> to vector<38x128xf32>
    %43 = arith.addf %40, %42 : vector<38x128xf32>
    %cst_39 = arith.constant 0.000000e+00 : f32
    %44 = vector.broadcast %cst_39 : f32 to vector<38x128xf32>
    %45 = arith.maximumf %43, %44 : vector<38x128xf32>
    %c0_40 = arith.constant 0 : index
    %c0_41 = arith.constant 0 : index
    %46 = vector.load %arg8[%c0_40, %c0_41] : memref<1x128xf32, #tpu.memory_space<vmem>>, vector<1x128xf32>
    %47 = vector.broadcast %46 : vector<1x128xf32> to vector<38x128xf32>
    %48 = arith.mulf %45, %47 : vector<38x128xf32>
    %c0_42 = arith.constant 0 : index
    %c0_43 = arith.constant 0 : index
    %49 = vector.load %arg9[%c0_42, %c0_43] : memref<1x128xf32, #tpu.memory_space<vmem>>, vector<1x128xf32>
    %50 = vector.broadcast %49 : vector<1x128xf32> to vector<38x128xf32>
    %51 = arith.addf %48, %50 : vector<38x128xf32>
    %c0_44 = arith.constant 0 : index
    %c0_45 = arith.constant 0 : index
    %c0_46 = arith.constant 0 : index
    %52 = vector.load %arg10[%c0_44, %c0_45, %c0_46] : memref<1x38x128xf32, #tpu.memory_space<vmem>>, vector<1x38x128xf32>
    %53 = vector.shape_cast %52 : vector<1x38x128xf32> to vector<38x128xf32>
    %54 = vector.shape_cast %51 : vector<38x128xf32> to vector<1x38x128xf32>
    tpu.vector_store %arg10[%c0_44, %c0_45, %c0_46], %54 {strides = array<i32>} : memref<1x38x128xf32, #tpu.memory_space<vmem>>, vector<1x38x128xf32>,
    return
  }
  func.func @transform_0(%arg0: i32) -> (i32, i32, i32) {
    %c0_i32 = arith.constant 0 : i32
    %c0_i32_0 = arith.constant 0 : i32
    %c0_i32_1 = arith.constant 0 : i32
    return %arg0, %c0_i32, %c0_i32_0 : i32, i32, i32
  }
  func.func @transform_1(%arg0: i32) -> (i32, i32) {
    %c0_i32 = arith.constant 0 : i32
    %c0_i32_0 = arith.constant 0 : i32
    %c0_i32_1 = arith.constant 0 : i32
    return %c0_i32, %c0_i32_0 : i32, i32
  }
  func.func @transform_2(%arg0: i32) -> (i32, i32) {
    %c0_i32 = arith.constant 0 : i32
    %c0_i32_0 = arith.constant 0 : i32
    %c0_i32_1 = arith.constant 0 : i32
    return %c0_i32, %c0_i32_0 : i32, i32
  }
  func.func @transform_3(%arg0: i32) -> (i32, i32) {
    %c0_i32 = arith.constant 0 : i32
    %c0_i32_0 = arith.constant 0 : i32
    %c0_i32_1 = arith.constant 0 : i32
    return %c0_i32, %c0_i32_0 : i32, i32
  }
  func.func @transform_4(%arg0: i32) -> (i32, i32) {
    %c0_i32 = arith.constant 0 : i32
    %c0_i32_0 = arith.constant 0 : i32
    %c0_i32_1 = arith.constant 0 : i32
    return %c0_i32, %c0_i32_0 : i32, i32
  }
  func.func @transform_5(%arg0: i32) -> (i32, i32) {
    %c0_i32 = arith.constant 0 : i32
    %c0_i32_0 = arith.constant 0 : i32
    %c0_i32_1 = arith.constant 0 : i32
    return %c0_i32, %c0_i32_0 : i32, i32
  }
  func.func @transform_6(%arg0: i32) -> (i32, i32) {
    %c0_i32 = arith.constant 0 : i32
    %c0_i32_0 = arith.constant 0 : i32
    %c0_i32_1 = arith.constant 0 : i32
    return %c0_i32, %c0_i32_0 : i32, i32
  }
  func.func @transform_7(%arg0: i32) -> (i32, i32) {
    %c0_i32 = arith.constant 0 : i32
    %c0_i32_0 = arith.constant 0 : i32
    %c0_i32_1 = arith.constant 0 : i32
    return %c0_i32, %c0_i32_0 : i32, i32
  }
  func.func @transform_8(%arg0: i32) -> (i32, i32) {
    %c0_i32 = arith.constant 0 : i32
    %c0_i32_0 = arith.constant 0 : i32
    %c0_i32_1 = arith.constant 0 : i32
    return %c0_i32, %c0_i32_0 : i32, i32
  }
  func.func @transform_9(%arg0: i32) -> (i32, i32, i32) {
    %c0_i32 = arith.constant 0 : i32
    %c0_i32_0 = arith.constant 0 : i32
    %c0_i32_1 = arith.constant 0 : i32
    return %arg0, %c0_i32, %c0_i32_0 : i32, i32, i32
  }
}

module attributes {stable_mosaic.version = 11 : i64} {
  func.func @_head_kernel(%arg0: i32, %arg1: memref<8x4864xf32, #tpu.memory_space<vmem>>, %arg2: memref<4864x256xbf16, #tpu.memory_space<vmem>>, %arg3: memref<1x256xf32, #tpu.memory_space<vmem>>, %arg4: memref<1x256xf32, #tpu.memory_space<vmem>>, %arg5: memref<8x256xf32, #tpu.memory_space<vmem>>) attributes {dimension_semantics = [#tpu.dimension_semantics<parallel>], iteration_bounds = array<i64: 7>, scalar_prefetch = 0 : i64, scratch_operands = 0 : i64, tpu.core_type = #tpu.core_type<tc>, window_params = [{pipeline_mode = #tpu.pipeline_mode<synchronous>, transform_indices = @transform_0, window_bounds = array<i64: 8, 4864>}, {transform_indices = @transform_1, window_bounds = array<i64: 4864, 256>}, {transform_indices = @transform_2, window_bounds = array<i64: 1, 256>}, {transform_indices = @transform_3, window_bounds = array<i64: 1, 256>}, {transform_indices = @transform_4, window_bounds = array<i64: 8, 256>}]} {
    %c0 = arith.constant 0 : index
    %c0_0 = arith.constant 0 : index
    %0 = vector.load %arg1[%c0, %c0_0] : memref<8x4864xf32, #tpu.memory_space<vmem>>, vector<8x4864xf32>
    %c0_1 = arith.constant 0 : index
    %c0_2 = arith.constant 0 : index
    %1 = vector.load %arg2[%c0_1, %c0_2] : memref<4864x256xbf16, #tpu.memory_space<vmem>>, vector<4864x256xbf16>
    %2 = arith.extf %1 : vector<4864x256xbf16> to vector<4864x256xf32>
    %cst = arith.constant dense<0.000000e+00> : vector<8x256xf32>
    %3 = tpu.matmul %0, %2, %cst {dimension_numbers = #tpu.dot_dimension_numbers<[1], [0], [0], [1], [0, 0, 1, 1], [], []>} : vector<8x4864xf32>, vector<4864x256xf32>, vector<8x256xf32> -> vector<8x256xf32>
    %c0_3 = arith.constant 0 : index
    %c0_4 = arith.constant 0 : index
    %4 = vector.load %arg3[%c0_3, %c0_4] : memref<1x256xf32, #tpu.memory_space<vmem>>, vector<1x256xf32>
    %5 = vector.broadcast %4 : vector<1x256xf32> to vector<8x256xf32>
    %6 = arith.mulf %3, %5 : vector<8x256xf32>
    %c0_5 = arith.constant 0 : index
    %c0_6 = arith.constant 0 : index
    %7 = vector.load %arg4[%c0_5, %c0_6] : memref<1x256xf32, #tpu.memory_space<vmem>>, vector<1x256xf32>
    %8 = vector.broadcast %7 : vector<1x256xf32> to vector<8x256xf32>
    %9 = arith.addf %6, %8 : vector<8x256xf32>
    %cst_7 = arith.constant 0.000000e+00 : f32
    %10 = vector.broadcast %cst_7 : f32 to vector<8x256xf32>
    %11 = arith.maximumf %9, %10 : vector<8x256xf32>
    %c0_8 = arith.constant 0 : index
    %c0_9 = arith.constant 0 : index
    %12 = vector.load %arg5[%c0_8, %c0_9] : memref<8x256xf32, #tpu.memory_space<vmem>>, vector<8x256xf32>
    tpu.vector_store %arg5[%c0_8, %c0_9], %11 {strides = array<i32>} : memref<8x256xf32, #tpu.memory_space<vmem>>, vector<8x256xf32>,
    return
  }
  func.func @transform_0(%arg0: i32) -> (i32, i32) {
    %c0_i32 = arith.constant 0 : i32
    %c0_i32_0 = arith.constant 0 : i32
    %c0_i32_1 = arith.constant 0 : i32
    return %c0_i32, %c0_i32_0 : i32, i32
  }
  func.func @transform_1(%arg0: i32) -> (i32, i32) {
    %c0_i32 = arith.constant 0 : i32
    %c0_i32_0 = arith.constant 0 : i32
    return %c0_i32, %arg0 : i32, i32
  }
  func.func @transform_2(%arg0: i32) -> (i32, i32) {
    %c0_i32 = arith.constant 0 : i32
    %c0_i32_0 = arith.constant 0 : i32
    return %c0_i32, %arg0 : i32, i32
  }
  func.func @transform_3(%arg0: i32) -> (i32, i32) {
    %c0_i32 = arith.constant 0 : i32
    %c0_i32_0 = arith.constant 0 : i32
    return %c0_i32, %arg0 : i32, i32
  }
  func.func @transform_4(%arg0: i32) -> (i32, i32) {
    %c0_i32 = arith.constant 0 : i32
    %c0_i32_0 = arith.constant 0 : i32
    return %c0_i32, %arg0 : i32, i32
  }
}

</mosaic_0001>

<bundles_post_ra>
// kernel: classifier_forward.2
= control target key start
LH: loop header
LB: loop body
LE: loop exit
PB: predicated region body
PF: predicated region fallthrough
CT: control target
= control target key end

     0   :  { %14 = vsyncpa [#allocation4], 0  ;;  %s2105_s0 = inlined_call_operand.vmem [shape: f32[2,42,32], index: 0, kind: input, shape index: {}]   ;;  %s2106_s1 = inlined_call_operand.vmem [shape: f32[96,64], index: 1, kind: input, shape index: {}]   ;;  %s2107_s2 = inlined_call_operand.hbm [shape: f32[1,64], index: 2, kind: input, shape index: {}]   ;;  %s2108_s3 = inlined_call_operand.vmem [shape: f32[1,64], index: 3, kind: input, shape index: {}]   ;;  %s2109_s4 = inlined_call_operand.vmem [shape: f32[1,64], index: 4, kind: input, shape index: {}]   ;;  %s2110_s5 = inlined_call_operand.hbm [shape: f32[192,128], index: 5, kind: input, shape index: {}]   ;;  %s2111_s6 = inlined_call_operand.hbm [shape: f32[1,128], index: 6, kind: input, shape index: {}]   ;;  %s2112_s7 = inlined_call_operand.vmem [shape: f32[1,128], index: 7, kind: input, shape index: {}]   ;;  %s2113_s8 = inlined_call_operand.vmem [shape: f32[1,128], index: 8, kind: input, shape index: {}]   ;;  %s2114_s9 = inlined_call_operand.vmem [shape: f32[2,38,128], index: 9, kind: output, shape index: {}]  }
   0x1   :  { %15 = vsyncpa [#allocation6], 0  ;;  %s1796_s30 = smov 0  }
   0x2 LB: > { %s1738_s10 = smov [#allocation5]   ;;  %s1802_s12 = sadd.s32 4294967295, %s1736_s30   ;;  %s1736_s30 = sphi %s1796_s30, %s21_s30  }
   0x3   : > { %s278_s11 = sshll.u32 %s1738_s10, 4  ;;  %p1261_p0 = scmp.ge.s32.totalorder %s1736_s30, 1  ;;  %s1811_s11 = int_to_ptr.vmem [resolvable:$true] %s278_s11 }
   0x4   : > { %p246_p1 = scmp.lt.s32.totalorder %s1736_s30, 3  ;;  %p1616_p2 = scmp.eq.s32.totalorder %s1802_s12, 0 }
   0x5   : > { %s1739_s14 = smov [#allocation3]   ;;  %s1740_s17 = smov [#allocation7]  }
   0x6   : > { %p1807_p3 = pnand %p1261_p0, %p246_p1  ;;  %s262_s15 = sshll.u32 %s1739_s14, 4  ;;  %s1821_s15 = int_to_ptr.vmem [resolvable:$true] %s262_s15 }
   0x7   : > { %s292_s18 = sshll.u32 %s1740_s17, 4  ;;  %s1638_s21 = scalar_lea.hbm %s2110_s5, 3072  ;;  %s1823_s18 = int_to_ptr.vmem [resolvable:$true] %s292_s18 }
   0x8   : > { %p1606_p4 = pneg %p1807_p3  ;;  %p1639_p6 = scmp.ne.s32.totalorder %s2110_s5, %s1638_s21 }
   0x9   : > { %p1645_p10 = scmp.lt.u32.totalorder %s1638_s21, %s2110_s5 }
   0xa   : > { %p1817_p5 = pnand %p1616_p2, %p1606_p4 }
   0xc   : > { %p1833_p7 = pneg %p1817_p5 }
   0xe   : > { %p1641_p8 = pnand %p1833_p7, %p1639_p6 }
  0x10   : > { %p1642_p9 = pneg %p1641_p8 }
  0x12   : > { %p1647_p11 = pnand %p1645_p10, %p1642_p9 }
  0x14   : > { %1650 = shalt.err (!%p1647_p11)
}
  0x15   : > { %s1651_s27 = scalar_lea.vmem %s1811_s11, 3072  ;;  %p1659_p1 = scmp.lt.s32.totalorder %s1811_s11, %s1811_s11 }
  0x16   : > { %p1652_p12 = scmp.ne.s32.totalorder %s1811_s11, %s1651_s27  ;;  %p1660_p4 = scmp.lt.s32.totalorder %s1651_s27, %s1651_s27 }
  0x18   : > { %p1654_p13 = pnand %p1652_p12, %p1833_p7  ;;  %p1661_p6 = por %p1660_p4, %p1659_p1 }
  0x1a   : > { %p1655_p0 = pneg %p1654_p13 }
  0x1c   : > { %p1662_p8 = pnand %p1661_p6, %p1655_p0 }
  0x1e   : > { %1665 = shalt.err (!%p1662_p8)
}
  0x1f   : > { %s1741_s28 = smov 128   ;;  %s1742_s29 = smov 8  }
  0x20   : > { %1612 = dma.hbm_to_vmem [thread:$0]  (!%p1817_p5), %s2110_s5, 3072, %s1811_s11, [#allocation6], %s1741_s28, %s1741_s28, %s1742_s29  }
  0x21   : > { %s1666_s20 = scalar_lea.hbm %s2107_s2, 16 }
  0x22   : > { %p1667_p9 = scmp.ne.s32.totalorder %s2107_s2, %s1666_s20  ;;  %p1673_p12 = scmp.lt.u32.totalorder %s1666_s20, %s2107_s2 }
  0x24   : > { %p1669_p10 = pnand %p1667_p9, %p1833_p7 }
  0x26   : > { %p1670_p11 = pneg %p1669_p10 }
  0x28   : > { %p1675_p13 = pnand %p1673_p12, %p1670_p11 }
  0x2a   : > { %1678 = shalt.err (!%p1675_p13)
}
  0x2b   : > { %s1679_s11 = scalar_lea.vmem %s1821_s15, 16  ;;  %s1686_s26 = scalar_lea.vmem %s1821_s15, 32 }
  0x2c   : > { %p1680_p0 = scmp.ne.s32.totalorder %s1821_s15, %s1679_s11  ;;  %p1687_p6 = scmp.lt.s32.totalorder %s1821_s15, %s1821_s15 }
  0x2d   : > { %p1688_p8 = scmp.lt.s32.totalorder %s1686_s26, %s1679_s11 }
  0x2e   : > { %p1682_p1 = pnand %p1680_p0, %p1833_p7 }
  0x2f   : > { %p1689_p9 = por %p1688_p8, %p1687_p6 }
  0x30   : > { %p1683_p4 = pneg %p1682_p1 }
  0x32   : > { %p1690_p10 = pnand %p1689_p9, %p1683_p4 }
  0x34   : > { %1693 = shalt.err (!%p1690_p10)
}
  0x35   : > { %1609 = dma.hbm_to_vmem [thread:$0]  (!%p1817_p5), %s2107_s2, 16, %s1821_s15, [#allocation4]  }
  0x36   : > { %s1694_s14 = scalar_lea.hbm %s2111_s6, 16 }
  0x37   : > { %p1695_p11 = scmp.ne.s32.totalorder %s2111_s6, %s1694_s14  ;;  %p1701_p0 = scmp.lt.u32.totalorder %s1694_s14, %s2111_s6 }
  0x39   : > { %p1697_p12 = pnand %p1695_p11, %p1833_p7 }
  0x3b   : > { %p1698_p13 = pneg %p1697_p12 }
  0x3d   : > { %p1703_p1 = pnand %p1701_p0, %p1698_p13 }
  0x3f   : > { %1706 = shalt.err (!%p1703_p1)
}
  0x40   : > { %s1707_s15 = scalar_lea.vmem %s1823_s18, 16  ;;  %s1714_s22 = scalar_lea.vmem %s1823_s18, 32 }
  0x41   : > { %p1708_p4 = scmp.ne.s32.totalorder %s1823_s18, %s1707_s15  ;;  %p1715_p9 = scmp.lt.s32.totalorder %s1823_s18, %s1823_s18 }
  0x42   : > { %p1716_p10 = scmp.lt.s32.totalorder %s1714_s22, %s1707_s15 }
  0x43   : > { %p1710_p6 = pnand %p1708_p4, %p1833_p7 }
  0x44   : > { %p1717_p11 = por %p1716_p10, %p1715_p9 }
  0x45   : > { %p1711_p8 = pneg %p1710_p6 }
  0x47   : > { %p1718_p12 = pnand %p1717_p11, %p1711_p8 }
  0x49   : > { %1721 = shalt.err (!%p1718_p12)
}
  0x4a   : > { %1615 = dma.hbm_to_vmem [thread:$0]  (!%p1817_p5), %s2111_s6, 16, %s1823_s18, [#allocation6]  }
  0x4b   : > { %319 = sbr.rel (%p1807_p3) target bundleno = 609 (0x261), region = 56 }
  0x52   : > { %1727 = dma.done.wait (%p1616_p2), [#allocation4], 16  }
  0x53   : > { %1729 = vsyncadd (%p1616_p2), [#allocation4], 4294967280 }
  0x54   : > { %1731 = dma.done.wait (%p1616_p2), [#allocation6], 3088  }
  0x55   : > { %1733 = vsyncadd (%p1616_p2), [#allocation6], 4294964208  ;;  %p363_p7 = scmp.lt.s32.totalorder %s1802_s12, 1  ;;  %v1743_v0 = vmov 0.0|0.0   ;;  %vm1744_vm0 = vmmov 0   ;;  %v1745_v1 = vmov 0.0  }
  0x56   : > { %1538 = vmatprep.subr.bf16.mxu0 %v1743_v0  ;;  %1544 = vmatprep.subr.bf16.mxu1 %v1743_v0  ;;  %v387_v2 = vld [vmem:[%s2106_s1 + $0x20] sm:$0xff]  ;;  %v388_v3 = vld [vmem:[%s2106_s1 + $0x28] sm:$0xff]  ;;  %v389_v7 = vld [vmem:[%s2106_s1 + $0x30] sm:$0xff]  ;;  %vm391_vm1 = vcmask 261120   ;;  %vm762_vm2 = vcmask 523264  }
  0x57   : > { %1384 = vmatprep.mubr.msk.f32.mxu0 %vm1744_vm0, %v1745_v1  ;;  %1407 = vmatprep.mubr.msk.f32.mxu1 %vm1744_vm0, %v1745_v1  ;;  %s2119_s12 = smov (!%p363_p7, %s1802_s12), 1  ;;  %v378_v4 = vld [vmem:[%s2106_s1] sm:$0xff]  ;;  %v1539_v5 = vpack.c.bf16 %v388_v3, %v387_v2  ;;  %v379_v6 = vld [vmem:[%s2106_s1 + $0x8] sm:$0xff]  ;;  %v390_v8 = vld [vmem:[%s2106_s1 + $0x38] sm:$0xff] }
  0x58   : > { %s1592_s27 = smul.u32 48, %s2119_s12  ;;  %v1545_v9 = vpack.c.bf16 %v379_v6, %v378_v4  ;;  %v380_v10 = vld [vmem:[%s2106_s1 + $0x10] sm:$0xff]  ;;  %v381_v11 = vld [vmem:[%s2106_s1 + $0x18] sm:$0xff]  ;;  %v1542_v12 = vpack.c.bf16 %v390_v8, %v389_v7  ;;  %v607_v14 = vld [vmem:[%s2106_s1 + $0x40] sm:$0xff] }
  0x59   : > { %1540 = vmatpush3.bf16.msra.mxu0 %v1539_v5  ;;  %v1548_v13 = vpack.c.bf16 %v381_v11, %v380_v10  ;;  %v608_v15 = vld [vmem:[%s2106_s1 + $0x48] sm:$0xff]  ;;  %v609_v19 = vld [vmem:[%s2106_s1 + $0x50] sm:$0xff]  ;;  %v610_v20 = vld [vmem:[%s2106_s1 + $0x58] sm:$0xff]  ;;  %s1593_s20 = smul.u32 40, %s2119_s12 }
  0x5a   : > { %1546 = vmatpush3.bf16.msra.mxu1 %v1545_v9  ;;  %1541 = vmatprep.subr.bf16.mxu0 %v1743_v0  ;;  %s1951_s13 = scalar_lea.vmem %s2105_s0, %s1592_s27  ;;  %v1551_v17 = vpack.c.bf16 %v608_v15, %v607_v14  ;;  %v1554_v23 = vpack.c.bf16 %v610_v20, %v609_v19  ;;  %v773_v35 = vld [vmem:[#allocation5] sm:$0xff]  ;;  %v774_v36 = vld [vmem:[#allocation5 + $0x8] sm:$0xff]  ;;  %v775_v40 = vld [vmem:[#allocation5 + $0x10] sm:$0xff] }
  0x5b   : > { %1547 = vmatprep.subr.bf16.mxu1 %v1743_v0  ;;  %v382_v16 = vld [vmem:[%s1951_s13 + $0x1] sm:$0xff]  ;;  %v383_v21 = vld [vmem:[%s1951_s13 + $0x9] sm:$0xff]  ;;  %v384_v24 = vld [vmem:[%s1951_s13 + $0x11] sm:$0xff]  ;;  %v1569_v37 = vpack.c.bf16 %v774_v36, %v773_v35  ;;  %s372_s16 = scalar_lea.vmem %s2114_s9, %s1593_s20 }
  0x5c   : > { %v373_v18 = vld [vmem:[%s1951_s13] sm:$0xff]  ;;  %v374_v22 = vld [vmem:[%s1951_s13 + $0x8] sm:$0xff]  ;;  %v375_v25 = vld [vmem:[%s1951_s13 + $0x10] sm:$0xff] }
  0x5d   : > { %1543 = vmatpush3.bf16.msra.mxu0 %v1542_v12  ;;  %v385_v26 = vld [vmem:[%s1951_s13 + $0x19] sm:$0xff]  ;;  %v386_v28 = vld [vmem:[%s1951_s13 + $0x21] sm:$0xff]  ;;  %v603_v31 = vld [vmem:[%s1951_s13 + $0xa] sm:$0xff] }
  0x5e   : > { %1549 = vmatpush3.bf16.msra.mxu1 %v1548_v13  ;;  %1550 = vmatprep.subr.bf16.mxu0 %v1743_v0  ;;  %v376_v27 = vld [vmem:[%s1951_s13 + $0x18] sm:$0xff]  ;;  %v377_v29 = vld [vmem:[%s1951_s13 + $0x20] sm:$0xff]  ;;  %v786_v38 = vld [vmem:[#allocation5 + $0x40] sm:$0xff] }
  0x5f   : > { %1556 = vmatprep.subr.bf16.mxu1 %v1743_v0  ;;  %v602_v30 = vld [vmem:[%s1951_s13 + $0x2] sm:$0xff]  ;;  %v604_v32 = vld [vmem:[%s1951_s13 + $0x12] sm:$0xff]  ;;  %v605_v33 = vld [vmem:[%s1951_s13 + $0x1a] sm:$0xff] }
  0x60   : > { %1385 = vmatmul.mubr.msk.f32.vlgmr.msra.gmra.mrb[0].mxu0 %vm391_vm1, %v382_v16  ;;  %v606_v34 = vld [vmem:[%s1951_s13 + $0x22] sm:$0xff]  ;;  %v787_v39 = vld [vmem:[#allocation5 + $0x48] sm:$0xff]  ;;  %v788_v44 = vld [vmem:[#allocation5 + $0x50] sm:$0xff] }
  0x61   : > { %1408 = vmatmul.mubr.msk.f32.vlgmr.msra.gmra.mrb[0].mxu1 %vm391_vm1, %v373_v18  ;;  %1552 = vmatpush3.bf16.msra.mxu0 %v1551_v17  ;;  %v1557_v41 = vpack.c.bf16 %v787_v39, %v786_v38  ;;  %v776_v42 = vld [vmem:[#allocation5 + $0x18] sm:$0xff]  ;;  %v777_v46 = vld [vmem:[#allocation5 + $0x20] sm:$0xff]  ;;  %v778_v48 = vld [vmem:[#allocation5 + $0x28] sm:$0xff] }
  0x62   : > { %1387 = vmatprep.mubr.msk.f32.mxu0 %vm1744_vm0, %v1745_v1  ;;  %1410 = vmatprep.mubr.msk.f32.mxu1 %vm1744_vm0, %v1745_v1  ;;  %v1572_v43 = vpack.c.bf16 %v776_v42, %v775_v40  ;;  %v789_v45 = vld [vmem:[#allocation5 + $0x58] sm:$0xff]  ;;  %v1575_v49 = vpack.c.bf16 %v778_v48, %v777_v46  ;;  %v790_v50 = vld [vmem:[#allocation5 + $0x60] sm:$0xff]  ;;  %v791_v51 = vld [vmem:[#allocation5 + $0x68] sm:$0xff] }
  0x63   : > { %1553 = vmatprep.subr.bf16.mxu0 %v1743_v0  ;;  %1558 = vmatpush3.bf16.msra.mxu1 %v1557_v41  ;;  %v1560_v47 = vpack.c.bf16 %v789_v45, %v788_v44  ;;  %v779_v52 = vld [vmem:[#allocation5 + $0x30] sm:$0xff]  ;;  %v1563_v53 = vpack.c.bf16 %v791_v51, %v790_v50  ;;  %v780_v54 = vld [vmem:[#allocation5 + $0x38] sm:$0xff] }
  0x64   : > { %1388 = vmatmul.mubr.msk.f32.gmra.mrb[2].mxu0 %vm391_vm1, %v383_v21  ;;  %1559 = vmatprep.subr.bf16.mxu1 %v1743_v0  ;;  %v1578_v55 = vpack.c.bf16 %v780_v54, %v779_v52  ;;  %v792_v56 = vld [vmem:[#allocation5 + $0x70] sm:$0xff]  ;;  %v793_v57 = vld [vmem:[#allocation5 + $0x78] sm:$0xff]  ;;  %v1009_v54 = vld [vmem:[#allocation5 + $0x80] sm:$0xff] }
  0x65   : > { %1411 = vmatmul.mubr.msk.f32.gmra.mrb[2].mxu1 %vm391_vm1, %v374_v22  ;;  %1390 = vmatprep.mubr.msk.f32.mxu0 %vm1744_vm0, %v1745_v1  ;;  %v1566_v58 = vpack.c.bf16 %v793_v57, %v792_v56 }
  0x66   : > { %1413 = vmatprep.mubr.msk.f32.mxu1 %vm1744_vm0, %v1745_v1  ;;  %1555 = vmatpush3.bf16.msra.mxu0 %v1554_v23  ;;  %v1287_v23 = vld [vmem:[#allocation3] ss:$0 sm:$0xff] }
  0x67   : > { %1568 = vmatprep.subr.bf16.mxu0 %v1743_v0  ;;  %1561 = vmatpush3.bf16.msra.mxu1 %v1560_v47 }
  0x68   : > { %1391 = vmatmul.mubr.msk.f32.gmra.mrb[4].mxu0 %vm391_vm1, %v384_v24  ;;  %1562 = vmatprep.subr.bf16.mxu1 %v1743_v0 }
  0x69   : > { %1414 = vmatmul.mubr.msk.f32.gmra.mrb[4].mxu1 %vm391_vm1, %v375_v25  ;;  %1393 = vmatprep.mubr.msk.f32.mxu0 %vm1744_vm0, %v1745_v1 }
  0x6a   : > { %1416 = vmatprep.mubr.msk.f32.mxu1 %vm1744_vm0, %v1745_v1 }
  0x6b   : > { %1564 = vmatpush3.bf16.msra.mxu1 %v1563_v53 }
  0x6c   : > { %1394 = vmatmul.mubr.msk.f32.gmra.mrb[6].mxu0 %vm391_vm1, %v385_v26  ;;  %1565 = vmatprep.subr.bf16.mxu1 %v1743_v0 }
  0x6d   : > { %1417 = vmatmul.mubr.msk.f32.gmra.mrb[6].mxu1 %vm391_vm1, %v376_v27  ;;  %1396 = vmatprep.mubr.msk.f32.mxu0 %vm1744_vm0, %v1745_v1  ;;  %v1288_v27 = vld [vmem:[%s2108_s3] ss:$0 sm:$0xff] }
  0x6e   : > { %1419 = vmatprep.mubr.msk.f32.mxu1 %vm1744_vm0, %v1745_v1 }
  0x6f   : > { %1567 = vmatpush3.bf16.msra.mxu1 %v1566_v58 }
  0x70   : > { %1397 = vmatmul.mubr.msk.f32.gmra.mrb[8].mxu0 %vm391_vm1, %v386_v28  ;;  %1580 = vmatprep.subr.bf16.mxu1 %v1743_v0 }
  0x71   : > { %1420 = vmatmul.mubr.msk.f32.gmra.mrb[8].mxu1 %vm391_vm1, %v377_v29  ;;  %1430 = vmatprep.mubr.msk.f32.mxu0 %vm1744_vm0, %v1745_v1 }
  0x72   : > { %1461 = vmatprep.mubr.msk.f32.mxu1 %vm1744_vm0, %v1745_v1 }
  0x74   : > { %1431 = vmatmul.mubr.msk.f32.vlgmr.msra.gmra.mrb[10].mxu0 %vm391_vm1, %v602_v30 }
  0x75   : > { %1433 = vmatprep.mubr.msk.f32.mxu0 %vm1744_vm0, %v1745_v1  ;;  %1570 = vmatpush3.bf16.msra.mxu0 %v1569_v37 }
  0x76   : > { %1571 = vmatprep.subr.bf16.mxu0 %v1743_v0 }
  0x78   : > { %1434 = vmatmul.mubr.msk.f32.gmra.mrb[12].mxu0 %vm391_vm1, %v603_v31 }
  0x79   : > { %1436 = vmatprep.mubr.msk.f32.mxu0 %vm1744_vm0, %v1745_v1  ;;  %1573 = vmatpush3.bf16.msra.mxu0 %v1572_v43 }
  0x7a   : > { %1574 = vmatprep.subr.bf16.mxu0 %v1743_v0 }
  0x7c   : > { %1437 = vmatmul.mubr.msk.f32.gmra.mrb[14].mxu0 %vm391_vm1, %v604_v32  ;;  %v1289_v32 = vld [vmem:[%s2109_s4] ss:$0 sm:$0xff] }
  0x7d   : > { %1439 = vmatprep.mubr.msk.f32.mxu0 %vm1744_vm0, %v1745_v1  ;;  %1576 = vmatpush3.bf16.msra.mxu0 %v1575_v49 }
  0x7e   : > { %1577 = vmatprep.subr.bf16.mxu0 %v1743_v0 }
  0x80   : > { %1440 = vmatmul.mubr.msk.f32.gmra.mrb[16].mxu0 %vm391_vm1, %v605_v33 }
  0x81   : > { %1442 = vmatprep.mubr.msk.f32.mxu0 %vm1744_vm0, %v1745_v1  ;;  %1579 = vmatpush3.bf16.msra.mxu0 %v1578_v55  ;;  %v1010_v55 = vld [vmem:[#allocation5 + $0x88] sm:$0xff] }
  0x84   : > { %1443 = vmatmul.mubr.msk.f32.gmra.mrb[18].mxu0 %vm391_vm1, %v606_v34 }
  0x85   : > { %1492 = vmatprep.mubr.msk.f32.mxu0 %vm1744_vm0, %v1745_v1 }
 0x133   : > { %v473_v59 = vpop.f32.mrb[0].mxu0 }
 0x134   : > { %v1386_v60 = vpop.f32.mrb[1].mxu0  ;;  %v578_v61 = vpop.f32.mrb[0].mxu1 }
 0x135   : > { %v579_v62 = vadd.f32 %v578_v61, %v473_v59  ;;  %v1409_v63 = vpop.f32.mrb[1].mxu1  ;;  %v1581_v59 = vpack.c.bf16 %v1010_v55, %v1009_v54 }
 0x136   : > { %v1012_v63 = vld [vmem:[#allocation5 + $0x98] sm:$0xff] }
 0x137   : > { %v478_v2 = vpop.f32.mrb[2].mxu0 }
 0x138   : > { %v1389_v3 = vpop.f32.mrb[3].mxu0  ;;  %v583_v4 = vpop.f32.mrb[2].mxu1 }
 0x139   : > { %v584_v5 = vadd.f32 %v583_v4, %v478_v2  ;;  %v1412_v6 = vpop.f32.mrb[3].mxu1 }
 0x13b   : > { %v483_v7 = vpop.f32.mrb[4].mxu0 }
 0x13c   : > { %v1392_v8 = vpop.f32.mrb[5].mxu0  ;;  %v588_v9 = vpop.f32.mrb[4].mxu1 }
 0x13d   : > { %v589_v10 = vadd.f32 %v588_v9, %v483_v7  ;;  %v1415_v11 = vpop.f32.mrb[5].mxu1  ;;  %v1013_v7 = vld [vmem:[#allocation5 + $0xa0] sm:$0xff] }
 0x13f   : > { %v488_v12 = vpop.f32.mrb[6].mxu0 }
 0x140   : > { %v1395_v13 = vpop.f32.mrb[7].mxu0  ;;  %v593_v14 = vpop.f32.mrb[6].mxu1 }
 0x141   : > { %v594_v15 = vadd.f32 %v593_v14, %v488_v12  ;;  %v1418_v16 = vpop.f32.mrb[7].mxu1  ;;  %v1015_v12 = vld [vmem:[#allocation5 + $0xb0] sm:$0xff] }
 0x143   : > { %v493_v17 = vpop.f32.mrb[8].mxu0 }
 0x144   : > { %v1398_v18 = vpop.f32.mrb[9].mxu0  ;;  %v598_v19 = vpop.f32.mrb[8].mxu1 }
 0x145   : > { %v599_v20 = vadd.f32 %v598_v19, %v493_v17  ;;  %v1421_v21 = vpop.f32.mrb[9].mxu1 }
 0x147   : > { %v692_v22 = vpop.f32.mrb[10].mxu0 }
 0x148   : > { %v716_v24 = vadd.f32 %v692_v22, %v579_v62  ;;  %v1432_v25 = vpop.f32.mrb[11].mxu0  ;;  %v1011_v62 = vld [vmem:[#allocation5 + $0x90] sm:$0xff] }
 0x14a   : > { %v728_v26 = vadd.f32 %v1287_v23, %v716_v24 }
 0x14b   : > { %v697_v28 = vpop.f32.mrb[12].mxu0 }
 0x14c   : > { %v733_v29 = vmax.f32 %v728_v26, 0.0  ;;  %v717_v30 = vadd.f32 %v697_v28, %v584_v5  ;;  %v1435_v31 = vpop.f32.mrb[13].mxu0  ;;  %v1584_v5 = vpack.c.bf16 %v1012_v63, %v1011_v62 }
 0x14e   : > { %v745_v33 = vmul.f32 %v1288_v27, %v733_v29  ;;  %v729_v34 = vadd.f32 %v1287_v23, %v717_v30 }
 0x14f   : > { %v702_v35 = vpop.f32.mrb[14].mxu0 }
 0x150   : > { %v757_v36 = vadd.f32 %v1289_v32, %v745_v33  ;;  %v734_v37 = vmax.f32 %v729_v34, 0.0  ;;  %v718_v38 = vadd.f32 %v702_v35, %v589_v10  ;;  %v1438_v39 = vpop.f32.mrb[15].mxu0  ;;  %v1014_v10 = vld [vmem:[#allocation5 + $0xa8] sm:$0xff] }
 0x151   : > { %v1587_v11 = vpack.c.bf16 %v1014_v10, %v1013_v7 }
 0x152   : > { %763 = vst.msk [vmem:[#allocation2] sm:$0xff] %vm762_vm2, %v757_v36  ;;  %v746_v40 = vmul.f32 %v1288_v27, %v734_v37  ;;  %v730_v41 = vadd.f32 %v1287_v23, %v718_v38 }
 0x153   : > { %v707_v42 = vpop.f32.mrb[16].mxu0 }
 0x154   : > { %v758_v43 = vadd.f32 %v1289_v32, %v746_v40  ;;  %v735_v44 = vmax.f32 %v730_v41, 0.0  ;;  %v719_v45 = vadd.f32 %v707_v42, %v594_v15  ;;  %v1441_v46 = vpop.f32.mrb[17].mxu0  ;;  %v1016_v15 = vld [vmem:[#allocation5 + $0xb8] sm:$0xff] }
 0x155   : > { %v1590_v16 = vpack.c.bf16 %v1016_v15, %v1015_v12 }
 0x156   : > { %764 = vst.msk [vmem:[#allocation2 + $0x8] sm:$0xff] %vm762_vm2, %v758_v43  ;;  %v747_v47 = vmul.f32 %v1288_v27, %v735_v44  ;;  %v731_v48 = vadd.f32 %v1287_v23, %v719_v45 }
 0x157   : > { %v712_v49 = vpop.f32.mrb[18].mxu0 }
 0x158   : > { %v759_v50 = vadd.f32 %v1289_v32, %v747_v47  ;;  %v736_v51 = vmax.f32 %v731_v48, 0.0  ;;  %v720_v52 = vadd.f32 %v712_v49, %v599_v20  ;;  %v1444_v53 = vpop.f32.mrb[19].mxu0  ;;  %v1305_v49 = vld [vmem:[#allocation7] ss:$0 sm:$0xff] }
 0x159   : > { %v768_v56 = vld [vmem:[#allocation2] sm:$0xff] }
 0x15a   : > { %765 = vst.msk [vmem:[#allocation2 + $0x10] sm:$0xff] %vm762_vm2, %v759_v50  ;;  %v748_v57 = vmul.f32 %v1288_v27, %v736_v51  ;;  %v732_v58 = vadd.f32 %v1287_v23, %v720_v52  ;;  %1493 = vmatmul.mubr.msk.f32.vlgmr.msra.gmra.mrb[20].mxu0 %vm762_vm2, %v768_v56  ;;  %v1306_v53 = vld [vmem:[%s2112_s7] ss:$0 sm:$0xff] }
 0x15b   : > { %1495 = vmatprep.mubr.msk.f32.mxu0 %vm1744_vm0, %v1745_v1 }
 0x15c   : > { %v760_v60 = vadd.f32 %v1289_v32, %v748_v57  ;;  %v737_v61 = vmax.f32 %v732_v58, 0.0  ;;  %v1307_v58 = vld [vmem:[%s2113_s8] ss:$0 sm:$0xff] }
 0x15d   : > { %v781_v2 = vld [vmem:[#allocation2 + $0x1] sm:$0xff] }
 0x15e   : > { %v769_v3 = vld [vmem:[#allocation2 + $0x8] sm:$0xff]  ;;  %766 = vst.msk [vmem:[#allocation2 + $0x18] sm:$0xff] %vm762_vm2, %v760_v60  ;;  %v749_v4 = vmul.f32 %v1288_v27, %v737_v61  ;;  %1462 = vmatmul.mubr.msk.f32.vlgmr.msra.gmra.mrb[10].mxu1 %vm762_vm2, %v781_v2 }
 0x15f   : > { %1496 = vmatmul.mubr.msk.f32.gmra.mrb[22].mxu0 %vm762_vm2, %v769_v3  ;;  %1582 = vmatpush3.bf16.msra.mxu1 %v1581_v59  ;;  %v1004_v20 = vld [vmem:[#allocation2 + $0x2] sm:$0xff] }
 0x160   : > { %1464 = vmatprep.mubr.msk.f32.mxu1 %vm1744_vm0, %v1745_v1  ;;  %v761_v6 = vadd.f32 %v1289_v32, %v749_v4  ;;  %1498 = vmatprep.mubr.msk.f32.mxu0 %vm1744_vm0, %v1745_v1 }
 0x161   : > { %1583 = vmatprep.subr.bf16.mxu1 %v1743_v0  ;;  %v782_v8 = vld [vmem:[#allocation2 + $0x9] sm:$0xff] }
 0x162   : > { %v770_v9 = vld [vmem:[#allocation2 + $0x10] sm:$0xff]  ;;  %767 = vst.msk [vmem:[#allocation2 + $0x20] sm:$0xff] %vm762_vm2, %v761_v6  ;;  %1465 = vmatmul.mubr.msk.f32.gmra.mrb[12].mxu1 %vm762_vm2, %v782_v8 }
 0x163   : > { %1499 = vmatmul.mubr.msk.f32.gmra.mrb[24].mxu0 %vm762_vm2, %v770_v9  ;;  %1585 = vmatpush3.bf16.msra.mxu1 %v1584_v5 }
 0x164   : > { %1467 = vmatprep.mubr.msk.f32.mxu1 %vm1744_vm0, %v1745_v1  ;;  %1501 = vmatprep.mubr.msk.f32.mxu0 %vm1744_vm0, %v1745_v1 }
 0x165   : > { %1586 = vmatprep.subr.bf16.mxu1 %v1743_v0  ;;  %v783_v13 = vld [vmem:[#allocation2 + $0x11] sm:$0xff] }
 0x166   : > { %v771_v14 = vld [vmem:[#allocation2 + $0x18] sm:$0xff]  ;;  %1468 = vmatmul.mubr.msk.f32.gmra.mrb[14].mxu1 %vm762_vm2, %v783_v13 }
 0x167   : > { %1502 = vmatmul.mubr.msk.f32.gmra.mrb[26].mxu0 %vm762_vm2, %v771_v14  ;;  %1470 = vmatprep.mubr.msk.f32.mxu1 %vm1744_vm0, %v1745_v1  ;;  %v1006_v21 = vld [vmem:[#allocation2 + $0x12] sm:$0xff] }
 0x168   : > { %1504 = vmatprep.mubr.msk.f32.mxu0 %vm1744_vm0, %v1745_v1  ;;  %1588 = vmatpush3.bf16.msra.mxu1 %v1587_v11 }
 0x169   : > { %v784_v17 = vld [vmem:[#allocation2 + $0x19] sm:$0xff]  ;;  %1589 = vmatprep.subr.bf16.mxu1 %v1743_v0  ;;  %v785_v19 = vld [vmem:[#allocation2 + $0x21] sm:$0x3f]  ;;  %v1005_v0 = vld [vmem:[#allocation2 + $0xa] sm:$0xff] }
 0x16a   : > { %v772_v18 = vld [vmem:[#allocation2 + $0x20] sm:$0x3f]  ;;  %1471 = vmatmul.mubr.msk.f32.gmra.mrb[16].mxu1 %vm762_vm2, %v784_v17 }
 0x16b   : > { %1505 = vmatmul.mubr.msk.f32.gmra.mrb[28].mxu0 %vm762_vm2, %v772_v18  ;;  %1473 = vmatprep.mubr.msk.f32.mxu1 %vm1744_vm0, %v1745_v1  ;;  %v1007_v22 = vld [vmem:[#allocation2 + $0x1a] sm:$0xff]  ;;  %v1008_v23 = vld [vmem:[#allocation2 + $0x22] sm:$0x3f] }
 0x16c   : > { %1591 = vmatpush3.bf16.msra.mxu1 %v1590_v16 }
 0x16e   : > { %1474 = vmatmul.mubr.msk.f32.gmra.mrb[18].mxu1 %vm762_vm2, %v785_v19 }
 0x16f   : > { %1523 = vmatprep.mubr.msk.f32.mxu1 %vm1744_vm0, %v1745_v1 }
 0x172   : > { %1524 = vmatmul.mubr.msk.f32.vlgmr.msra.gmra.mrb[20].mxu1 %vm762_vm2, %v1004_v20 }
 0x173   : > { %1526 = vmatprep.mubr.msk.f32.mxu1 %vm1744_vm0, %v1745_v1 }
 0x176   : > { %1527 = vmatmul.mubr.msk.f32.gmra.mrb[22].mxu1 %vm762_vm2, %v1005_v0 }
 0x177   : > { %1529 = vmatprep.mubr.msk.f32.mxu1 %vm1744_vm0, %v1745_v1 }
 0x17a   : > { %1530 = vmatmul.mubr.msk.f32.gmra.mrb[24].mxu1 %vm762_vm2, %v1006_v21 }
 0x17b   : > { %1532 = vmatprep.mubr.msk.f32.mxu1 %vm1744_vm0, %v1745_v1 }
 0x17e   : > { %1533 = vmatmul.mubr.msk.f32.gmra.mrb[26].mxu1 %vm762_vm2, %v1007_v22 }
 0x17f   : > { %1535 = vmatprep.mubr.msk.f32.mxu1 %vm1744_vm0, %v1745_v1 }
 0x182   : > { %1536 = vmatmul.mubr.msk.f32.gmra.mrb[28].mxu1 %vm762_vm2, %v1008_v23 }
 0x22d   : > { %v980_v24 = vpop.f32.mrb[20].mxu0 }
 0x22e   : > { %v1494_v25 = vpop.f32.mrb[21].mxu0 }
 0x231   : > { %v875_v26 = vpop.f32.mrb[10].mxu1 }
 0x232   : > { %v985_v27 = vpop.f32.mrb[22].mxu0  ;;  %v981_v28 = vadd.f32 %v980_v24, %v875_v26  ;;  %v1463_v29 = vpop.f32.mrb[11].mxu1 }
 0x233   : > { %v1497_v30 = vpop.f32.mrb[23].mxu0 }
 0x235   : > { %v880_v31 = vpop.f32.mrb[12].mxu1 }
 0x236   : > { %v990_v32 = vpop.f32.mrb[24].mxu0  ;;  %v986_v33 = vadd.f32 %v985_v27, %v880_v31  ;;  %v1466_v34 = vpop.f32.mrb[13].mxu1 }
 0x237   : > { %v1500_v35 = vpop.f32.mrb[25].mxu0 }
 0x239   : > { %v885_v36 = vpop.f32.mrb[14].mxu1 }
 0x23a   : > { %v995_v37 = vpop.f32.mrb[26].mxu0  ;;  %v991_v38 = vadd.f32 %v990_v32, %v885_v36  ;;  %v1469_v1 = vpop.f32.mrb[15].mxu1 }
 0x23b   : > { %v1503_v39 = vpop.f32.mrb[27].mxu0 }
 0x23d   : > { %v890_v40 = vpop.f32.mrb[16].mxu1 }
 0x23e   : > { %v1000_v41 = vpop.f32.mrb[28].mxu0  ;;  %v996_v42 = vadd.f32 %v995_v37, %v890_v40  ;;  %v1472_v43 = vpop.f32.mrb[17].mxu1 }
 0x23f   : > { %v1506_v44 = vpop.f32.mrb[29].mxu0 }
 0x241   : > { %v895_v45 = vpop.f32.mrb[18].mxu1 }
 0x242   : > { %v1001_v46 = vadd.f32 %v1000_v41, %v895_v45  ;;  %v1475_v47 = vpop.f32.mrb[19].mxu1 }
 0x245   : > { %v1098_v48 = vpop.f32.mrb[20].mxu1 }
 0x246   : > { %v1122_v50 = vadd.f32 %v1098_v48, %v981_v28  ;;  %v1525_v51 = vpop.f32.mrb[21].mxu1 }
 0x248   : > { %v1134_v52 = vadd.f32 %v1305_v49, %v1122_v50 }
 0x249   : > { %v1103_v54 = vpop.f32.mrb[22].mxu1 }
 0x24a   : > { %v1139_v55 = vmax.f32 %v1134_v52, 0.0  ;;  %v1123_v56 = vadd.f32 %v1103_v54, %v986_v33  ;;  %v1528_v57 = vpop.f32.mrb[23].mxu1 }
 0x24c   : > { %v1151_v59 = vmul.f32 %v1306_v53, %v1139_v55  ;;  %v1135_v60 = vadd.f32 %v1305_v49, %v1123_v56 }
 0x24d   : > { %v1108_v61 = vpop.f32.mrb[24].mxu1 }
 0x24e   : > { %v1163_v62 = vadd.f32 %v1307_v58, %v1151_v59  ;;  %v1140_v63 = vmax.f32 %v1135_v60, 0.0  ;;  %v1124_v2 = vadd.f32 %v1108_v61, %v991_v38  ;;  %v1531_v3 = vpop.f32.mrb[25].mxu1 }
 0x250   : > { %1168 = vst [vmem:[%s372_s16] sm:$0xff] %v1163_v62  ;;  %v1152_v4 = vmul.f32 %v1306_v53, %v1140_v63  ;;  %v1136_v5 = vadd.f32 %v1305_v49, %v1124_v2 }
 0x251   : > { %v1113_v6 = vpop.f32.mrb[26].mxu1 }
 0x252   : > { %v1164_v7 = vadd.f32 %v1307_v58, %v1152_v4  ;;  %v1141_v8 = vmax.f32 %v1136_v5, 0.0  ;;  %v1125_v9 = vadd.f32 %v1113_v6, %v996_v42  ;;  %v1534_v10 = vpop.f32.mrb[27].mxu1 }
 0x254   : > { %1169 = vst [vmem:[%s372_s16 + $0x8] sm:$0xff] %v1164_v7  ;;  %v1153_v11 = vmul.f32 %v1306_v53, %v1141_v8  ;;  %v1137_v12 = vadd.f32 %v1305_v49, %v1125_v9 }
 0x255   : > { %v1118_v13 = vpop.f32.mrb[28].mxu1 }
 0x256   : > { %v1165_v14 = vadd.f32 %v1307_v58, %v1153_v11  ;;  %v1142_v15 = vmax.f32 %v1137_v12, 0.0  ;;  %v1126_v16 = vadd.f32 %v1118_v13, %v1001_v46  ;;  %v1537_v17 = vpop.f32.mrb[29].mxu1 }
 0x258   : > { %1170 = vst [vmem:[%s372_s16 + $0x10] sm:$0xff] %v1165_v14  ;;  %v1154_v18 = vmul.f32 %v1306_v53, %v1142_v15  ;;  %v1138_v19 = vadd.f32 %v1305_v49, %v1126_v16 }
 0x25a   : > { %v1166_v20 = vadd.f32 %v1307_v58, %v1154_v18  ;;  %v1143_v0 = vmax.f32 %v1138_v19, 0.0 }
 0x25c   : > { %1171 = vst [vmem:[%s372_s16 + $0x18] sm:$0xff] %v1166_v20  ;;  %v1155_v21 = vmul.f32 %v1306_v53, %v1143_v0 }
 0x25e   : > { %v1167_v22 = vadd.f32 %v1307_v58, %v1155_v21 }
 0x260   : > { %1172 = vst [vmem:[%s372_s16 + $0x20] sm:$0x3f] %v1167_v22 }
 0x261 PF: > { %s21_s30 = sadd.s32 1, %s1736_s30  }
 0x262   : > { %p18_p2 = scmp.ge.s32.totalorder %s21_s30, 4  }
 0x264   :  { %20 = sbr.rel (!%p18_p2) target bundleno = 2 (0x2), region = 99 }
 0x26b   :  { %1194 = vsyncpa [#allocation4], 1 }
 0x26c   :  { %1196 = vsyncpa [#allocation4 + $0x1], 1 }
 0x26d   :  { %1197 = vsyncpa [#allocation6], 1 }

// kernel: classifier_forward.3
= control target key start
LH: loop header
LB: loop body
LE: loop exit
PB: predicated region body
PF: predicated region fallthrough
CT: control target
= control target key end

     0   :  { %s11365_s15 = smov 0   ;;  %s11367_s16 = smov 0   ;;  %s13367_s0 = inlined_call_operand.vmem [shape: f32[8,4864], index: 0, kind: input, shape index: {}]   ;;  %s13368_s1 = inlined_call_operand.vmem [shape: bf16[4864,1792], index: 1, kind: input, shape index: {}]   ;;  %s13369_s2 = inlined_call_operand.vmem [shape: f32[1,1792], index: 2, kind: input, shape index: {}]   ;;  %s13370_s3 = inlined_call_operand.vmem [shape: f32[1,1792], index: 3, kind: input, shape index: {}]   ;;  %s13371_s4 = inlined_call_operand.vmem [shape: f32[8,1792], index: 4, kind: output, shape index: {}]  }
   0x1   :  { %s11369_s17 = smov 0  }
   0x2 LB: > { %s8504_s18 = sadd.s32 4294967295, %s11338_s17   ;;  %s11382_s19 = sadd.s32 1, %s11338_s17   ;;  %s11338_s17 = sphi %s11369_s17, %s13374_s17   ;;  %s11334_s16 = sphi %s11367_s16, %s13373_s16   ;;  %s11330_s15 = sphi %s11365_s15, %s13372_s15  }
   0x3   : > { %s39_s20 = ssub.s32 %s11338_s17, %s11382_s19  ;;  %s42_s21 = sadd.s32 1, %s11334_s16 }
   0x4   : > { %p40_p0 = scmp.eq.s32.totalorder %s39_s20, 0  ;;  %p49_p1 = scmp.ne.s32.totalorder %s11334_s16, %s11330_s15 }
   0x5   : > { %p50_p2 = scmp.eq.s32.totalorder %s11338_s17, 0  ;;  %p8507_p4 = scmp.ge.s32.totalorder %s11338_s17, 7 }
   0x6   : > { %s11391_s22 = scalar_select %p40_p0, %s11334_s16, %s42_s21  }
   0x7   : > { %p51_p3 = por %p50_p2, %p49_p1  ;;  %156 = sbr.rel (%p8507_p4) target bundleno = 323 (0x143), region = 20 }
   0xe   : > { %159 = sbr.rel (!%p51_p3) target bundleno = 323 (0x143), region = 24  ;;  %s161_s23 = sand.u32 (%p51_p3), 1, %s11334_s16  }
   0xf   : > { %s8517_s24 = sshll.u32 (%p51_p3), %s11338_s17, 3  ;;  %s10378_s25 = smul.u32 (%p51_p3), 4864, %s161_s23 }
  0x10   : > { %s11399_s28 = scalar_lea.vmem (%p51_p3), %s13368_s1, %s8517_s24 }
  0x11   : > { %v1411_v0 = vld [vmem:[%s11399_s28] sm:$0xff] (%p51_p3)  ;;  %v1413_v1 = vld [vmem:[%s11399_s28 + $0x38] sm:$0xff] (%p51_p3)  ;;  %v1415_v2 = vld [vmem:[%s11399_s28 + $0x70] sm:$0xff] (%p51_p3)  ;;  %s11407_s29 = scalar_lea.vmem (%p51_p3), [#allocation2], %s10378_s25 }
  0x12   : > { %v1417_v3 = vld [vmem:[%s11399_s28 + $0xa8] sm:$0xff] (%p51_p3)  ;;  %v1419_v4 = vld [vmem:[%s11399_s28 + $0xe0] sm:$0xff] (%p51_p3)  ;;  %v1421_v5 = vld [vmem:[%s11399_s28 + $0x118] sm:$0xff] (%p51_p3)  ;;  %1412 = vst [vmem:[%s11407_s29] sm:$0xff] (%p51_p3), %v1411_v0 }
  0x13   : > { %1414 = vst [vmem:[%s11407_s29 + $0x8] sm:$0xff] (%p51_p3), %v1413_v1  ;;  %1416 = vst [vmem:[%s11407_s29 + $0x10] sm:$0xff] (%p51_p3), %v1415_v2  ;;  %v1423_v6 = vld [vmem:[%s11399_s28 + $0x150] sm:$0xff] (%p51_p3)  ;;  %v1425_v7 = vld [vmem:[%s11399_s28 + $0x188] sm:$0xff] (%p51_p3) }
  0x14   : > { %1418 = vst [vmem:[%s11407_s29 + $0x18] sm:$0xff] (%p51_p3), %v1417_v3  ;;  %1420 = vst [vmem:[%s11407_s29 + $0x20] sm:$0xff] (%p51_p3), %v1419_v4  ;;  %v1427_v8 = vld [vmem:[%s11399_s28 + $0x1c0] sm:$0xff] (%p51_p3)  ;;  %v1429_v9 = vld [vmem:[%s11399_s28 + $0x1f8] sm:$0xff] (%p51_p3) }
  0x15   : > { %1422 = vst [vmem:[%s11407_s29 + $0x28] sm:$0xff] %v1421_v5  ;;  %1424 = vst [vmem:[%s11407_s29 + $0x30] sm:$0xff] %v1423_v6  ;;  %v1431_v10 = vld [vmem:[%s11399_s28 + $0x230] sm:$0xff]  ;;  %v1433_v11 = vld [vmem:[%s11399_s28 + $0x268] sm:$0xff] }
  0x16   : > { %1426 = vst [vmem:[%s11407_s29 + $0x38] sm:$0xff] %v1425_v7  ;;  %1428 = vst [vmem:[%s11407_s29 + $0x40] sm:$0xff] %v1427_v8  ;;  %v1435_v12 = vld [vmem:[%s11399_s28 + $0x2a0] sm:$0xff]  ;;  %v1437_v13 = vld [vmem:[%s11399_s28 + $0x2d8] sm:$0xff] }
  0x17   : > { %1430 = vst [vmem:[%s11407_s29 + $0x48] sm:$0xff] %v1429_v9  ;;  %1432 = vst [vmem:[%s11407_s29 + $0x50] sm:$0xff] %v1431_v10  ;;  %v1439_v14 = vld [vmem:[%s11399_s28 + $0x310] sm:$0xff]  ;;  %v1441_v15 = vld [vmem:[%s11399_s28 + $0x348] sm:$0xff] }
  0x18   : > { %1434 = vst [vmem:[%s11407_s29 + $0x58] sm:$0xff] %v1433_v11  ;;  %1436 = vst [vmem:[%s11407_s29 + $0x60] sm:$0xff] %v1435_v12  ;;  %v1443_v16 = vld [vmem:[%s11399_s28 + $0x380] sm:$0xff]  ;;  %v1445_v17 = vld [vmem:[%s11399_s28 + $0x3b8] sm:$0xff] }
  0x19   : > { %1438 = vst [vmem:[%s11407_s29 + $0x68] sm:$0xff] %v1437_v13  ;;  %1440 = vst [vmem:[%s11407_s29 + $0x70] sm:$0xff] %v1439_v14  ;;  %v1447_v18 = vld [vmem:[%s11399_s28 + $0x3f0] sm:$0xff]  ;;  %v1449_v19 = vld [vmem:[%s11399_s28 + $0x428] sm:$0xff] }
  0x1a   : > { %1442 = vst [vmem:[%s11407_s29 + $0x78] sm:$0xff] %v1441_v15  ;;  %1444 = vst [vmem:[%s11407_s29 + $0x80] sm:$0xff] %v1443_v16  ;;  %v1451_v20 = vld [vmem:[%s11399_s28 + $0x460] sm:$0xff]  ;;  %v1453_v21 = vld [vmem:[%s11399_s28 + $0x498] sm:$0xff] }
  0x1b   : > { %1446 = vst [vmem:[%s11407_s29 + $0x88] sm:$0xff] %v1445_v17  ;;  %1448 = vst [vmem:[%s11407_s29 + $0x90] sm:$0xff] %v1447_v18  ;;  %v1455_v22 = vld [vmem:[%s11399_s28 + $0x4d0] sm:$0xff]  ;;  %v1457_v23 = vld [vmem:[%s11399_s28 + $0x508] sm:$0xff] }
  0x1c   : > { %1450 = vst [vmem:[%s11407_s29 + $0x98] sm:$0xff] %v1449_v19  ;;  %1452 = vst [vmem:[%s11407_s29 + $0xa0] sm:$0xff] %v1451_v20  ;;  %v1459_v24 = vld [vmem:[%s11399_s28 + $0x540] sm:$0xff]  ;;  %v1461_v25 = vld [vmem:[%s11399_s28 + $0x578] sm:$0xff] }
  0x1d   : > { %1454 = vst [vmem:[%s11407_s29 + $0xa8] sm:$0xff] %v1453_v21  ;;  %1456 = vst [vmem:[%s11407_s29 + $0xb0] sm:$0xff] %v1455_v22  ;;  %v1463_v26 = vld [vmem:[%s11399_s28 + $0x5b0] sm:$0xff]  ;;  %v1465_v27 = vld [vmem:[%s11399_s28 + $0x5e8] sm:$0xff] }
  0x1e   : > { %1458 = vst [vmem:[%s11407_s29 + $0xb8] sm:$0xff] %v1457_v23  ;;  %1460 = vst [vmem:[%s11407_s29 + $0xc0] sm:$0xff] %v1459_v24  ;;  %v1467_v28 = vld [vmem:[%s11399_s28 + $0x620] sm:$0xff]  ;;  %v1469_v29 = vld [vmem:[%s11399_s28 + $0x658] sm:$0xff] }
  0x1f   : > { %1462 = vst [vmem:[%s11407_s29 + $0xc8] sm:$0xff] %v1461_v25  ;;  %1464 = vst [vmem:[%s11407_s29 + $0xd0] sm:$0xff] %v1463_v26  ;;  %v1471_v30 = vld [vmem:[%s11399_s28 + $0x690] sm:$0xff]  ;;  %v1473_v31 = vld [vmem:[%s11399_s28 + $0x6c8] sm:$0xff] }
  0x20   : > { %1466 = vst [vmem:[%s11407_s29 + $0xd8] sm:$0xff] %v1465_v27  ;;  %1468 = vst [vmem:[%s11407_s29 + $0xe0] sm:$0xff] %v1467_v28  ;;  %v1475_v32 = vld [vmem:[%s11399_s28 + $0x700] sm:$0xff]  ;;  %v1477_v33 = vld [vmem:[%s11399_s28 + $0x738] sm:$0xff] }
  0x21   : > { %1470 = vst [vmem:[%s11407_s29 + $0xe8] sm:$0xff] %v1469_v29  ;;  %1472 = vst [vmem:[%s11407_s29 + $0xf0] sm:$0xff] %v1471_v30  ;;  %v1479_v34 = vld [vmem:[%s11399_s28 + $0x770] sm:$0xff]  ;;  %v1481_v35 = vld [vmem:[%s11399_s28 + $0x7a8] sm:$0xff] }
  0x22   : > { %1474 = vst [vmem:[%s11407_s29 + $0xf8] sm:$0xff] %v1473_v31  ;;  %1476 = vst [vmem:[%s11407_s29 + $0x100] sm:$0xff] %v1475_v32  ;;  %v1483_v36 = vld [vmem:[%s11399_s28 + $0x7e0] sm:$0xff]  ;;  %v1485_v37 = vld [vmem:[%s11399_s28 + $0x818] sm:$0xff] }
  0x23   : > { %1478 = vst [vmem:[%s11407_s29 + $0x108] sm:$0xff] %v1477_v33  ;;  %1480 = vst [vmem:[%s11407_s29 + $0x110] sm:$0xff] %v1479_v34  ;;  %v1487_v38 = vld [vmem:[%s11399_s28 + $0x850] sm:$0xff]  ;;  %v1489_v39 = vld [vmem:[%s11399_s28 + $0x888] sm:$0xff] }
  0x24   : > { %1482 = vst [vmem:[%s11407_s29 + $0x118] sm:$0xff] %v1481_v35  ;;  %1484 = vst [vmem:[%s11407_s29 + $0x120] sm:$0xff] %v1483_v36  ;;  %v1491_v40 = vld [vmem:[%s11399_s28 + $0x8c0] sm:$0xff]  ;;  %v1493_v41 = vld [vmem:[%s11399_s28 + $0x8f8] sm:$0xff] }
  0x25   : > { %1486 = vst [vmem:[%s11407_s29 + $0x128] sm:$0xff] %v1485_v37  ;;  %1488 = vst [vmem:[%s11407_s29 + $0x130] sm:$0xff] %v1487_v38  ;;  %v1495_v42 = vld [vmem:[%s11399_s28 + $0x930] sm:$0xff]  ;;  %v1497_v43 = vld [vmem:[%s11399_s28 + $0x968] sm:$0xff] }
  0x26   : > { %1490 = vst [vmem:[%s11407_s29 + $0x138] sm:$0xff] %v1489_v39  ;;  %1492 = vst [vmem:[%s11407_s29 + $0x140] sm:$0xff] %v1491_v40  ;;  %v1499_v44 = vld [vmem:[%s11399_s28 + $0x9a0] sm:$0xff]  ;;  %v1501_v45 = vld [vmem:[%s11399_s28 + $0x9d8] sm:$0xff] }
  0x27   : > { %1494 = vst [vmem:[%s11407_s29 + $0x148] sm:$0xff] %v1493_v41  ;;  %1496 = vst [vmem:[%s11407_s29 + $0x150] sm:$0xff] %v1495_v42  ;;  %v1503_v46 = vld [vmem:[%s11399_s28 + $0xa10] sm:$0xff]  ;;  %v1505_v47 = vld [vmem:[%s11399_s28 + $0xa48] sm:$0xff] }
  0x28   : > { %1498 = vst [vmem:[%s11407_s29 + $0x158] sm:$0xff] %v1497_v43  ;;  %1500 = vst [vmem:[%s11407_s29 + $0x160] sm:$0xff] %v1499_v44  ;;  %v1507_v48 = vld [vmem:[%s11399_s28 + $0xa80] sm:$0xff]  ;;  %v1509_v49 = vld [vmem:[%s11399_s28 + $0xab8] sm:$0xff] }
  0x29   : > { %1502 = vst [vmem:[%s11407_s29 + $0x168] sm:$0xff] %v1501_v45  ;;  %1504 = vst [vmem:[%s11407_s29 + $0x170] sm:$0xff] %v1503_v46  ;;  %v1511_v50 = vld [vmem:[%s11399_s28 + $0xaf0] sm:$0xff]  ;;  %v1513_v51 = vld [vmem:[%s11399_s28 + $0xb28] sm:$0xff] }
  0x2a   : > { %1506 = vst [vmem:[%s11407_s29 + $0x178] sm:$0xff] %v1505_v47  ;;  %1508 = vst [vmem:[%s11407_s29 + $0x180] sm:$0xff] %v1507_v48  ;;  %v1515_v52 = vld [vmem:[%s11399_s28 + $0xb60] sm:$0xff]  ;;  %v1517_v53 = vld [vmem:[%s11399_s28 + $0xb98] sm:$0xff] }
  0x2b   : > { %1510 = vst [vmem:[%s11407_s29 + $0x188] sm:$0xff] %v1509_v49  ;;  %1512 = vst [vmem:[%s11407_s29 + $0x190] sm:$0xff] %v1511_v50  ;;  %v1519_v54 = vld [vmem:[%s11399_s28 + $0xbd0] sm:$0xff]  ;;  %v1521_v55 = vld [vmem:[%s11399_s28 + $0xc08] sm:$0xff] }
  0x2c   : > { %1514 = vst [vmem:[%s11407_s29 + $0x198] sm:$0xff] %v1513_v51  ;;  %1516 = vst [vmem:[%s11407_s29 + $0x1a0] sm:$0xff] %v1515_v52  ;;  %v1523_v56 = vld [vmem:[%s11399_s28 + $0xc40] sm:$0xff]  ;;  %v1525_v57 = vld [vmem:[%s11399_s28 + $0xc78] sm:$0xff] }
  0x2d   : > { %1518 = vst [vmem:[%s11407_s29 + $0x1a8] sm:$0xff] %v1517_v53  ;;  %1520 = vst [vmem:[%s11407_s29 + $0x1b0] sm:$0xff] %v1519_v54  ;;  %v1527_v58 = vld [vmem:[%s11399_s28 + $0xcb0] sm:$0xff]  ;;  %v1529_v59 = vld [vmem:[%s11399_s28 + $0xce8] sm:$0xff] }
  0x2e   : > { %1522 = vst [vmem:[%s11407_s29 + $0x1b8] sm:$0xff] %v1521_v55  ;;  %1524 = vst [vmem:[%s11407_s29 + $0x1c0] sm:$0xff] %v1523_v56  ;;  %v1531_v60 = vld [vmem:[%s11399_s28 + $0xd20] sm:$0xff]  ;;  %v1533_v61 = vld [vmem:[%s11399_s28 + $0xd58] sm:$0xff] }
  0x2f   : > { %1526 = vst [vmem:[%s11407_s29 + $0x1c8] sm:$0xff] %v1525_v57  ;;  %1528 = vst [vmem:[%s11407_s29 + $0x1d0] sm:$0xff] %v1527_v58  ;;  %v1535_v62 = vld [vmem:[%s11399_s28 + $0xd90] sm:$0xff]  ;;  %v1537_v63 = vld [vmem:[%s11399_s28 + $0xdc8] sm:$0xff] }
  0x30   : > { %1530 = vst [vmem:[%s11407_s29 + $0x1d8] sm:$0xff] %v1529_v59  ;;  %1532 = vst [vmem:[%s11407_s29 + $0x1e0] sm:$0xff] %v1531_v60  ;;  %v1539_v0 = vld [vmem:[%s11399_s28 + $0xe00] sm:$0xff]  ;;  %v1541_v1 = vld [vmem:[%s11399_s28 + $0xe38] sm:$0xff] }
  0x31   : > { %1534 = vst [vmem:[%s11407_s29 + $0x1e8] sm:$0xff] %v1533_v61  ;;  %1536 = vst [vmem:[%s11407_s29 + $0x1f0] sm:$0xff] %v1535_v62  ;;  %v1543_v2 = vld [vmem:[%s11399_s28 + $0xe70] sm:$0xff]  ;;  %v1545_v3 = vld [vmem:[%s11399_s28 + $0xea8] sm:$0xff] }
  0x32   : > { %1538 = vst [vmem:[%s11407_s29 + $0x1f8] sm:$0xff] %v1537_v63  ;;  %1540 = vst [vmem:[%s11407_s29 + $0x200] sm:$0xff] %v1539_v0  ;;  %v1547_v4 = vld [vmem:[%s11399_s28 + $0xee0] sm:$0xff]  ;;  %v1549_v5 = vld [vmem:[%s11399_s28 + $0xf18] sm:$0xff] }
  0x33   : > { %1542 = vst [vmem:[%s11407_s29 + $0x208] sm:$0xff] %v1541_v1  ;;  %1544 = vst [vmem:[%s11407_s29 + $0x210] sm:$0xff] %v1543_v2  ;;  %v1551_v6 = vld [vmem:[%s11399_s28 + $0xf50] sm:$0xff]  ;;  %v1553_v7 = vld [vmem:[%s11399_s28 + $0xf88] sm:$0xff] }
  0x34   : > { %1546 = vst [vmem:[%s11407_s29 + $0x218] sm:$0xff] %v1545_v3  ;;  %1548 = vst [vmem:[%s11407_s29 + $0x220] sm:$0xff] %v1547_v4  ;;  %v1555_v8 = vld [vmem:[%s11399_s28 + $0xfc0] sm:$0xff]  ;;  %v1557_v9 = vld [vmem:[%s11399_s28 + $0xff8] sm:$0xff] }
  0x35   : > { %1550 = vst [vmem:[%s11407_s29 + $0x228] sm:$0xff] %v1549_v5  ;;  %1552 = vst [vmem:[%s11407_s29 + $0x230] sm:$0xff] %v1551_v6  ;;  %v1559_v10 = vld [vmem:[%s11399_s28 + $0x1030] sm:$0xff]  ;;  %v1561_v11 = vld [vmem:[%s11399_s28 + $0x1068] sm:$0xff] }
  0x36   : > { %1554 = vst [vmem:[%s11407_s29 + $0x238] sm:$0xff] %v1553_v7  ;;  %1556 = vst [vmem:[%s11407_s29 + $0x240] sm:$0xff] %v1555_v8  ;;  %v1563_v12 = vld [vmem:[%s11399_s28 + $0x10a0] sm:$0xff]  ;;  %v1565_v13 = vld [vmem:[%s11399_s28 + $0x10d8] sm:$0xff] }
  0x37   : > { %1558 = vst [vmem:[%s11407_s29 + $0x248] sm:$0xff] %v1557_v9  ;;  %1560 = vst [vmem:[%s11407_s29 + $0x250] sm:$0xff] %v1559_v10  ;;  %v1567_v14 = vld [vmem:[%s11399_s28 + $0x1110] sm:$0xff]  ;;  %v1569_v15 = vld [vmem:[%s11399_s28 + $0x1148] sm:$0xff] }
  0x38   : > { %1562 = vst [vmem:[%s11407_s29 + $0x258] sm:$0xff] %v1561_v11  ;;  %1564 = vst [vmem:[%s11407_s29 + $0x260] sm:$0xff] %v1563_v12  ;;  %v1571_v16 = vld [vmem:[%s11399_s28 + $0x1180] sm:$0xff]  ;;  %v1573_v17 = vld [vmem:[%s11399_s28 + $0x11b8] sm:$0xff] }
  0x39   : > { %1566 = vst [vmem:[%s11407_s29 + $0x268] sm:$0xff] %v1565_v13  ;;  %1568 = vst [vmem:[%s11407_s29 + $0x270] sm:$0xff] %v1567_v14  ;;  %v1575_v18 = vld [vmem:[%s11399_s28 + $0x11f0] sm:$0xff]  ;;  %v1577_v19 = vld [vmem:[%s11399_s28 + $0x1228] sm:$0xff] }
  0x3a   : > { %1570 = vst [vmem:[%s11407_s29 + $0x278] sm:$0xff] %v1569_v15  ;;  %1572 = vst [vmem:[%s11407_s29 + $0x280] sm:$0xff] %v1571_v16  ;;  %v1579_v20 = vld [vmem:[%s11399_s28 + $0x1260] sm:$0xff]  ;;  %v1581_v21 = vld [vmem:[%s11399_s28 + $0x1298] sm:$0xff] }
  0x3b   : > { %1574 = vst [vmem:[%s11407_s29 + $0x288] sm:$0xff] %v1573_v17  ;;  %1576 = vst [vmem:[%s11407_s29 + $0x290] sm:$0xff] %v1575_v18  ;;  %v1583_v22 = vld [vmem:[%s11399_s28 + $0x12d0] sm:$0xff]  ;;  %v1585_v23 = vld [vmem:[%s11399_s28 + $0x1308] sm:$0xff] }
  0x3c   : > { %1578 = vst [vmem:[%s11407_s29 + $0x298] sm:$0xff] %v1577_v19  ;;  %1580 = vst [vmem:[%s11407_s29 + $0x2a0] sm:$0xff] %v1579_v20  ;;  %v1587_v24 = vld [vmem:[%s11399_s28 + $0x1340] sm:$0xff]  ;;  %v1589_v25 = vld [vmem:[%s11399_s28 + $0x1378] sm:$0xff] }
  0x3d   : > { %1582 = vst [vmem:[%s11407_s29 + $0x2a8] sm:$0xff] %v1581_v21  ;;  %1584 = vst [vmem:[%s11407_s29 + $0x2b0] sm:$0xff] %v1583_v22  ;;  %v1591_v26 = vld [vmem:[%s11399_s28 + $0x13b0] sm:$0xff]  ;;  %v1593_v27 = vld [vmem:[%s11399_s28 + $0x13e8] sm:$0xff] }
  0x3e   : > { %1586 = vst [vmem:[%s11407_s29 + $0x2b8] sm:$0xff] %v1585_v23  ;;  %1588 = vst [vmem:[%s11407_s29 + $0x2c0] sm:$0xff] %v1587_v24  ;;  %v1595_v28 = vld [vmem:[%s11399_s28 + $0x1420] sm:$0xff]  ;;  %v1597_v29 = vld [vmem:[%s11399_s28 + $0x1458] sm:$0xff] }
  0x3f   : > { %1590 = vst [vmem:[%s11407_s29 + $0x2c8] sm:$0xff] %v1589_v25  ;;  %1592 = vst [vmem:[%s11407_s29 + $0x2d0] sm:$0xff] %v1591_v26  ;;  %v1599_v30 = vld [vmem:[%s11399_s28 + $0x1490] sm:$0xff]  ;;  %v1601_v31 = vld [vmem:[%s11399_s28 + $0x14c8] sm:$0xff] }
  0x40   : > { %1594 = vst [vmem:[%s11407_s29 + $0x2d8] sm:$0xff] %v1593_v27  ;;  %1596 = vst [vmem:[%s11407_s29 + $0x2e0] sm:$0xff] %v1595_v28  ;;  %v1603_v32 = vld [vmem:[%s11399_s28 + $0x1500] sm:$0xff]  ;;  %v1605_v33 = vld [vmem:[%s11399_s28 + $0x1538] sm:$0xff] }
  0x41   : > { %1598 = vst [vmem:[%s11407_s29 + $0x2e8] sm:$0xff] %v1597_v29  ;;  %1600 = vst [vmem:[%s11407_s29 + $0x2f0] sm:$0xff] %v1599_v30  ;;  %v1607_v34 = vld [vmem:[%s11399_s28 + $0x1570] sm:$0xff]  ;;  %v1609_v35 = vld [vmem:[%s11399_s28 + $0x15a8] sm:$0xff] }
  0x42   : > { %1602 = vst [vmem:[%s11407_s29 + $0x2f8] sm:$0xff] %v1601_v31  ;;  %1604 = vst [vmem:[%s11407_s29 + $0x300] sm:$0xff] %v1603_v32  ;;  %v1611_v36 = vld [vmem:[%s11399_s28 + $0x15e0] sm:$0xff]  ;;  %v1613_v37 = vld [vmem:[%s11399_s28 + $0x1618] sm:$0xff] }
  0x43   : > { %1606 = vst [vmem:[%s11407_s29 + $0x308] sm:$0xff] %v1605_v33  ;;  %1608 = vst [vmem:[%s11407_s29 + $0x310] sm:$0xff] %v1607_v34  ;;  %v1615_v38 = vld [vmem:[%s11399_s28 + $0x1650] sm:$0xff]  ;;  %v1617_v39 = vld [vmem:[%s11399_s28 + $0x1688] sm:$0xff] }
  0x44   : > { %1610 = vst [vmem:[%s11407_s29 + $0x318] sm:$0xff] %v1609_v35  ;;  %1612 = vst [vmem:[%s11407_s29 + $0x320] sm:$0xff] %v1611_v36  ;;  %v1619_v40 = vld [vmem:[%s11399_s28 + $0x16c0] sm:$0xff]  ;;  %v1621_v41 = vld [vmem:[%s11399_s28 + $0x16f8] sm:$0xff] }
  0x45   : > { %1614 = vst [vmem:[%s11407_s29 + $0x328] sm:$0xff] %v1613_v37  ;;  %1616 = vst [vmem:[%s11407_s29 + $0x330] sm:$0xff] %v1615_v38  ;;  %v1623_v42 = vld [vmem:[%s11399_s28 + $0x1730] sm:$0xff]  ;;  %v1625_v43 = vld [vmem:[%s11399_s28 + $0x1768] sm:$0xff] }
  0x46   : > { %1618 = vst [vmem:[%s11407_s29 + $0x338] sm:$0xff] %v1617_v39  ;;  %1620 = vst [vmem:[%s11407_s29 + $0x340] sm:$0xff] %v1619_v40  ;;  %v1627_v44 = vld [vmem:[%s11399_s28 + $0x17a0] sm:$0xff]  ;;  %v1629_v45 = vld [vmem:[%s11399_s28 + $0x17d8] sm:$0xff] }
  0x47   : > { %1622 = vst [vmem:[%s11407_s29 + $0x348] sm:$0xff] %v1621_v41  ;;  %1624 = vst [vmem:[%s11407_s29 + $0x350] sm:$0xff] %v1623_v42  ;;  %v1631_v46 = vld [vmem:[%s11399_s28 + $0x1810] sm:$0xff]  ;;  %v1633_v47 = vld [vmem:[%s11399_s28 + $0x1848] sm:$0xff] }
  0x48   : > { %1626 = vst [vmem:[%s11407_s29 + $0x358] sm:$0xff] %v1625_v43  ;;  %1628 = vst [vmem:[%s11407_s29 + $0x360] sm:$0xff] %v1627_v44  ;;  %v1635_v48 = vld [vmem:[%s11399_s28 + $0x1880] sm:$0xff]  ;;  %v1637_v49 = vld [vmem:[%s11399_s28 + $0x18b8] sm:$0xff] }
  0x49   : > { %1630 = vst [vmem:[%s11407_s29 + $0x368] sm:$0xff] %v1629_v45  ;;  %1632 = vst [vmem:[%s11407_s29 + $0x370] sm:$0xff] %v1631_v46  ;;  %v1639_v50 = vld [vmem:[%s11399_s28 + $0x18f0] sm:$0xff]  ;;  %v1641_v51 = vld [vmem:[%s11399_s28 + $0x1928] sm:$0xff] }
  0x4a   : > { %1634 = vst [vmem:[%s11407_s29 + $0x378] sm:$0xff] %v1633_v47  ;;  %1636 = vst [vmem:[%s11407_s29 + $0x380] sm:$0xff] %v1635_v48  ;;  %v1643_v52 = vld [vmem:[%s11399_s28 + $0x1960] sm:$0xff]  ;;  %v1645_v53 = vld [vmem:[%s11399_s28 + $0x1998] sm:$0xff] }
  0x4b   : > { %1638 = vst [vmem:[%s11407_s29 + $0x388] sm:$0xff] %v1637_v49  ;;  %1640 = vst [vmem:[%s11407_s29 + $0x390] sm:$0xff] %v1639_v50  ;;  %v1647_v54 = vld [vmem:[%s11399_s28 + $0x19d0] sm:$0xff]  ;;  %v1649_v55 = vld [vmem:[%s11399_s28 + $0x1a08] sm:$0xff] }
  0x4c   : > { %1642 = vst [vmem:[%s11407_s29 + $0x398] sm:$0xff] %v1641_v51  ;;  %1644 = vst [vmem:[%s11407_s29 + $0x3a0] sm:$0xff] %v1643_v52  ;;  %v1651_v56 = vld [vmem:[%s11399_s28 + $0x1a40] sm:$0xff]  ;;  %v1653_v57 = vld [vmem:[%s11399_s28 + $0x1a78] sm:$0xff] }
  0x4d   : > { %1646 = vst [vmem:[%s11407_s29 + $0x3a8] sm:$0xff] %v1645_v53  ;;  %1648 = vst [vmem:[%s11407_s29 + $0x3b0] sm:$0xff] %v1647_v54  ;;  %v1655_v58 = vld [vmem:[%s11399_s28 + $0x1ab0] sm:$0xff]  ;;  %v1657_v59 = vld [vmem:[%s11399_s28 + $0x1ae8] sm:$0xff] }
  0x4e   : > { %1650 = vst [vmem:[%s11407_s29 + $0x3b8] sm:$0xff] %v1649_v55  ;;  %1652 = vst [vmem:[%s11407_s29 + $0x3c0] sm:$0xff] %v1651_v56  ;;  %v1659_v60 = vld [vmem:[%s11399_s28 + $0x1b20] sm:$0xff]  ;;  %v1661_v61 = vld [vmem:[%s11399_s28 + $0x1b58] sm:$0xff] }
  0x4f   : > { %1654 = vst [vmem:[%s11407_s29 + $0x3c8] sm:$0xff] %v1653_v57  ;;  %1656 = vst [vmem:[%s11407_s29 + $0x3d0] sm:$0xff] %v1655_v58  ;;  %v1663_v62 = vld [vmem:[%s11399_s28 + $0x1b90] sm:$0xff]  ;;  %v1665_v63 = vld [vmem:[%s11399_s28 + $0x1bc8] sm:$0xff] }
  0x50   : > { %1658 = vst [vmem:[%s11407_s29 + $0x3d8] sm:$0xff] %v1657_v59  ;;  %1660 = vst [vmem:[%s11407_s29 + $0x3e0] sm:$0xff] %v1659_v60  ;;  %v1667_v0 = vld [vmem:[%s11399_s28 + $0x1c00] sm:$0xff]  ;;  %v1669_v1 = vld [vmem:[%s11399_s28 + $0x1c38] sm:$0xff] }
  0x51   : > { %1662 = vst [vmem:[%s11407_s29 + $0x3e8] sm:$0xff] %v1661_v61  ;;  %1664 = vst [vmem:[%s11407_s29 + $0x3f0] sm:$0xff] %v1663_v62  ;;  %v1671_v2 = vld [vmem:[%s11399_s28 + $0x1c70] sm:$0xff]  ;;  %v1673_v3 = vld [vmem:[%s11399_s28 + $0x1ca8] sm:$0xff] }
  0x52   : > { %1666 = vst [vmem:[%s11407_s29 + $0x3f8] sm:$0xff] %v1665_v63  ;;  %1668 = vst [vmem:[%s11407_s29 + $0x400] sm:$0xff] %v1667_v0  ;;  %v1675_v4 = vld [vmem:[%s11399_s28 + $0x1ce0] sm:$0xff]  ;;  %v1677_v5 = vld [vmem:[%s11399_s28 + $0x1d18] sm:$0xff] }
  0x53   : > { %1670 = vst [vmem:[%s11407_s29 + $0x408] sm:$0xff] %v1669_v1  ;;  %1672 = vst [vmem:[%s11407_s29 + $0x410] sm:$0xff] %v1671_v2  ;;  %v1679_v6 = vld [vmem:[%s11399_s28 + $0x1d50] sm:$0xff]  ;;  %v1681_v7 = vld [vmem:[%s11399_s28 + $0x1d88] sm:$0xff] }
  0x54   : > { %1674 = vst [vmem:[%s11407_s29 + $0x418] sm:$0xff] %v1673_v3  ;;  %1676 = vst [vmem:[%s11407_s29 + $0x420] sm:$0xff] %v1675_v4  ;;  %v1683_v8 = vld [vmem:[%s11399_s28 + $0x1dc0] sm:$0xff]  ;;  %v1685_v9 = vld [vmem:[%s11399_s28 + $0x1df8] sm:$0xff] }
  0x55   : > { %1678 = vst [vmem:[%s11407_s29 + $0x428] sm:$0xff] %v1677_v5  ;;  %1680 = vst [vmem:[%s11407_s29 + $0x430] sm:$0xff] %v1679_v6  ;;  %v1687_v10 = vld [vmem:[%s11399_s28 + $0x1e30] sm:$0xff]  ;;  %v1689_v11 = vld [vmem:[%s11399_s28 + $0x1e68] sm:$0xff] }
  0x56   : > { %1682 = vst [vmem:[%s11407_s29 + $0x438] sm:$0xff] %v1681_v7  ;;  %1684 = vst [vmem:[%s11407_s29 + $0x440] sm:$0xff] %v1683_v8  ;;  %v1691_v12 = vld [vmem:[%s11399_s28 + $0x1ea0] sm:$0xff]  ;;  %v1693_v13 = vld [vmem:[%s11399_s28 + $0x1ed8] sm:$0xff] }
  0x57   : > { %1686 = vst [vmem:[%s11407_s29 + $0x448] sm:$0xff] %v1685_v9  ;;  %1688 = vst [vmem:[%s11407_s29 + $0x450] sm:$0xff] %v1687_v10  ;;  %v1695_v14 = vld [vmem:[%s11399_s28 + $0x1f10] sm:$0xff]  ;;  %v1697_v15 = vld [vmem:[%s11399_s28 + $0x1f48] sm:$0xff] }
  0x58   : > { %1690 = vst [vmem:[%s11407_s29 + $0x458] sm:$0xff] %v1689_v11  ;;  %1692 = vst [vmem:[%s11407_s29 + $0x460] sm:$0xff] %v1691_v12  ;;  %v1699_v16 = vld [vmem:[%s11399_s28 + $0x1f80] sm:$0xff]  ;;  %v1701_v17 = vld [vmem:[%s11399_s28 + $0x1fb8] sm:$0xff] }
  0x59   : > { %1694 = vst [vmem:[%s11407_s29 + $0x468] sm:$0xff] %v1693_v13  ;;  %1696 = vst [vmem:[%s11407_s29 + $0x470] sm:$0xff] %v1695_v14  ;;  %v1703_v18 = vld [vmem:[%s11399_s28 + $0x1ff0] sm:$0xff]  ;;  %v1705_v19 = vld [vmem:[%s11399_s28 + $0x2028] sm:$0xff] }
  0x5a   : > { %1698 = vst [vmem:[%s11407_s29 + $0x478] sm:$0xff] %v1697_v15  ;;  %1700 = vst [vmem:[%s11407_s29 + $0x480] sm:$0xff] %v1699_v16  ;;  %v1707_v20 = vld [vmem:[%s11399_s28 + $0x2060] sm:$0xff]  ;;  %v1709_v21 = vld [vmem:[%s11399_s28 + $0x2098] sm:$0xff] }
  0x5b   : > { %1702 = vst [vmem:[%s11407_s29 + $0x488] sm:$0xff] %v1701_v17  ;;  %1704 = vst [vmem:[%s11407_s29 + $0x490] sm:$0xff] %v1703_v18  ;;  %v1711_v22 = vld [vmem:[%s11399_s28 + $0x20d0] sm:$0xff]  ;;  %v1713_v23 = vld [vmem:[%s11399_s28 + $0x2108] sm:$0xff] }
  0x5c   : > { %1706 = vst [vmem:[%s11407_s29 + $0x498] sm:$0xff] %v1705_v19  ;;  %1708 = vst [vmem:[%s11407_s29 + $0x4a0] sm:$0xff] %v1707_v20  ;;  %v1715_v24 = vld [vmem:[%s11399_s28 + $0x2140] sm:$0xff]  ;;  %v1717_v25 = vld [vmem:[%s11399_s28 + $0x2178] sm:$0xff] }
  0x5d   : > { %1710 = vst [vmem:[%s11407_s29 + $0x4a8] sm:$0xff] %v1709_v21  ;;  %1712 = vst [vmem:[%s11407_s29 + $0x4b0] sm:$0xff] %v1711_v22  ;;  %v1719_v26 = vld [vmem:[%s11399_s28 + $0x21b0] sm:$0xff]  ;;  %v1721_v27 = vld [vmem:[%s11399_s28 + $0x21e8] sm:$0xff] }
  0x5e   : > { %1714 = vst [vmem:[%s11407_s29 + $0x4b8] sm:$0xff] %v1713_v23  ;;  %1716 = vst [vmem:[%s11407_s29 + $0x4c0] sm:$0xff] %v1715_v24  ;;  %v1723_v28 = vld [vmem:[%s11399_s28 + $0x2220] sm:$0xff]  ;;  %v1725_v29 = vld [vmem:[%s11399_s28 + $0x2258] sm:$0xff] }
  0x5f   : > { %1718 = vst [vmem:[%s11407_s29 + $0x4c8] sm:$0xff] %v1717_v25  ;;  %1720 = vst [vmem:[%s11407_s29 + $0x4d0] sm:$0xff] %v1719_v26  ;;  %v1727_v30 = vld [vmem:[%s11399_s28 + $0x2290] sm:$0xff]  ;;  %v1729_v31 = vld [vmem:[%s11399_s28 + $0x22c8] sm:$0xff] }
  0x60   : > { %1722 = vst [vmem:[%s11407_s29 + $0x4d8] sm:$0xff] %v1721_v27  ;;  %1724 = vst [vmem:[%s11407_s29 + $0x4e0] sm:$0xff] %v1723_v28  ;;  %v1731_v32 = vld [vmem:[%s11399_s28 + $0x2300] sm:$0xff]  ;;  %v1733_v33 = vld [vmem:[%s11399_s28 + $0x2338] sm:$0xff] }
  0x61   : > { %1726 = vst [vmem:[%s11407_s29 + $0x4e8] sm:$0xff] %v1725_v29  ;;  %1728 = vst [vmem:[%s11407_s29 + $0x4f0] sm:$0xff] %v1727_v30  ;;  %v1735_v34 = vld [vmem:[%s11399_s28 + $0x2370] sm:$0xff]  ;;  %v1737_v35 = vld [vmem:[%s11399_s28 + $0x23a8] sm:$0xff] }
  0x62   : > { %1730 = vst [vmem:[%s11407_s29 + $0x4f8] sm:$0xff] %v1729_v31  ;;  %1732 = vst [vmem:[%s11407_s29 + $0x500] sm:$0xff] %v1731_v32  ;;  %v1739_v36 = vld [vmem:[%s11399_s28 + $0x23e0] sm:$0xff]  ;;  %v1741_v37 = vld [vmem:[%s11399_s28 + $0x2418] sm:$0xff] }
  0x63   : > { %1734 = vst [vmem:[%s11407_s29 + $0x508] sm:$0xff] %v1733_v33  ;;  %1736 = vst [vmem:[%s11407_s29 + $0x510] sm:$0xff] %v1735_v34  ;;  %v1743_v38 = vld [vmem:[%s11399_s28 + $0x2450] sm:$0xff]  ;;  %v1745_v39 = vld [vmem:[%s11399_s28 + $0x2488] sm:$0xff] }
  0x64   : > { %1738 = vst [vmem:[%s11407_s29 + $0x518] sm:$0xff] %v1737_v35  ;;  %1740 = vst [vmem:[%s11407_s29 + $0x520] sm:$0xff] %v1739_v36  ;;  %v1747_v40 = vld [vmem:[%s11399_s28 + $0x24c0] sm:$0xff]  ;;  %v1749_v41 = vld [vmem:[%s11399_s28 + $0x24f8] sm:$0xff] }
  0x65   : > { %1742 = vst [vmem:[%s11407_s29 + $0x528] sm:$0xff] %v1741_v37  ;;  %1744 = vst [vmem:[%s11407_s29 + $0x530] sm:$0xff] %v1743_v38  ;;  %v1751_v42 = vld [vmem:[%s11399_s28 + $0x2530] sm:$0xff]  ;;  %v1753_v43 = vld [vmem:[%s11399_s28 + $0x2568] sm:$0xff] }
  0x66   : > { %1746 = vst [vmem:[%s11407_s29 + $0x538] sm:$0xff] %v1745_v39  ;;  %1748 = vst [vmem:[%s11407_s29 + $0x540] sm:$0xff] %v1747_v40  ;;  %v1755_v44 = vld [vmem:[%s11399_s28 + $0x25a0] sm:$0xff]  ;;  %v1757_v45 = vld [vmem:[%s11399_s28 + $0x25d8] sm:$0xff] }
  0x67   : > { %1750 = vst [vmem:[%s11407_s29 + $0x548] sm:$0xff] %v1749_v41  ;;  %1752 = vst [vmem:[%s11407_s29 + $0x550] sm:$0xff] %v1751_v42  ;;  %v1759_v46 = vld [vmem:[%s11399_s28 + $0x2610] sm:$0xff]  ;;  %v1761_v47 = vld [vmem:[%s11399_s28 + $0x2648] sm:$0xff] }
  0x68   : > { %1754 = vst [vmem:[%s11407_s29 + $0x558] sm:$0xff] %v1753_v43  ;;  %1756 = vst [vmem:[%s11407_s29 + $0x560] sm:$0xff] %v1755_v44  ;;  %v1763_v48 = vld [vmem:[%s11399_s28 + $0x2680] sm:$0xff]  ;;  %v1765_v49 = vld [vmem:[%s11399_s28 + $0x26b8] sm:$0xff] }
  0x69   : > { %1758 = vst [vmem:[%s11407_s29 + $0x568] sm:$0xff] %v1757_v45  ;;  %1760 = vst [vmem:[%s11407_s29 + $0x570] sm:$0xff] %v1759_v46  ;;  %v1767_v50 = vld [vmem:[%s11399_s28 + $0x26f0] sm:$0xff]  ;;  %v1769_v51 = vld [vmem:[%s11399_s28 + $0x2728] sm:$0xff] }
  0x6a   : > { %1762 = vst [vmem:[%s11407_s29 + $0x578] sm:$0xff] %v1761_v47  ;;  %1764 = vst [vmem:[%s11407_s29 + $0x580] sm:$0xff] %v1763_v48  ;;  %v1771_v52 = vld [vmem:[%s11399_s28 + $0x2760] sm:$0xff]  ;;  %v1773_v53 = vld [vmem:[%s11399_s28 + $0x2798] sm:$0xff] }
  0x6b   : > { %1766 = vst [vmem:[%s11407_s29 + $0x588] sm:$0xff] %v1765_v49  ;;  %1768 = vst [vmem:[%s11407_s29 + $0x590] sm:$0xff] %v1767_v50  ;;  %v1775_v54 = vld [vmem:[%s11399_s28 + $0x27d0] sm:$0xff]  ;;  %v1777_v55 = vld [vmem:[%s11399_s28 + $0x2808] sm:$0xff] }
  0x6c   : > { %1770 = vst [vmem:[%s11407_s29 + $0x598] sm:$0xff] %v1769_v51  ;;  %1772 = vst [vmem:[%s11407_s29 + $0x5a0] sm:$0xff] %v1771_v52  ;;  %v1779_v56 = vld [vmem:[%s11399_s28 + $0x2840] sm:$0xff]  ;;  %v1781_v57 = vld [vmem:[%s11399_s28 + $0x2878] sm:$0xff] }
  0x6d   : > { %1774 = vst [vmem:[%s11407_s29 + $0x5a8] sm:$0xff] %v1773_v53  ;;  %1776 = vst [vmem:[%s11407_s29 + $0x5b0] sm:$0xff] %v1775_v54  ;;  %v1783_v58 = vld [vmem:[%s11399_s28 + $0x28b0] sm:$0xff]  ;;  %v1785_v59 = vld [vmem:[%s11399_s28 + $0x28e8] sm:$0xff] }
  0x6e   : > { %1778 = vst [vmem:[%s11407_s29 + $0x5b8] sm:$0xff] %v1777_v55  ;;  %1780 = vst [vmem:[%s11407_s29 + $0x5c0] sm:$0xff] %v1779_v56  ;;  %v1787_v60 = vld [vmem:[%s11399_s28 + $0x2920] sm:$0xff]  ;;  %v1789_v61 = vld [vmem:[%s11399_s28 + $0x2958] sm:$0xff] }
  0x6f   : > { %1782 = vst [vmem:[%s11407_s29 + $0x5c8] sm:$0xff] %v1781_v57  ;;  %1784 = vst [vmem:[%s11407_s29 + $0x5d0] sm:$0xff] %v1783_v58  ;;  %v1791_v62 = vld [vmem:[%s11399_s28 + $0x2990] sm:$0xff]  ;;  %v1793_v63 = vld [vmem:[%s11399_s28 + $0x29c8] sm:$0xff] }
  0x70   : > { %1786 = vst [vmem:[%s11407_s29 + $0x5d8] sm:$0xff] %v1785_v59  ;;  %1788 = vst [vmem:[%s11407_s29 + $0x5e0] sm:$0xff] %v1787_v60  ;;  %v1795_v0 = vld [vmem:[%s11399_s28 + $0x2a00] sm:$0xff]  ;;  %v1797_v1 = vld [vmem:[%s11399_s28 + $0x2a38] sm:$0xff] }
  0x71   : > { %1790 = vst [vmem:[%s11407_s29 + $0x5e8] sm:$0xff] %v1789_v61  ;;  %1792 = vst [vmem:[%s11407_s29 + $0x5f0] sm:$0xff] %v1791_v62  ;;  %v1799_v2 = vld [vmem:[%s11399_s28 + $0x2a70] sm:$0xff]  ;;  %v1801_v3 = vld [vmem:[%s11399_s28 + $0x2aa8] sm:$0xff] }
  0x72   : > { %1794 = vst [vmem:[%s11407_s29 + $0x5f8] sm:$0xff] %v1793_v63  ;;  %1796 = vst [vmem:[%s11407_s29 + $0x600] sm:$0xff] %v1795_v0  ;;  %v1803_v4 = vld [vmem:[%s11399_s28 + $0x2ae0] sm:$0xff]  ;;  %v1805_v5 = vld [vmem:[%s11399_s28 + $0x2b18] sm:$0xff] }
  0x73   : > { %1798 = vst [vmem:[%s11407_s29 + $0x608] sm:$0xff] %v1797_v1  ;;  %1800 = vst [vmem:[%s11407_s29 + $0x610] sm:$0xff] %v1799_v2  ;;  %v1807_v6 = vld [vmem:[%s11399_s28 + $0x2b50] sm:$0xff]  ;;  %v1809_v7 = vld [vmem:[%s11399_s28 + $0x2b88] sm:$0xff] }
  0x74   : > { %1802 = vst [vmem:[%s11407_s29 + $0x618] sm:$0xff] %v1801_v3  ;;  %1804 = vst [vmem:[%s11407_s29 + $0x620] sm:$0xff] %v1803_v4  ;;  %v1811_v8 = vld [vmem:[%s11399_s28 + $0x2bc0] sm:$0xff]  ;;  %v1813_v9 = vld [vmem:[%s11399_s28 + $0x2bf8] sm:$0xff] }
  0x75   : > { %1806 = vst [vmem:[%s11407_s29 + $0x628] sm:$0xff] %v1805_v5  ;;  %1808 = vst [vmem:[%s11407_s29 + $0x630] sm:$0xff] %v1807_v6  ;;  %v1815_v10 = vld [vmem:[%s11399_s28 + $0x2c30] sm:$0xff]  ;;  %v1817_v11 = vld [vmem:[%s11399_s28 + $0x2c68] sm:$0xff] }
  0x76   : > { %1810 = vst [vmem:[%s11407_s29 + $0x638] sm:$0xff] %v1809_v7  ;;  %1812 = vst [vmem:[%s11407_s29 + $0x640] sm:$0xff] %v1811_v8  ;;  %v1819_v12 = vld [vmem:[%s11399_s28 + $0x2ca0] sm:$0xff]  ;;  %v1821_v13 = vld [vmem:[%s11399_s28 + $0x2cd8] sm:$0xff] }
  0x77   : > { %1814 = vst [vmem:[%s11407_s29 + $0x648] sm:$0xff] %v1813_v9  ;;  %1816 = vst [vmem:[%s11407_s29 + $0x650] sm:$0xff] %v1815_v10  ;;  %v1823_v14 = vld [vmem:[%s11399_s28 + $0x2d10] sm:$0xff]  ;;  %v1825_v15 = vld [vmem:[%s11399_s28 + $0x2d48] sm:$0xff] }
  0x78   : > { %1818 = vst [vmem:[%s11407_s29 + $0x658] sm:$0xff] %v1817_v11  ;;  %1820 = vst [vmem:[%s11407_s29 + $0x660] sm:$0xff] %v1819_v12  ;;  %v1827_v16 = vld [vmem:[%s11399_s28 + $0x2d80] sm:$0xff]  ;;  %v1829_v17 = vld [vmem:[%s11399_s28 + $0x2db8] sm:$0xff] }
  0x79   : > { %1822 = vst [vmem:[%s11407_s29 + $0x668] sm:$0xff] %v1821_v13  ;;  %1824 = vst [vmem:[%s11407_s29 + $0x670] sm:$0xff] %v1823_v14  ;;  %v1831_v18 = vld [vmem:[%s11399_s28 + $0x2df0] sm:$0xff]  ;;  %v1833_v19 = vld [vmem:[%s11399_s28 + $0x2e28] sm:$0xff] }
  0x7a   : > { %1826 = vst [vmem:[%s11407_s29 + $0x678] sm:$0xff] %v1825_v15  ;;  %1828 = vst [vmem:[%s11407_s29 + $0x680] sm:$0xff] %v1827_v16  ;;  %v1835_v20 = vld [vmem:[%s11399_s28 + $0x2e60] sm:$0xff]  ;;  %v1837_v21 = vld [vmem:[%s11399_s28 + $0x2e98] sm:$0xff] }
  0x7b   : > { %1830 = vst [vmem:[%s11407_s29 + $0x688] sm:$0xff] %v1829_v17  ;;  %1832 = vst [vmem:[%s11407_s29 + $0x690] sm:$0xff] %v1831_v18  ;;  %v1839_v22 = vld [vmem:[%s11399_s28 + $0x2ed0] sm:$0xff]  ;;  %v1841_v23 = vld [vmem:[%s11399_s28 + $0x2f08] sm:$0xff] }
  0x7c   : > { %1834 = vst [vmem:[%s11407_s29 + $0x698] sm:$0xff] %v1833_v19  ;;  %1836 = vst [vmem:[%s11407_s29 + $0x6a0] sm:$0xff] %v1835_v20  ;;  %v1843_v24 = vld [vmem:[%s11399_s28 + $0x2f40] sm:$0xff]  ;;  %v1845_v25 = vld [vmem:[%s11399_s28 + $0x2f78] sm:$0xff] }
  0x7d   : > { %1838 = vst [vmem:[%s11407_s29 + $0x6a8] sm:$0xff] %v1837_v21  ;;  %1840 = vst [vmem:[%s11407_s29 + $0x6b0] sm:$0xff] %v1839_v22  ;;  %v1847_v26 = vld [vmem:[%s11399_s28 + $0x2fb0] sm:$0xff]  ;;  %v1849_v27 = vld [vmem:[%s11399_s28 + $0x2fe8] sm:$0xff] }
  0x7e   : > { %1842 = vst [vmem:[%s11407_s29 + $0x6b8] sm:$0xff] %v1841_v23  ;;  %1844 = vst [vmem:[%s11407_s29 + $0x6c0] sm:$0xff] %v1843_v24  ;;  %v1851_v28 = vld [vmem:[%s11399_s28 + $0x3020] sm:$0xff]  ;;  %v1853_v29 = vld [vmem:[%s11399_s28 + $0x3058] sm:$0xff] }
  0x7f   : > { %1846 = vst [vmem:[%s11407_s29 + $0x6c8] sm:$0xff] %v1845_v25  ;;  %1848 = vst [vmem:[%s11407_s29 + $0x6d0] sm:$0xff] %v1847_v26  ;;  %v1855_v30 = vld [vmem:[%s11399_s28 + $0x3090] sm:$0xff]  ;;  %v1857_v31 = vld [vmem:[%s11399_s28 + $0x30c8] sm:$0xff] }
  0x80   : > { %1850 = vst [vmem:[%s11407_s29 + $0x6d8] sm:$0xff] %v1849_v27  ;;  %1852 = vst [vmem:[%s11407_s29 + $0x6e0] sm:$0xff] %v1851_v28  ;;  %v1859_v32 = vld [vmem:[%s11399_s28 + $0x3100] sm:$0xff]  ;;  %v1861_v33 = vld [vmem:[%s11399_s28 + $0x3138] sm:$0xff] }
  0x81   : > { %1854 = vst [vmem:[%s11407_s29 + $0x6e8] sm:$0xff] %v1853_v29  ;;  %1856 = vst [vmem:[%s11407_s29 + $0x6f0] sm:$0xff] %v1855_v30  ;;  %v1863_v34 = vld [vmem:[%s11399_s28 + $0x3170] sm:$0xff]  ;;  %v1865_v35 = vld [vmem:[%s11399_s28 + $0x31a8] sm:$0xff] }
  0x82   : > { %1858 = vst [vmem:[%s11407_s29 + $0x6f8] sm:$0xff] %v1857_v31  ;;  %1860 = vst [vmem:[%s11407_s29 + $0x700] sm:$0xff] %v1859_v32  ;;  %v1867_v36 = vld [vmem:[%s11399_s28 + $0x31e0] sm:$0xff]  ;;  %v1869_v37 = vld [vmem:[%s11399_s28 + $0x3218] sm:$0xff] }
  0x83   : > { %1862 = vst [vmem:[%s11407_s29 + $0x708] sm:$0xff] %v1861_v33  ;;  %1864 = vst [vmem:[%s11407_s29 + $0x710] sm:$0xff] %v1863_v34  ;;  %v1871_v38 = vld [vmem:[%s11399_s28 + $0x3250] sm:$0xff]  ;;  %v1873_v39 = vld [vmem:[%s11399_s28 + $0x3288] sm:$0xff] }
  0x84   : > { %1866 = vst [vmem:[%s11407_s29 + $0x718] sm:$0xff] %v1865_v35  ;;  %1868 = vst [vmem:[%s11407_s29 + $0x720] sm:$0xff] %v1867_v36  ;;  %v1875_v40 = vld [vmem:[%s11399_s28 + $0x32c0] sm:$0xff]  ;;  %v1877_v41 = vld [vmem:[%s11399_s28 + $0x32f8] sm:$0xff] }
  0x85   : > { %1870 = vst [vmem:[%s11407_s29 + $0x728] sm:$0xff] %v1869_v37  ;;  %1872 = vst [vmem:[%s11407_s29 + $0x730] sm:$0xff] %v1871_v38  ;;  %v1879_v42 = vld [vmem:[%s11399_s28 + $0x3330] sm:$0xff]  ;;  %v1881_v43 = vld [vmem:[%s11399_s28 + $0x3368] sm:$0xff] }
  0x86   : > { %1874 = vst [vmem:[%s11407_s29 + $0x738] sm:$0xff] %v1873_v39  ;;  %1876 = vst [vmem:[%s11407_s29 + $0x740] sm:$0xff] %v1875_v40  ;;  %v1883_v44 = vld [vmem:[%s11399_s28 + $0x33a0] sm:$0xff]  ;;  %v1885_v45 = vld [vmem:[%s11399_s28 + $0x33d8] sm:$0xff] }
  0x87   : > { %1878 = vst [vmem:[%s11407_s29 + $0x748] sm:$0xff] %v1877_v41  ;;  %1880 = vst [vmem:[%s11407_s29 + $0x750] sm:$0xff] %v1879_v42  ;;  %v1887_v46 = vld [vmem:[%s11399_s28 + $0x3410] sm:$0xff]  ;;  %v1889_v47 = vld [vmem:[%s11399_s28 + $0x3448] sm:$0xff] }
  0x88   : > { %1882 = vst [vmem:[%s11407_s29 + $0x758] sm:$0xff] %v1881_v43  ;;  %1884 = vst [vmem:[%s11407_s29 + $0x760] sm:$0xff] %v1883_v44  ;;  %v1891_v48 = vld [vmem:[%s11399_s28 + $0x3480] sm:$0xff]  ;;  %v1893_v49 = vld [vmem:[%s11399_s28 + $0x34b8] sm:$0xff] }
  0x89   : > { %1886 = vst [vmem:[%s11407_s29 + $0x768] sm:$0xff] %v1885_v45  ;;  %1888 = vst [vmem:[%s11407_s29 + $0x770] sm:$0xff] %v1887_v46  ;;  %v1895_v50 = vld [vmem:[%s11399_s28 + $0x34f0] sm:$0xff]  ;;  %v1897_v51 = vld [vmem:[%s11399_s28 + $0x3528] sm:$0xff] }
  0x8a   : > { %1890 = vst [vmem:[%s11407_s29 + $0x778] sm:$0xff] %v1889_v47  ;;  %1892 = vst [vmem:[%s11407_s29 + $0x780] sm:$0xff] %v1891_v48  ;;  %v1899_v52 = vld [vmem:[%s11399_s28 + $0x3560] sm:$0xff]  ;;  %v1901_v53 = vld [vmem:[%s11399_s28 + $0x3598] sm:$0xff] }
  0x8b   : > { %1894 = vst [vmem:[%s11407_s29 + $0x788] sm:$0xff] %v1893_v49  ;;  %1896 = vst [vmem:[%s11407_s29 + $0x790] sm:$0xff] %v1895_v50  ;;  %v1903_v54 = vld [vmem:[%s11399_s28 + $0x35d0] sm:$0xff]  ;;  %v1905_v55 = vld [vmem:[%s11399_s28 + $0x3608] sm:$0xff] }
  0x8c   : > { %1898 = vst [vmem:[%s11407_s29 + $0x798] sm:$0xff] %v1897_v51  ;;  %1900 = vst [vmem:[%s11407_s29 + $0x7a0] sm:$0xff] %v1899_v52  ;;  %v1907_v56 = vld [vmem:[%s11399_s28 + $0x3640] sm:$0xff]  ;;  %v1909_v57 = vld [vmem:[%s11399_s28 + $0x3678] sm:$0xff] }
  0x8d   : > { %1902 = vst [vmem:[%s11407_s29 + $0x7a8] sm:$0xff] %v1901_v53  ;;  %1904 = vst [vmem:[%s11407_s29 + $0x7b0] sm:$0xff] %v1903_v54  ;;  %v1911_v58 = vld [vmem:[%s11399_s28 + $0x36b0] sm:$0xff]  ;;  %v1913_v59 = vld [vmem:[%s11399_s28 + $0x36e8] sm:$0xff] }
  0x8e   : > { %1906 = vst [vmem:[%s11407_s29 + $0x7b8] sm:$0xff] %v1905_v55  ;;  %1908 = vst [vmem:[%s11407_s29 + $0x7c0] sm:$0xff] %v1907_v56  ;;  %v1915_v60 = vld [vmem:[%s11399_s28 + $0x3720] sm:$0xff]  ;;  %v1917_v61 = vld [vmem:[%s11399_s28 + $0x3758] sm:$0xff] }
  0x8f   : > { %1910 = vst [vmem:[%s11407_s29 + $0x7c8] sm:$0xff] %v1909_v57  ;;  %1912 = vst [vmem:[%s11407_s29 + $0x7d0] sm:$0xff] %v1911_v58  ;;  %v1919_v62 = vld [vmem:[%s11399_s28 + $0x3790] sm:$0xff]  ;;  %v1921_v63 = vld [vmem:[%s11399_s28 + $0x37c8] sm:$0xff] }
  0x90   : > { %1914 = vst [vmem:[%s11407_s29 + $0x7d8] sm:$0xff] %v1913_v59  ;;  %1916 = vst [vmem:[%s11407_s29 + $0x7e0] sm:$0xff] %v1915_v60  ;;  %v1923_v0 = vld [vmem:[%s11399_s28 + $0x3800] sm:$0xff]  ;;  %v1925_v1 = vld [vmem:[%s11399_s28 + $0x3838] sm:$0xff] }
  0x91   : > { %1918 = vst [vmem:[%s11407_s29 + $0x7e8] sm:$0xff] %v1917_v61  ;;  %1920 = vst [vmem:[%s11407_s29 + $0x7f0] sm:$0xff] %v1919_v62  ;;  %v1927_v2 = vld [vmem:[%s11399_s28 + $0x3870] sm:$0xff]  ;;  %v1929_v3 = vld [vmem:[%s11399_s28 + $0x38a8] sm:$0xff] }
  0x92   : > { %1922 = vst [vmem:[%s11407_s29 + $0x7f8] sm:$0xff] %v1921_v63  ;;  %1924 = vst [vmem:[%s11407_s29 + $0x800] sm:$0xff] %v1923_v0  ;;  %v1931_v4 = vld [vmem:[%s11399_s28 + $0x38e0] sm:$0xff]  ;;  %v1933_v5 = vld [vmem:[%s11399_s28 + $0x3918] sm:$0xff] }
  0x93   : > { %1926 = vst [vmem:[%s11407_s29 + $0x808] sm:$0xff] %v1925_v1  ;;  %1928 = vst [vmem:[%s11407_s29 + $0x810] sm:$0xff] %v1927_v2  ;;  %v1935_v6 = vld [vmem:[%s11399_s28 + $0x3950] sm:$0xff]  ;;  %v1937_v7 = vld [vmem:[%s11399_s28 + $0x3988] sm:$0xff] }
  0x94   : > { %1930 = vst [vmem:[%s11407_s29 + $0x818] sm:$0xff] %v1929_v3  ;;  %1932 = vst [vmem:[%s11407_s29 + $0x820] sm:$0xff] %v1931_v4  ;;  %v1939_v8 = vld [vmem:[%s11399_s28 + $0x39c0] sm:$0xff]  ;;  %v1941_v9 = vld [vmem:[%s11399_s28 + $0x39f8] sm:$0xff] }
  0x95   : > { %1934 = vst [vmem:[%s11407_s29 + $0x828] sm:$0xff] %v1933_v5  ;;  %1936 = vst [vmem:[%s11407_s29 + $0x830] sm:$0xff] %v1935_v6  ;;  %v1943_v10 = vld [vmem:[%s11399_s28 + $0x3a30] sm:$0xff]  ;;  %v1945_v11 = vld [vmem:[%s11399_s28 + $0x3a68] sm:$0xff] }
  0x96   : > { %1938 = vst [vmem:[%s11407_s29 + $0x838] sm:$0xff] %v1937_v7  ;;  %1940 = vst [vmem:[%s11407_s29 + $0x840] sm:$0xff] %v1939_v8  ;;  %v1947_v12 = vld [vmem:[%s11399_s28 + $0x3aa0] sm:$0xff]  ;;  %v1949_v13 = vld [vmem:[%s11399_s28 + $0x3ad8] sm:$0xff] }
  0x97   : > { %1942 = vst [vmem:[%s11407_s29 + $0x848] sm:$0xff] %v1941_v9  ;;  %1944 = vst [vmem:[%s11407_s29 + $0x850] sm:$0xff] %v1943_v10  ;;  %v1951_v14 = vld [vmem:[%s11399_s28 + $0x3b10] sm:$0xff]  ;;  %v1953_v15 = vld [vmem:[%s11399_s28 + $0x3b48] sm:$0xff] }
  0x98   : > { %1946 = vst [vmem:[%s11407_s29 + $0x858] sm:$0xff] %v1945_v11  ;;  %1948 = vst [vmem:[%s11407_s29 + $0x860] sm:$0xff] %v1947_v12  ;;  %v1955_v16 = vld [vmem:[%s11399_s28 + $0x3b80] sm:$0xff]  ;;  %v1957_v17 = vld [vmem:[%s11399_s28 + $0x3bb8] sm:$0xff] }
  0x99   : > { %1950 = vst [vmem:[%s11407_s29 + $0x868] sm:$0xff] %v1949_v13  ;;  %1952 = vst [vmem:[%s11407_s29 + $0x870] sm:$0xff] %v1951_v14  ;;  %v1959_v18 = vld [vmem:[%s11399_s28 + $0x3bf0] sm:$0xff]  ;;  %v1961_v19 = vld [vmem:[%s11399_s28 + $0x3c28] sm:$0xff] }
  0x9a   : > { %1954 = vst [vmem:[%s11407_s29 + $0x878] sm:$0xff] %v1953_v15  ;;  %1956 = vst [vmem:[%s11407_s29 + $0x880] sm:$0xff] %v1955_v16  ;;  %v1963_v20 = vld [vmem:[%s11399_s28 + $0x3c60] sm:$0xff]  ;;  %v1965_v21 = vld [vmem:[%s11399_s28 + $0x3c98] sm:$0xff] }
  0x9b   : > { %1958 = vst [vmem:[%s11407_s29 + $0x888] sm:$0xff] %v1957_v17  ;;  %1960 = vst [vmem:[%s11407_s29 + $0x890] sm:$0xff] %v1959_v18  ;;  %v1967_v22 = vld [vmem:[%s11399_s28 + $0x3cd0] sm:$0xff]  ;;  %v1969_v23 = vld [vmem:[%s11399_s28 + $0x3d08] sm:$0xff] }
  0x9c   : > { %1962 = vst [vmem:[%s11407_s29 + $0x898] sm:$0xff] %v1961_v19  ;;  %1964 = vst [vmem:[%s11407_s29 + $0x8a0] sm:$0xff] %v1963_v20  ;;  %v1971_v24 = vld [vmem:[%s11399_s28 + $0x3d40] sm:$0xff]  ;;  %v1973_v25 = vld [vmem:[%s11399_s28 + $0x3d78] sm:$0xff] }
  0x9d   : > { %1966 = vst [vmem:[%s11407_s29 + $0x8a8] sm:$0xff] %v1965_v21  ;;  %1968 = vst [vmem:[%s11407_s29 + $0x8b0] sm:$0xff] %v1967_v22  ;;  %v1975_v26 = vld [vmem:[%s11399_s28 + $0x3db0] sm:$0xff]  ;;  %v1977_v27 = vld [vmem:[%s11399_s28 + $0x3de8] sm:$0xff] }
  0x9e   : > { %1970 = vst [vmem:[%s11407_s29 + $0x8b8] sm:$0xff] %v1969_v23  ;;  %1972 = vst [vmem:[%s11407_s29 + $0x8c0] sm:$0xff] %v1971_v24  ;;  %v1979_v28 = vld [vmem:[%s11399_s28 + $0x3e20] sm:$0xff]  ;;  %v1981_v29 = vld [vmem:[%s11399_s28 + $0x3e58] sm:$0xff] }
  0x9f   : > { %1974 = vst [vmem:[%s11407_s29 + $0x8c8] sm:$0xff] %v1973_v25  ;;  %1976 = vst [vmem:[%s11407_s29 + $0x8d0] sm:$0xff] %v1975_v26  ;;  %v1983_v30 = vld [vmem:[%s11399_s28 + $0x3e90] sm:$0xff]  ;;  %v1985_v31 = vld [vmem:[%s11399_s28 + $0x3ec8] sm:$0xff] }
  0xa0   : > { %1978 = vst [vmem:[%s11407_s29 + $0x8d8] sm:$0xff] %v1977_v27  ;;  %1980 = vst [vmem:[%s11407_s29 + $0x8e0] sm:$0xff] %v1979_v28  ;;  %v1987_v32 = vld [vmem:[%s11399_s28 + $0x3f00] sm:$0xff]  ;;  %v1989_v33 = vld [vmem:[%s11399_s28 + $0x3f38] sm:$0xff] }
  0xa1   : > { %1982 = vst [vmem:[%s11407_s29 + $0x8e8] sm:$0xff] %v1981_v29  ;;  %1984 = vst [vmem:[%s11407_s29 + $0x8f0] sm:$0xff] %v1983_v30  ;;  %v1991_v34 = vld [vmem:[%s11399_s28 + $0x3f70] sm:$0xff]  ;;  %v1993_v35 = vld [vmem:[%s11399_s28 + $0x3fa8] sm:$0xff] }
  0xa2   : > { %1986 = vst [vmem:[%s11407_s29 + $0x8f8] sm:$0xff] %v1985_v31  ;;  %1988 = vst [vmem:[%s11407_s29 + $0x900] sm:$0xff] %v1987_v32  ;;  %v1995_v36 = vld [vmem:[%s11399_s28 + $0x3fe0] sm:$0xff]  ;;  %v1997_v37 = vld [vmem:[%s11399_s28 + $0x4018] sm:$0xff] }
  0xa3   : > { %1990 = vst [vmem:[%s11407_s29 + $0x908] sm:$0xff] %v1989_v33  ;;  %1992 = vst [vmem:[%s11407_s29 + $0x910] sm:$0xff] %v1991_v34  ;;  %v1999_v38 = vld [vmem:[%s11399_s28 + $0x4050] sm:$0xff]  ;;  %v2001_v39 = vld [vmem:[%s11399_s28 + $0x4088] sm:$0xff] }
  0xa4   : > { %1994 = vst [vmem:[%s11407_s29 + $0x918] sm:$0xff] %v1993_v35  ;;  %1996 = vst [vmem:[%s11407_s29 + $0x920] sm:$0xff] %v1995_v36  ;;  %v2003_v40 = vld [vmem:[%s11399_s28 + $0x40c0] sm:$0xff]  ;;  %v2005_v41 = vld [vmem:[%s11399_s28 + $0x40f8] sm:$0xff] }
  0xa5   : > { %1998 = vst [vmem:[%s11407_s29 + $0x928] sm:$0xff] %v1997_v37  ;;  %2000 = vst [vmem:[%s11407_s29 + $0x930] sm:$0xff] %v1999_v38  ;;  %v2007_v42 = vld [vmem:[%s11399_s28 + $0x4130] sm:$0xff]  ;;  %v2009_v43 = vld [vmem:[%s11399_s28 + $0x4168] sm:$0xff] }
  0xa6   : > { %2002 = vst [vmem:[%s11407_s29 + $0x938] sm:$0xff] %v2001_v39  ;;  %2004 = vst [vmem:[%s11407_s29 + $0x940] sm:$0xff] %v2003_v40  ;;  %v2011_v44 = vld [vmem:[%s11399_s28 + $0x41a0] sm:$0xff]  ;;  %v2013_v45 = vld [vmem:[%s11399_s28 + $0x41d8] sm:$0xff] }
  0xa7   : > { %2006 = vst [vmem:[%s11407_s29 + $0x948] sm:$0xff] %v2005_v41  ;;  %2008 = vst [vmem:[%s11407_s29 + $0x950] sm:$0xff] %v2007_v42  ;;  %v2015_v46 = vld [vmem:[%s11399_s28 + $0x4210] sm:$0xff]  ;;  %v2017_v47 = vld [vmem:[%s11399_s28 + $0x4248] sm:$0xff] }
  0xa8   : > { %2010 = vst [vmem:[%s11407_s29 + $0x958] sm:$0xff] %v2009_v43  ;;  %2012 = vst [vmem:[%s11407_s29 + $0x960] sm:$0xff] %v2011_v44  ;;  %v2019_v48 = vld [vmem:[%s11399_s28 + $0x4280] sm:$0xff]  ;;  %v2021_v49 = vld [vmem:[%s11399_s28 + $0x42b8] sm:$0xff] }
  0xa9   : > { %2014 = vst [vmem:[%s11407_s29 + $0x968] sm:$0xff] %v2013_v45  ;;  %2016 = vst [vmem:[%s11407_s29 + $0x970] sm:$0xff] %v2015_v46  ;;  %v2023_v50 = vld [vmem:[%s11399_s28 + $0x42f0] sm:$0xff]  ;;  %v2025_v51 = vld [vmem:[%s11399_s28 + $0x4328] sm:$0xff] }
  0xaa   : > { %2018 = vst [vmem:[%s11407_s29 + $0x978] sm:$0xff] %v2017_v47  ;;  %2020 = vst [vmem:[%s11407_s29 + $0x980] sm:$0xff] %v2019_v48  ;;  %v2027_v52 = vld [vmem:[%s11399_s28 + $0x4360] sm:$0xff]  ;;  %v2029_v53 = vld [vmem:[%s11399_s28 + $0x4398] sm:$0xff] }
  0xab   : > { %2022 = vst [vmem:[%s11407_s29 + $0x988] sm:$0xff] %v2021_v49  ;;  %2024 = vst [vmem:[%s11407_s29 + $0x990] sm:$0xff] %v2023_v50  ;;  %v2031_v54 = vld [vmem:[%s11399_s28 + $0x43d0] sm:$0xff]  ;;  %v2033_v55 = vld [vmem:[%s11399_s28 + $0x4408] sm:$0xff] }
  0xac   : > { %2026 = vst [vmem:[%s11407_s29 + $0x998] sm:$0xff] %v2025_v51  ;;  %2028 = vst [vmem:[%s11407_s29 + $0x9a0] sm:$0xff] %v2027_v52  ;;  %v2035_v56 = vld [vmem:[%s11399_s28 + $0x4440] sm:$0xff]  ;;  %v2037_v57 = vld [vmem:[%s11399_s28 + $0x4478] sm:$0xff] }
  0xad   : > { %2030 = vst [vmem:[%s11407_s29 + $0x9a8] sm:$0xff] %v2029_v53  ;;  %2032 = vst [vmem:[%s11407_s29 + $0x9b0] sm:$0xff] %v2031_v54  ;;  %v2039_v58 = vld [vmem:[%s11399_s28 + $0x44b0] sm:$0xff]  ;;  %v2041_v59 = vld [vmem:[%s11399_s28 + $0x44e8] sm:$0xff] }
  0xae   : > { %2034 = vst [vmem:[%s11407_s29 + $0x9b8] sm:$0xff] %v2033_v55  ;;  %2036 = vst [vmem:[%s11407_s29 + $0x9c0] sm:$0xff] %v2035_v56  ;;  %v2043_v60 = vld [vmem:[%s11399_s28 + $0x4520] sm:$0xff]  ;;  %v2045_v61 = vld [vmem:[%s11399_s28 + $0x4558] sm:$0xff] }
  0xaf   : > { %2038 = vst [vmem:[%s11407_s29 + $0x9c8] sm:$0xff] %v2037_v57  ;;  %2040 = vst [vmem:[%s11407_s29 + $0x9d0] sm:$0xff] %v2039_v58  ;;  %v2047_v62 = vld [vmem:[%s11399_s28 + $0x4590] sm:$0xff]  ;;  %v2049_v63 = vld [vmem:[%s11399_s28 + $0x45c8] sm:$0xff] }
  0xb0   : > { %2042 = vst [vmem:[%s11407_s29 + $0x9d8] sm:$0xff] %v2041_v59  ;;  %2044 = vst [vmem:[%s11407_s29 + $0x9e0] sm:$0xff] %v2043_v60  ;;  %v2051_v0 = vld [vmem:[%s11399_s28 + $0x4600] sm:$0xff]  ;;  %v2053_v1 = vld [vmem:[%s11399_s28 + $0x4638] sm:$0xff] }
  0xb1   : > { %2046 = vst [vmem:[%s11407_s29 + $0x9e8] sm:$0xff] %v2045_v61  ;;  %2048 = vst [vmem:[%s11407_s29 + $0x9f0] sm:$0xff] %v2047_v62  ;;  %v2055_v2 = vld [vmem:[%s11399_s28 + $0x4670] sm:$0xff]  ;;  %v2057_v3 = vld [vmem:[%s11399_s28 + $0x46a8] sm:$0xff] }
  0xb2   : > { %2050 = vst [vmem:[%s11407_s29 + $0x9f8] sm:$0xff] %v2049_v63  ;;  %2052 = vst [vmem:[%s11407_s29 + $0xa00] sm:$0xff] %v2051_v0  ;;  %v2059_v4 = vld [vmem:[%s11399_s28 + $0x46e0] sm:$0xff]  ;;  %v2061_v5 = vld [vmem:[%s11399_s28 + $0x4718] sm:$0xff] }
  0xb3   : > { %2054 = vst [vmem:[%s11407_s29 + $0xa08] sm:$0xff] %v2053_v1  ;;  %2056 = vst [vmem:[%s11407_s29 + $0xa10] sm:$0xff] %v2055_v2  ;;  %v2063_v6 = vld [vmem:[%s11399_s28 + $0x4750] sm:$0xff]  ;;  %v2065_v7 = vld [vmem:[%s11399_s28 + $0x4788] sm:$0xff] }
  0xb4   : > { %2058 = vst [vmem:[%s11407_s29 + $0xa18] sm:$0xff] %v2057_v3  ;;  %2060 = vst [vmem:[%s11407_s29 + $0xa20] sm:$0xff] %v2059_v4  ;;  %v2067_v8 = vld [vmem:[%s11399_s28 + $0x47c0] sm:$0xff]  ;;  %v2069_v9 = vld [vmem:[%s11399_s28 + $0x47f8] sm:$0xff] }
  0xb5   : > { %2062 = vst [vmem:[%s11407_s29 + $0xa28] sm:$0xff] %v2061_v5  ;;  %2064 = vst [vmem:[%s11407_s29 + $0xa30] sm:$0xff] %v2063_v6  ;;  %v2071_v10 = vld [vmem:[%s11399_s28 + $0x4830] sm:$0xff]  ;;  %v2073_v11 = vld [vmem:[%s11399_s28 + $0x4868] sm:$0xff] }
  0xb6   : > { %2066 = vst [vmem:[%s11407_s29 + $0xa38] sm:$0xff] %v2065_v7  ;;  %2068 = vst [vmem:[%s11407_s29 + $0xa40] sm:$0xff] %v2067_v8  ;;  %v2075_v12 = vld [vmem:[%s11399_s28 + $0x48a0] sm:$0xff]  ;;  %v2077_v13 = vld [vmem:[%s11399_s28 + $0x48d8] sm:$0xff] }
  0xb7   : > { %2070 = vst [vmem:[%s11407_s29 + $0xa48] sm:$0xff] %v2069_v9  ;;  %2072 = vst [vmem:[%s11407_s29 + $0xa50] sm:$0xff] %v2071_v10  ;;  %v2079_v14 = vld [vmem:[%s11399_s28 + $0x4910] sm:$0xff]  ;;  %v2081_v15 = vld [vmem:[%s11399_s28 + $0x4948] sm:$0xff] }
  0xb8   : > { %2074 = vst [vmem:[%s11407_s29 + $0xa58] sm:$0xff] %v2073_v11  ;;  %2076 = vst [vmem:[%s11407_s29 + $0xa60] sm:$0xff] %v2075_v12  ;;  %v2083_v16 = vld [vmem:[%s11399_s28 + $0x4980] sm:$0xff]  ;;  %v2085_v17 = vld [vmem:[%s11399_s28 + $0x49b8] sm:$0xff] }
  0xb9   : > { %2078 = vst [vmem:[%s11407_s29 + $0xa68] sm:$0xff] %v2077_v13  ;;  %2080 = vst [vmem:[%s11407_s29 + $0xa70] sm:$0xff] %v2079_v14  ;;  %v2087_v18 = vld [vmem:[%s11399_s28 + $0x49f0] sm:$0xff]  ;;  %v2089_v19 = vld [vmem:[%s11399_s28 + $0x4a28] sm:$0xff] }
  0xba   : > { %2082 = vst [vmem:[%s11407_s29 + $0xa78] sm:$0xff] %v2081_v15  ;;  %2084 = vst [vmem:[%s11407_s29 + $0xa80] sm:$0xff] %v2083_v16  ;;  %v2091_v20 = vld [vmem:[%s11399_s28 + $0x4a60] sm:$0xff]  ;;  %v2093_v21 = vld [vmem:[%s11399_s28 + $0x4a98] sm:$0xff] }
  0xbb   : > { %2086 = vst [vmem:[%s11407_s29 + $0xa88] sm:$0xff] %v2085_v17  ;;  %2088 = vst [vmem:[%s11407_s29 + $0xa90] sm:$0xff] %v2087_v18  ;;  %v2095_v22 = vld [vmem:[%s11399_s28 + $0x4ad0] sm:$0xff]  ;;  %v2097_v23 = vld [vmem:[%s11399_s28 + $0x4b08] sm:$0xff] }
  0xbc   : > { %2090 = vst [vmem:[%s11407_s29 + $0xa98] sm:$0xff] %v2089_v19  ;;  %2092 = vst [vmem:[%s11407_s29 + $0xaa0] sm:$0xff] %v2091_v20  ;;  %v2099_v24 = vld [vmem:[%s11399_s28 + $0x4b40] sm:$0xff]  ;;  %v2101_v25 = vld [vmem:[%s11399_s28 + $0x4b78] sm:$0xff] }
  0xbd   : > { %2094 = vst [vmem:[%s11407_s29 + $0xaa8] sm:$0xff] %v2093_v21  ;;  %2096 = vst [vmem:[%s11407_s29 + $0xab0] sm:$0xff] %v2095_v22  ;;  %v2103_v26 = vld [vmem:[%s11399_s28 + $0x4bb0] sm:$0xff]  ;;  %v2105_v27 = vld [vmem:[%s11399_s28 + $0x4be8] sm:$0xff] }
  0xbe   : > { %2098 = vst [vmem:[%s11407_s29 + $0xab8] sm:$0xff] %v2097_v23  ;;  %2100 = vst [vmem:[%s11407_s29 + $0xac0] sm:$0xff] %v2099_v24  ;;  %v2107_v28 = vld [vmem:[%s11399_s28 + $0x4c20] sm:$0xff]  ;;  %v2109_v29 = vld [vmem:[%s11399_s28 + $0x4c58] sm:$0xff] }
  0xbf   : > { %2102 = vst [vmem:[%s11407_s29 + $0xac8] sm:$0xff] %v2101_v25  ;;  %2104 = vst [vmem:[%s11407_s29 + $0xad0] sm:$0xff] %v2103_v26  ;;  %v2111_v30 = vld [vmem:[%s11399_s28 + $0x4c90] sm:$0xff]  ;;  %v2113_v31 = vld [vmem:[%s11399_s28 + $0x4cc8] sm:$0xff] }
  0xc0   : > { %2106 = vst [vmem:[%s11407_s29 + $0xad8] sm:$0xff] %v2105_v27  ;;  %2108 = vst [vmem:[%s11407_s29 + $0xae0] sm:$0xff] %v2107_v28  ;;  %v2115_v32 = vld [vmem:[%s11399_s28 + $0x4d00] sm:$0xff]  ;;  %v2117_v33 = vld [vmem:[%s11399_s28 + $0x4d38] sm:$0xff] }
  0xc1   : > { %2110 = vst [vmem:[%s11407_s29 + $0xae8] sm:$0xff] %v2109_v29  ;;  %2112 = vst [vmem:[%s11407_s29 + $0xaf0] sm:$0xff] %v2111_v30  ;;  %v2119_v34 = vld [vmem:[%s11399_s28 + $0x4d70] sm:$0xff]  ;;  %v2121_v35 = vld [vmem:[%s11399_s28 + $0x4da8] sm:$0xff] }
  0xc2   : > { %2114 = vst [vmem:[%s11407_s29 + $0xaf8] sm:$0xff] %v2113_v31  ;;  %2116 = vst [vmem:[%s11407_s29 + $0xb00] sm:$0xff] %v2115_v32  ;;  %v2123_v36 = vld [vmem:[%s11399_s28 + $0x4de0] sm:$0xff]  ;;  %v2125_v37 = vld [vmem:[%s11399_s28 + $0x4e18] sm:$0xff] }
  0xc3   : > { %2118 = vst [vmem:[%s11407_s29 + $0xb08] sm:$0xff] %v2117_v33  ;;  %2120 = vst [vmem:[%s11407_s29 + $0xb10] sm:$0xff] %v2119_v34  ;;  %v2127_v38 = vld [vmem:[%s11399_s28 + $0x4e50] sm:$0xff]  ;;  %v2129_v39 = vld [vmem:[%s11399_s28 + $0x4e88] sm:$0xff] }
  0xc4   : > { %2122 = vst [vmem:[%s11407_s29 + $0xb18] sm:$0xff] %v2121_v35  ;;  %2124 = vst [vmem:[%s11407_s29 + $0xb20] sm:$0xff] %v2123_v36  ;;  %v2131_v40 = vld [vmem:[%s11399_s28 + $0x4ec0] sm:$0xff]  ;;  %v2133_v41 = vld [vmem:[%s11399_s28 + $0x4ef8] sm:$0xff] }
  0xc5   : > { %2126 = vst [vmem:[%s11407_s29 + $0xb28] sm:$0xff] %v2125_v37  ;;  %2128 = vst [vmem:[%s11407_s29 + $0xb30] sm:$0xff] %v2127_v38  ;;  %v2135_v42 = vld [vmem:[%s11399_s28 + $0x4f30] sm:$0xff]  ;;  %v2137_v43 = vld [vmem:[%s11399_s28 + $0x4f68] sm:$0xff] }
  0xc6   : > { %2130 = vst [vmem:[%s11407_s29 + $0xb38] sm:$0xff] %v2129_v39  ;;  %2132 = vst [vmem:[%s11407_s29 + $0xb40] sm:$0xff] %v2131_v40  ;;  %v2139_v44 = vld [vmem:[%s11399_s28 + $0x4fa0] sm:$0xff]  ;;  %v2141_v45 = vld [vmem:[%s11399_s28 + $0x4fd8] sm:$0xff] }
  0xc7   : > { %2134 = vst [vmem:[%s11407_s29 + $0xb48] sm:$0xff] %v2133_v41  ;;  %2136 = vst [vmem:[%s11407_s29 + $0xb50] sm:$0xff] %v2135_v42  ;;  %v2143_v46 = vld [vmem:[%s11399_s28 + $0x5010] sm:$0xff]  ;;  %v2145_v47 = vld [vmem:[%s11399_s28 + $0x5048] sm:$0xff] }
  0xc8   : > { %2138 = vst [vmem:[%s11407_s29 + $0xb58] sm:$0xff] %v2137_v43  ;;  %2140 = vst [vmem:[%s11407_s29 + $0xb60] sm:$0xff] %v2139_v44  ;;  %v2147_v48 = vld [vmem:[%s11399_s28 + $0x5080] sm:$0xff]  ;;  %v2149_v49 = vld [vmem:[%s11399_s28 + $0x50b8] sm:$0xff] }
  0xc9   : > { %2142 = vst [vmem:[%s11407_s29 + $0xb68] sm:$0xff] %v2141_v45  ;;  %2144 = vst [vmem:[%s11407_s29 + $0xb70] sm:$0xff] %v2143_v46  ;;  %v2151_v50 = vld [vmem:[%s11399_s28 + $0x50f0] sm:$0xff]  ;;  %v2153_v51 = vld [vmem:[%s11399_s28 + $0x5128] sm:$0xff] }
  0xca   : > { %2146 = vst [vmem:[%s11407_s29 + $0xb78] sm:$0xff] %v2145_v47  ;;  %2148 = vst [vmem:[%s11407_s29 + $0xb80] sm:$0xff] %v2147_v48  ;;  %v2155_v52 = vld [vmem:[%s11399_s28 + $0x5160] sm:$0xff]  ;;  %v2157_v53 = vld [vmem:[%s11399_s28 + $0x5198] sm:$0xff] }
  0xcb   : > { %2150 = vst [vmem:[%s11407_s29 + $0xb88] sm:$0xff] %v2149_v49  ;;  %2152 = vst [vmem:[%s11407_s29 + $0xb90] sm:$0xff] %v2151_v50  ;;  %v2159_v54 = vld [vmem:[%s11399_s28 + $0x51d0] sm:$0xff]  ;;  %v2161_v55 = vld [vmem:[%s11399_s28 + $0x5208] sm:$0xff] }
  0xcc   : > { %2154 = vst [vmem:[%s11407_s29 + $0xb98] sm:$0xff] %v2153_v51  ;;  %2156 = vst [vmem:[%s11407_s29 + $0xba0] sm:$0xff] %v2155_v52  ;;  %v2163_v56 = vld [vmem:[%s11399_s28 + $0x5240] sm:$0xff]  ;;  %v2165_v57 = vld [vmem:[%s11399_s28 + $0x5278] sm:$0xff] }
  0xcd   : > { %2158 = vst [vmem:[%s11407_s29 + $0xba8] sm:$0xff] %v2157_v53  ;;  %2160 = vst [vmem:[%s11407_s29 + $0xbb0] sm:$0xff] %v2159_v54  ;;  %v2167_v58 = vld [vmem:[%s11399_s28 + $0x52b0] sm:$0xff]  ;;  %v2169_v59 = vld [vmem:[%s11399_s28 + $0x52e8] sm:$0xff] }
  0xce   : > { %2162 = vst [vmem:[%s11407_s29 + $0xbb8] sm:$0xff] %v2161_v55  ;;  %2164 = vst [vmem:[%s11407_s29 + $0xbc0] sm:$0xff] %v2163_v56  ;;  %v2171_v60 = vld [vmem:[%s11399_s28 + $0x5320] sm:$0xff]  ;;  %v2173_v61 = vld [vmem:[%s11399_s28 + $0x5358] sm:$0xff] }
  0xcf   : > { %2166 = vst [vmem:[%s11407_s29 + $0xbc8] sm:$0xff] %v2165_v57  ;;  %2168 = vst [vmem:[%s11407_s29 + $0xbd0] sm:$0xff] %v2167_v58  ;;  %v2175_v62 = vld [vmem:[%s11399_s28 + $0x5390] sm:$0xff]  ;;  %v2177_v63 = vld [vmem:[%s11399_s28 + $0x53c8] sm:$0xff] }
  0xd0   : > { %2170 = vst [vmem:[%s11407_s29 + $0xbd8] sm:$0xff] %v2169_v59  ;;  %2172 = vst [vmem:[%s11407_s29 + $0xbe0] sm:$0xff] %v2171_v60  ;;  %v2179_v0 = vld [vmem:[%s11399_s28 + $0x5400] sm:$0xff]  ;;  %v2181_v1 = vld [vmem:[%s11399_s28 + $0x5438] sm:$0xff] }
  0xd1   : > { %2174 = vst [vmem:[%s11407_s29 + $0xbe8] sm:$0xff] %v2173_v61  ;;  %2176 = vst [vmem:[%s11407_s29 + $0xbf0] sm:$0xff] %v2175_v62  ;;  %v2183_v2 = vld [vmem:[%s11399_s28 + $0x5470] sm:$0xff]  ;;  %v2185_v3 = vld [vmem:[%s11399_s28 + $0x54a8] sm:$0xff] }
  0xd2   : > { %2178 = vst [vmem:[%s11407_s29 + $0xbf8] sm:$0xff] %v2177_v63  ;;  %2180 = vst [vmem:[%s11407_s29 + $0xc00] sm:$0xff] %v2179_v0  ;;  %v2187_v4 = vld [vmem:[%s11399_s28 + $0x54e0] sm:$0xff]  ;;  %v2189_v5 = vld [vmem:[%s11399_s28 + $0x5518] sm:$0xff] }
  0xd3   : > { %2182 = vst [vmem:[%s11407_s29 + $0xc08] sm:$0xff] %v2181_v1  ;;  %2184 = vst [vmem:[%s11407_s29 + $0xc10] sm:$0xff] %v2183_v2  ;;  %v2191_v6 = vld [vmem:[%s11399_s28 + $0x5550] sm:$0xff]  ;;  %v2193_v7 = vld [vmem:[%s11399_s28 + $0x5588] sm:$0xff] }
  0xd4   : > { %2186 = vst [vmem:[%s11407_s29 + $0xc18] sm:$0xff] %v2185_v3  ;;  %2188 = vst [vmem:[%s11407_s29 + $0xc20] sm:$0xff] %v2187_v4  ;;  %v2195_v8 = vld [vmem:[%s11399_s28 + $0x55c0] sm:$0xff]  ;;  %v2197_v9 = vld [vmem:[%s11399_s28 + $0x55f8] sm:$0xff] }
  0xd5   : > { %2190 = vst [vmem:[%s11407_s29 + $0xc28] sm:$0xff] %v2189_v5  ;;  %2192 = vst [vmem:[%s11407_s29 + $0xc30] sm:$0xff] %v2191_v6  ;;  %v2199_v10 = vld [vmem:[%s11399_s28 + $0x5630] sm:$0xff]  ;;  %v2201_v11 = vld [vmem:[%s11399_s28 + $0x5668] sm:$0xff] }
  0xd6   : > { %2194 = vst [vmem:[%s11407_s29 + $0xc38] sm:$0xff] %v2193_v7  ;;  %2196 = vst [vmem:[%s11407_s29 + $0xc40] sm:$0xff] %v2195_v8  ;;  %v2203_v12 = vld [vmem:[%s11399_s28 + $0x56a0] sm:$0xff]  ;;  %v2205_v13 = vld [vmem:[%s11399_s28 + $0x56d8] sm:$0xff] }
  0xd7   : > { %2198 = vst [vmem:[%s11407_s29 + $0xc48] sm:$0xff] %v2197_v9  ;;  %2200 = vst [vmem:[%s11407_s29 + $0xc50] sm:$0xff] %v2199_v10  ;;  %v2207_v14 = vld [vmem:[%s11399_s28 + $0x5710] sm:$0xff]  ;;  %v2209_v15 = vld [vmem:[%s11399_s28 + $0x5748] sm:$0xff] }
  0xd8   : > { %2202 = vst [vmem:[%s11407_s29 + $0xc58] sm:$0xff] %v2201_v11  ;;  %2204 = vst [vmem:[%s11407_s29 + $0xc60] sm:$0xff] %v2203_v12  ;;  %v2211_v16 = vld [vmem:[%s11399_s28 + $0x5780] sm:$0xff]  ;;  %v2213_v17 = vld [vmem:[%s11399_s28 + $0x57b8] sm:$0xff] }
  0xd9   : > { %2206 = vst [vmem:[%s11407_s29 + $0xc68] sm:$0xff] %v2205_v13  ;;  %2208 = vst [vmem:[%s11407_s29 + $0xc70] sm:$0xff] %v2207_v14  ;;  %v2215_v18 = vld [vmem:[%s11399_s28 + $0x57f0] sm:$0xff]  ;;  %v2217_v19 = vld [vmem:[%s11399_s28 + $0x5828] sm:$0xff] }
  0xda   : > { %2210 = vst [vmem:[%s11407_s29 + $0xc78] sm:$0xff] %v2209_v15  ;;  %2212 = vst [vmem:[%s11407_s29 + $0xc80] sm:$0xff] %v2211_v16  ;;  %v2219_v20 = vld [vmem:[%s11399_s28 + $0x5860] sm:$0xff]  ;;  %v2221_v21 = vld [vmem:[%s11399_s28 + $0x5898] sm:$0xff] }
  0xdb   : > { %2214 = vst [vmem:[%s11407_s29 + $0xc88] sm:$0xff] %v2213_v17  ;;  %2216 = vst [vmem:[%s11407_s29 + $0xc90] sm:$0xff] %v2215_v18  ;;  %v2223_v22 = vld [vmem:[%s11399_s28 + $0x58d0] sm:$0xff]  ;;  %v2225_v23 = vld [vmem:[%s11399_s28 + $0x5908] sm:$0xff] }
  0xdc   : > { %2218 = vst [vmem:[%s11407_s29 + $0xc98] sm:$0xff] %v2217_v19  ;;  %2220 = vst [vmem:[%s11407_s29 + $0xca0] sm:$0xff] %v2219_v20  ;;  %v2227_v24 = vld [vmem:[%s11399_s28 + $0x5940] sm:$0xff]  ;;  %v2229_v25 = vld [vmem:[%s11399_s28 + $0x5978] sm:$0xff] }
  0xdd   : > { %2222 = vst [vmem:[%s11407_s29 + $0xca8] sm:$0xff] %v2221_v21  ;;  %2224 = vst [vmem:[%s11407_s29 + $0xcb0] sm:$0xff] %v2223_v22  ;;  %v2231_v26 = vld [vmem:[%s11399_s28 + $0x59b0] sm:$0xff]  ;;  %v2233_v27 = vld [vmem:[%s11399_s28 + $0x59e8] sm:$0xff] }
  0xde   : > { %2226 = vst [vmem:[%s11407_s29 + $0xcb8] sm:$0xff] %v2225_v23  ;;  %2228 = vst [vmem:[%s11407_s29 + $0xcc0] sm:$0xff] %v2227_v24  ;;  %v2235_v28 = vld [vmem:[%s11399_s28 + $0x5a20] sm:$0xff]  ;;  %v2237_v29 = vld [vmem:[%s11399_s28 + $0x5a58] sm:$0xff] }
  0xdf   : > { %2230 = vst [vmem:[%s11407_s29 + $0xcc8] sm:$0xff] %v2229_v25  ;;  %2232 = vst [vmem:[%s11407_s29 + $0xcd0] sm:$0xff] %v2231_v26  ;;  %v2239_v30 = vld [vmem:[%s11399_s28 + $0x5a90] sm:$0xff]  ;;  %v2241_v31 = vld [vmem:[%s11399_s28 + $0x5ac8] sm:$0xff] }
  0xe0   : > { %2234 = vst [vmem:[%s11407_s29 + $0xcd8] sm:$0xff] %v2233_v27  ;;  %2236 = vst [vmem:[%s11407_s29 + $0xce0] sm:$0xff] %v2235_v28  ;;  %v2243_v32 = vld [vmem:[%s11399_s28 + $0x5b00] sm:$0xff]  ;;  %v2245_v33 = vld [vmem:[%s11399_s28 + $0x5b38] sm:$0xff] }
  0xe1   : > { %2238 = vst [vmem:[%s11407_s29 + $0xce8] sm:$0xff] %v2237_v29  ;;  %2240 = vst [vmem:[%s11407_s29 + $0xcf0] sm:$0xff] %v2239_v30  ;;  %v2247_v34 = vld [vmem:[%s11399_s28 + $0x5b70] sm:$0xff]  ;;  %v2249_v35 = vld [vmem:[%s11399_s28 + $0x5ba8] sm:$0xff] }
  0xe2   : > { %2242 = vst [vmem:[%s11407_s29 + $0xcf8] sm:$0xff] %v2241_v31  ;;  %2244 = vst [vmem:[%s11407_s29 + $0xd00] sm:$0xff] %v2243_v32  ;;  %v2251_v36 = vld [vmem:[%s11399_s28 + $0x5be0] sm:$0xff]  ;;  %v2253_v37 = vld [vmem:[%s11399_s28 + $0x5c18] sm:$0xff] }
  0xe3   : > { %2246 = vst [vmem:[%s11407_s29 + $0xd08] sm:$0xff] %v2245_v33  ;;  %2248 = vst [vmem:[%s11407_s29 + $0xd10] sm:$0xff] %v2247_v34  ;;  %v2255_v38 = vld [vmem:[%s11399_s28 + $0x5c50] sm:$0xff]  ;;  %v2257_v39 = vld [vmem:[%s11399_s28 + $0x5c88] sm:$0xff] }
  0xe4   : > { %2250 = vst [vmem:[%s11407_s29 + $0xd18] sm:$0xff] %v2249_v35  ;;  %2252 = vst [vmem:[%s11407_s29 + $0xd20] sm:$0xff] %v2251_v36  ;;  %v2259_v40 = vld [vmem:[%s11399_s28 + $0x5cc0] sm:$0xff]  ;;  %v2261_v41 = vld [vmem:[%s11399_s28 + $0x5cf8] sm:$0xff] }
  0xe5   : > { %2254 = vst [vmem:[%s11407_s29 + $0xd28] sm:$0xff] %v2253_v37  ;;  %2256 = vst [vmem:[%s11407_s29 + $0xd30] sm:$0xff] %v2255_v38  ;;  %v2263_v42 = vld [vmem:[%s11399_s28 + $0x5d30] sm:$0xff]  ;;  %v2265_v43 = vld [vmem:[%s11399_s28 + $0x5d68] sm:$0xff] }
  0xe6   : > { %2258 = vst [vmem:[%s11407_s29 + $0xd38] sm:$0xff] %v2257_v39  ;;  %2260 = vst [vmem:[%s11407_s29 + $0xd40] sm:$0xff] %v2259_v40  ;;  %v2267_v44 = vld [vmem:[%s11399_s28 + $0x5da0] sm:$0xff]  ;;  %v2269_v45 = vld [vmem:[%s11399_s28 + $0x5dd8] sm:$0xff] }
  0xe7   : > { %2262 = vst [vmem:[%s11407_s29 + $0xd48] sm:$0xff] %v2261_v41  ;;  %2264 = vst [vmem:[%s11407_s29 + $0xd50] sm:$0xff] %v2263_v42  ;;  %v2271_v46 = vld [vmem:[%s11399_s28 + $0x5e10] sm:$0xff]  ;;  %v2273_v47 = vld [vmem:[%s11399_s28 + $0x5e48] sm:$0xff] }
  0xe8   : > { %2266 = vst [vmem:[%s11407_s29 + $0xd58] sm:$0xff] %v2265_v43  ;;  %2268 = vst [vmem:[%s11407_s29 + $0xd60] sm:$0xff] %v2267_v44  ;;  %v2275_v48 = vld [vmem:[%s11399_s28 + $0x5e80] sm:$0xff]  ;;  %v2277_v49 = vld [vmem:[%s11399_s28 + $0x5eb8] sm:$0xff] }
  0xe9   : > { %2270 = vst [vmem:[%s11407_s29 + $0xd68] sm:$0xff] %v2269_v45  ;;  %2272 = vst [vmem:[%s11407_s29 + $0xd70] sm:$0xff] %v2271_v46  ;;  %v2279_v50 = vld [vmem:[%s11399_s28 + $0x5ef0] sm:$0xff]  ;;  %v2281_v51 = vld [vmem:[%s11399_s28 + $0x5f28] sm:$0xff] }
  0xea   : > { %2274 = vst [vmem:[%s11407_s29 + $0xd78] sm:$0xff] %v2273_v47  ;;  %2276 = vst [vmem:[%s11407_s29 + $0xd80] sm:$0xff] %v2275_v48  ;;  %v2283_v52 = vld [vmem:[%s11399_s28 + $0x5f60] sm:$0xff]  ;;  %v2285_v53 = vld [vmem:[%s11399_s28 + $0x5f98] sm:$0xff] }
  0xeb   : > { %2278 = vst [vmem:[%s11407_s29 + $0xd88] sm:$0xff] %v2277_v49  ;;  %2280 = vst [vmem:[%s11407_s29 + $0xd90] sm:$0xff] %v2279_v50  ;;  %v2287_v54 = vld [vmem:[%s11399_s28 + $0x5fd0] sm:$0xff]  ;;  %v2289_v55 = vld [vmem:[%s11399_s28 + $0x6008] sm:$0xff] }
  0xec   : > { %2282 = vst [vmem:[%s11407_s29 + $0xd98] sm:$0xff] %v2281_v51  ;;  %2284 = vst [vmem:[%s11407_s29 + $0xda0] sm:$0xff] %v2283_v52  ;;  %v2291_v56 = vld [vmem:[%s11399_s28 + $0x6040] sm:$0xff]  ;;  %v2293_v57 = vld [vmem:[%s11399_s28 + $0x6078] sm:$0xff] }
  0xed   : > { %2286 = vst [vmem:[%s11407_s29 + $0xda8] sm:$0xff] %v2285_v53  ;;  %2288 = vst [vmem:[%s11407_s29 + $0xdb0] sm:$0xff] %v2287_v54  ;;  %v2295_v58 = vld [vmem:[%s11399_s28 + $0x60b0] sm:$0xff]  ;;  %v2297_v59 = vld [vmem:[%s11399_s28 + $0x60e8] sm:$0xff] }
  0xee   : > { %2290 = vst [vmem:[%s11407_s29 + $0xdb8] sm:$0xff] %v2289_v55  ;;  %2292 = vst [vmem:[%s11407_s29 + $0xdc0] sm:$0xff] %v2291_v56  ;;  %v2299_v60 = vld [vmem:[%s11399_s28 + $0x6120] sm:$0xff]  ;;  %v2301_v61 = vld [vmem:[%s11399_s28 + $0x6158] sm:$0xff] }
  0xef   : > { %2294 = vst [vmem:[%s11407_s29 + $0xdc8] sm:$0xff] %v2293_v57  ;;  %2296 = vst [vmem:[%s11407_s29 + $0xdd0] sm:$0xff] %v2295_v58  ;;  %v2303_v62 = vld [vmem:[%s11399_s28 + $0x6190] sm:$0xff]  ;;  %v2305_v63 = vld [vmem:[%s11399_s28 + $0x61c8] sm:$0xff] }
  0xf0   : > { %2298 = vst [vmem:[%s11407_s29 + $0xdd8] sm:$0xff] %v2297_v59  ;;  %2300 = vst [vmem:[%s11407_s29 + $0xde0] sm:$0xff] %v2299_v60  ;;  %v2307_v0 = vld [vmem:[%s11399_s28 + $0x6200] sm:$0xff]  ;;  %v2309_v1 = vld [vmem:[%s11399_s28 + $0x6238] sm:$0xff] }
  0xf1   : > { %2302 = vst [vmem:[%s11407_s29 + $0xde8] sm:$0xff] %v2301_v61  ;;  %2304 = vst [vmem:[%s11407_s29 + $0xdf0] sm:$0xff] %v2303_v62  ;;  %v2311_v2 = vld [vmem:[%s11399_s28 + $0x6270] sm:$0xff]  ;;  %v2313_v3 = vld [vmem:[%s11399_s28 + $0x62a8] sm:$0xff] }
  0xf2   : > { %2306 = vst [vmem:[%s11407_s29 + $0xdf8] sm:$0xff] %v2305_v63  ;;  %2308 = vst [vmem:[%s11407_s29 + $0xe00] sm:$0xff] %v2307_v0  ;;  %v2315_v4 = vld [vmem:[%s11399_s28 + $0x62e0] sm:$0xff]  ;;  %v2317_v5 = vld [vmem:[%s11399_s28 + $0x6318] sm:$0xff] }
  0xf3   : > { %2310 = vst [vmem:[%s11407_s29 + $0xe08] sm:$0xff] %v2309_v1  ;;  %2312 = vst [vmem:[%s11407_s29 + $0xe10] sm:$0xff] %v2311_v2  ;;  %v2319_v6 = vld [vmem:[%s11399_s28 + $0x6350] sm:$0xff]  ;;  %v2321_v7 = vld [vmem:[%s11399_s28 + $0x6388] sm:$0xff] }
  0xf4   : > { %2314 = vst [vmem:[%s11407_s29 + $0xe18] sm:$0xff] %v2313_v3  ;;  %2316 = vst [vmem:[%s11407_s29 + $0xe20] sm:$0xff] %v2315_v4  ;;  %v2323_v8 = vld [vmem:[%s11399_s28 + $0x63c0] sm:$0xff]  ;;  %v2325_v9 = vld [vmem:[%s11399_s28 + $0x63f8] sm:$0xff] }
  0xf5   : > { %2318 = vst [vmem:[%s11407_s29 + $0xe28] sm:$0xff] %v2317_v5  ;;  %2320 = vst [vmem:[%s11407_s29 + $0xe30] sm:$0xff] %v2319_v6  ;;  %v2327_v10 = vld [vmem:[%s11399_s28 + $0x6430] sm:$0xff]  ;;  %v2329_v11 = vld [vmem:[%s11399_s28 + $0x6468] sm:$0xff] }
  0xf6   : > { %2322 = vst [vmem:[%s11407_s29 + $0xe38] sm:$0xff] %v2321_v7  ;;  %2324 = vst [vmem:[%s11407_s29 + $0xe40] sm:$0xff] %v2323_v8  ;;  %v2331_v12 = vld [vmem:[%s11399_s28 + $0x64a0] sm:$0xff]  ;;  %v2333_v13 = vld [vmem:[%s11399_s28 + $0x64d8] sm:$0xff] }
  0xf7   : > { %2326 = vst [vmem:[%s11407_s29 + $0xe48] sm:$0xff] %v2325_v9  ;;  %2328 = vst [vmem:[%s11407_s29 + $0xe50] sm:$0xff] %v2327_v10  ;;  %v2335_v14 = vld [vmem:[%s11399_s28 + $0x6510] sm:$0xff]  ;;  %v2337_v15 = vld [vmem:[%s11399_s28 + $0x6548] sm:$0xff] }
  0xf8   : > { %2330 = vst [vmem:[%s11407_s29 + $0xe58] sm:$0xff] %v2329_v11  ;;  %2332 = vst [vmem:[%s11407_s29 + $0xe60] sm:$0xff] %v2331_v12  ;;  %v2339_v16 = vld [vmem:[%s11399_s28 + $0x6580] sm:$0xff]  ;;  %v2341_v17 = vld [vmem:[%s11399_s28 + $0x65b8] sm:$0xff] }
  0xf9   : > { %2334 = vst [vmem:[%s11407_s29 + $0xe68] sm:$0xff] %v2333_v13  ;;  %2336 = vst [vmem:[%s11407_s29 + $0xe70] sm:$0xff] %v2335_v14  ;;  %v2343_v18 = vld [vmem:[%s11399_s28 + $0x65f0] sm:$0xff]  ;;  %v2345_v19 = vld [vmem:[%s11399_s28 + $0x6628] sm:$0xff] }
  0xfa   : > { %2338 = vst [vmem:[%s11407_s29 + $0xe78] sm:$0xff] %v2337_v15  ;;  %2340 = vst [vmem:[%s11407_s29 + $0xe80] sm:$0xff] %v2339_v16  ;;  %v2347_v20 = vld [vmem:[%s11399_s28 + $0x6660] sm:$0xff]  ;;  %v2349_v21 = vld [vmem:[%s11399_s28 + $0x6698] sm:$0xff] }
  0xfb   : > { %2342 = vst [vmem:[%s11407_s29 + $0xe88] sm:$0xff] %v2341_v17  ;;  %2344 = vst [vmem:[%s11407_s29 + $0xe90] sm:$0xff] %v2343_v18  ;;  %v2351_v22 = vld [vmem:[%s11399_s28 + $0x66d0] sm:$0xff]  ;;  %v2353_v23 = vld [vmem:[%s11399_s28 + $0x6708] sm:$0xff] }
  0xfc   : > { %2346 = vst [vmem:[%s11407_s29 + $0xe98] sm:$0xff] %v2345_v19  ;;  %2348 = vst [vmem:[%s11407_s29 + $0xea0] sm:$0xff] %v2347_v20  ;;  %v2355_v24 = vld [vmem:[%s11399_s28 + $0x6740] sm:$0xff]  ;;  %v2357_v25 = vld [vmem:[%s11399_s28 + $0x6778] sm:$0xff] }
  0xfd   : > { %2350 = vst [vmem:[%s11407_s29 + $0xea8] sm:$0xff] %v2349_v21  ;;  %2352 = vst [vmem:[%s11407_s29 + $0xeb0] sm:$0xff] %v2351_v22  ;;  %v2359_v26 = vld [vmem:[%s11399_s28 + $0x67b0] sm:$0xff]  ;;  %v2361_v27 = vld [vmem:[%s11399_s28 + $0x67e8] sm:$0xff] }
  0xfe   : > { %2354 = vst [vmem:[%s11407_s29 + $0xeb8] sm:$0xff] %v2353_v23  ;;  %2356 = vst [vmem:[%s11407_s29 + $0xec0] sm:$0xff] %v2355_v24  ;;  %v2363_v28 = vld [vmem:[%s11399_s28 + $0x6820] sm:$0xff]  ;;  %v2365_v29 = vld [vmem:[%s11399_s28 + $0x6858] sm:$0xff] }
  0xff   : > { %2358 = vst [vmem:[%s11407_s29 + $0xec8] sm:$0xff] %v2357_v25  ;;  %2360 = vst [vmem:[%s11407_s29 + $0xed0] sm:$0xff] %v2359_v26  ;;  %v2367_v30 = vld [vmem:[%s11399_s28 + $0x6890] sm:$0xff]  ;;  %v2369_v31 = vld [vmem:[%s11399_s28 + $0x68c8] sm:$0xff] }
 0x100   : > { %2362 = vst [vmem:[%s11407_s29 + $0xed8] sm:$0xff] %v2361_v27  ;;  %2364 = vst [vmem:[%s11407_s29 + $0xee0] sm:$0xff] %v2363_v28  ;;  %v2371_v32 = vld [vmem:[%s11399_s28 + $0x6900] sm:$0xff]  ;;  %v2373_v33 = vld [vmem:[%s11399_s28 + $0x6938] sm:$0xff] }
 0x101   : > { %2366 = vst [vmem:[%s11407_s29 + $0xee8] sm:$0xff] %v2365_v29  ;;  %2368 = vst [vmem:[%s11407_s29 + $0xef0] sm:$0xff] %v2367_v30  ;;  %v2375_v34 = vld [vmem:[%s11399_s28 + $0x6970] sm:$0xff]  ;;  %v2377_v35 = vld [vmem:[%s11399_s28 + $0x69a8] sm:$0xff] }
 0x102   : > { %2370 = vst [vmem:[%s11407_s29 + $0xef8] sm:$0xff] %v2369_v31  ;;  %2372 = vst [vmem:[%s11407_s29 + $0xf00] sm:$0xff] %v2371_v32  ;;  %v2379_v36 = vld [vmem:[%s11399_s28 + $0x69e0] sm:$0xff]  ;;  %v2381_v37 = vld [vmem:[%s11399_s28 + $0x6a18] sm:$0xff] }
 0x103   : > { %2374 = vst [vmem:[%s11407_s29 + $0xf08] sm:$0xff] %v2373_v33  ;;  %2376 = vst [vmem:[%s11407_s29 + $0xf10] sm:$0xff] %v2375_v34  ;;  %v2383_v38 = vld [vmem:[%s11399_s28 + $0x6a50] sm:$0xff]  ;;  %v2385_v39 = vld [vmem:[%s11399_s28 + $0x6a88] sm:$0xff] }
 0x104   : > { %2378 = vst [vmem:[%s11407_s29 + $0xf18] sm:$0xff] %v2377_v35  ;;  %2380 = vst [vmem:[%s11407_s29 + $0xf20] sm:$0xff] %v2379_v36  ;;  %v2387_v40 = vld [vmem:[%s11399_s28 + $0x6ac0] sm:$0xff]  ;;  %v2389_v41 = vld [vmem:[%s11399_s28 + $0x6af8] sm:$0xff] }
 0x105   : > { %2382 = vst [vmem:[%s11407_s29 + $0xf28] sm:$0xff] %v2381_v37  ;;  %2384 = vst [vmem:[%s11407_s29 + $0xf30] sm:$0xff] %v2383_v38  ;;  %v2391_v42 = vld [vmem:[%s11399_s28 + $0x6b30] sm:$0xff]  ;;  %v2393_v43 = vld [vmem:[%s11399_s28 + $0x6b68] sm:$0xff] }
 0x106   : > { %2386 = vst [vmem:[%s11407_s29 + $0xf38] sm:$0xff] %v2385_v39  ;;  %2388 = vst [vmem:[%s11407_s29 + $0xf40] sm:$0xff] %v2387_v40  ;;  %v2395_v44 = vld [vmem:[%s11399_s28 + $0x6ba0] sm:$0xff]  ;;  %v2397_v45 = vld [vmem:[%s11399_s28 + $0x6bd8] sm:$0xff] }
 0x107   : > { %2390 = vst [vmem:[%s11407_s29 + $0xf48] sm:$0xff] %v2389_v41  ;;  %2392 = vst [vmem:[%s11407_s29 + $0xf50] sm:$0xff] %v2391_v42  ;;  %v2399_v46 = vld [vmem:[%s11399_s28 + $0x6c10] sm:$0xff]  ;;  %v2401_v47 = vld [vmem:[%s11399_s28 + $0x6c48] sm:$0xff] }
 0x108   : > { %2394 = vst [vmem:[%s11407_s29 + $0xf58] sm:$0xff] %v2393_v43  ;;  %2396 = vst [vmem:[%s11407_s29 + $0xf60] sm:$0xff] %v2395_v44  ;;  %v2403_v48 = vld [vmem:[%s11399_s28 + $0x6c80] sm:$0xff]  ;;  %v2405_v49 = vld [vmem:[%s11399_s28 + $0x6cb8] sm:$0xff] }
 0x109   : > { %2398 = vst [vmem:[%s11407_s29 + $0xf68] sm:$0xff] %v2397_v45  ;;  %2400 = vst [vmem:[%s11407_s29 + $0xf70] sm:$0xff] %v2399_v46  ;;  %v2407_v50 = vld [vmem:[%s11399_s28 + $0x6cf0] sm:$0xff]  ;;  %v2409_v51 = vld [vmem:[%s11399_s28 + $0x6d28] sm:$0xff] }
 0x10a   : > { %2402 = vst [vmem:[%s11407_s29 + $0xf78] sm:$0xff] %v2401_v47  ;;  %2404 = vst [vmem:[%s11407_s29 + $0xf80] sm:$0xff] %v2403_v48  ;;  %v2411_v52 = vld [vmem:[%s11399_s28 + $0x6d60] sm:$0xff]  ;;  %v2413_v53 = vld [vmem:[%s11399_s28 + $0x6d98] sm:$0xff] }
 0x10b   : > { %2406 = vst [vmem:[%s11407_s29 + $0xf88] sm:$0xff] %v2405_v49  ;;  %2408 = vst [vmem:[%s11407_s29 + $0xf90] sm:$0xff] %v2407_v50  ;;  %v2415_v54 = vld [vmem:[%s11399_s28 + $0x6dd0] sm:$0xff]  ;;  %v2417_v55 = vld [vmem:[%s11399_s28 + $0x6e08] sm:$0xff] }
 0x10c   : > { %2410 = vst [vmem:[%s11407_s29 + $0xf98] sm:$0xff] %v2409_v51  ;;  %2412 = vst [vmem:[%s11407_s29 + $0xfa0] sm:$0xff] %v2411_v52  ;;  %v2419_v56 = vld [vmem:[%s11399_s28 + $0x6e40] sm:$0xff]  ;;  %v2421_v57 = vld [vmem:[%s11399_s28 + $0x6e78] sm:$0xff] }
 0x10d   : > { %2414 = vst [vmem:[%s11407_s29 + $0xfa8] sm:$0xff] %v2413_v53  ;;  %2416 = vst [vmem:[%s11407_s29 + $0xfb0] sm:$0xff] %v2415_v54  ;;  %v2423_v58 = vld [vmem:[%s11399_s28 + $0x6eb0] sm:$0xff]  ;;  %v2425_v59 = vld [vmem:[%s11399_s28 + $0x6ee8] sm:$0xff] }
 0x10e   : > { %2418 = vst [vmem:[%s11407_s29 + $0xfb8] sm:$0xff] %v2417_v55  ;;  %2420 = vst [vmem:[%s11407_s29 + $0xfc0] sm:$0xff] %v2419_v56  ;;  %v2427_v60 = vld [vmem:[%s11399_s28 + $0x6f20] sm:$0xff]  ;;  %v2429_v61 = vld [vmem:[%s11399_s28 + $0x6f58] sm:$0xff] }
 0x10f   : > { %2422 = vst [vmem:[%s11407_s29 + $0xfc8] sm:$0xff] %v2421_v57  ;;  %2424 = vst [vmem:[%s11407_s29 + $0xfd0] sm:$0xff] %v2423_v58  ;;  %v2431_v62 = vld [vmem:[%s11399_s28 + $0x6f90] sm:$0xff]  ;;  %v2433_v63 = vld [vmem:[%s11399_s28 + $0x6fc8] sm:$0xff] }
 0x110   : > { %2426 = vst [vmem:[%s11407_s29 + $0xfd8] sm:$0xff] %v2425_v59  ;;  %2428 = vst [vmem:[%s11407_s29 + $0xfe0] sm:$0xff] %v2427_v60  ;;  %v2435_v0 = vld [vmem:[%s11399_s28 + $0x7000] sm:$0xff]  ;;  %v2437_v1 = vld [vmem:[%s11399_s28 + $0x7038] sm:$0xff] }
 0x111   : > { %2430 = vst [vmem:[%s11407_s29 + $0xfe8] sm:$0xff] %v2429_v61  ;;  %2432 = vst [vmem:[%s11407_s29 + $0xff0] sm:$0xff] %v2431_v62  ;;  %v2439_v2 = vld [vmem:[%s11399_s28 + $0x7070] sm:$0xff]  ;;  %v2441_v3 = vld [vmem:[%s11399_s28 + $0x70a8] sm:$0xff] }
 0x112   : > { %2434 = vst [vmem:[%s11407_s29 + $0xff8] sm:$0xff] %v2433_v63  ;;  %2436 = vst [vmem:[%s11407_s29 + $0x1000] sm:$0xff] %v2435_v0  ;;  %v2443_v4 = vld [vmem:[%s11399_s28 + $0x70e0] sm:$0xff]  ;;  %v2445_v5 = vld [vmem:[%s11399_s28 + $0x7118] sm:$0xff] }
 0x113   : > { %2438 = vst [vmem:[%s11407_s29 + $0x1008] sm:$0xff] %v2437_v1  ;;  %2440 = vst [vmem:[%s11407_s29 + $0x1010] sm:$0xff] %v2439_v2  ;;  %v2447_v6 = vld [vmem:[%s11399_s28 + $0x7150] sm:$0xff]  ;;  %v2449_v7 = vld [vmem:[%s11399_s28 + $0x7188] sm:$0xff] }
 0x114   : > { %2442 = vst [vmem:[%s11407_s29 + $0x1018] sm:$0xff] %v2441_v3  ;;  %2444 = vst [vmem:[%s11407_s29 + $0x1020] sm:$0xff] %v2443_v4  ;;  %v2451_v8 = vld [vmem:[%s11399_s28 + $0x71c0] sm:$0xff]  ;;  %v2453_v9 = vld [vmem:[%s11399_s28 + $0x71f8] sm:$0xff] }
 0x115   : > { %2446 = vst [vmem:[%s11407_s29 + $0x1028] sm:$0xff] %v2445_v5  ;;  %2448 = vst [vmem:[%s11407_s29 + $0x1030] sm:$0xff] %v2447_v6  ;;  %v2455_v10 = vld [vmem:[%s11399_s28 + $0x7230] sm:$0xff]  ;;  %v2457_v11 = vld [vmem:[%s11399_s28 + $0x7268] sm:$0xff] }
 0x116   : > { %2450 = vst [vmem:[%s11407_s29 + $0x1038] sm:$0xff] %v2449_v7  ;;  %2452 = vst [vmem:[%s11407_s29 + $0x1040] sm:$0xff] %v2451_v8  ;;  %v2459_v12 = vld [vmem:[%s11399_s28 + $0x72a0] sm:$0xff]  ;;  %v2461_v13 = vld [vmem:[%s11399_s28 + $0x72d8] sm:$0xff] }
 0x117   : > { %2454 = vst [vmem:[%s11407_s29 + $0x1048] sm:$0xff] %v2453_v9  ;;  %2456 = vst [vmem:[%s11407_s29 + $0x1050] sm:$0xff] %v2455_v10  ;;  %v2463_v14 = vld [vmem:[%s11399_s28 + $0x7310] sm:$0xff]  ;;  %v2465_v15 = vld [vmem:[%s11399_s28 + $0x7348] sm:$0xff] }
 0x118   : > { %2458 = vst [vmem:[%s11407_s29 + $0x1058] sm:$0xff] %v2457_v11  ;;  %2460 = vst [vmem:[%s11407_s29 + $0x1060] sm:$0xff] %v2459_v12  ;;  %v2467_v16 = vld [vmem:[%s11399_s28 + $0x7380] sm:$0xff]  ;;  %v2469_v17 = vld [vmem:[%s11399_s28 + $0x73b8] sm:$0xff] }
 0x119   : > { %2462 = vst [vmem:[%s11407_s29 + $0x1068] sm:$0xff] %v2461_v13  ;;  %2464 = vst [vmem:[%s11407_s29 + $0x1070] sm:$0xff] %v2463_v14  ;;  %v2471_v18 = vld [vmem:[%s11399_s28 + $0x73f0] sm:$0xff]  ;;  %v2473_v19 = vld [vmem:[%s11399_s28 + $0x7428] sm:$0xff] }
 0x11a   : > { %2466 = vst [vmem:[%s11407_s29 + $0x1078] sm:$0xff] %v2465_v15  ;;  %2468 = vst [vmem:[%s11407_s29 + $0x1080] sm:$0xff] %v2467_v16  ;;  %v2475_v20 = vld [vmem:[%s11399_s28 + $0x7460] sm:$0xff]  ;;  %v2477_v21 = vld [vmem:[%s11399_s28 + $0x7498] sm:$0xff] }
 0x11b   : > { %2470 = vst [vmem:[%s11407_s29 + $0x1088] sm:$0xff] %v2469_v17  ;;  %2472 = vst [vmem:[%s11407_s29 + $0x1090] sm:$0xff] %v2471_v18  ;;  %v2479_v22 = vld [vmem:[%s11399_s28 + $0x74d0] sm:$0xff]  ;;  %v2481_v23 = vld [vmem:[%s11399_s28 + $0x7508] sm:$0xff] }
 0x11c   : > { %2474 = vst [vmem:[%s11407_s29 + $0x1098] sm:$0xff] %v2473_v19  ;;  %2476 = vst [vmem:[%s11407_s29 + $0x10a0] sm:$0xff] %v2475_v20  ;;  %v2483_v24 = vld [vmem:[%s11399_s28 + $0x7540] sm:$0xff]  ;;  %v2485_v25 = vld [vmem:[%s11399_s28 + $0x7578] sm:$0xff] }
 0x11d   : > { %2478 = vst [vmem:[%s11407_s29 + $0x10a8] sm:$0xff] %v2477_v21  ;;  %2480 = vst [vmem:[%s11407_s29 + $0x10b0] sm:$0xff] %v2479_v22  ;;  %v2487_v26 = vld [vmem:[%s11399_s28 + $0x75b0] sm:$0xff]  ;;  %v2489_v27 = vld [vmem:[%s11399_s28 + $0x75e8] sm:$0xff] }
 0x11e   : > { %2482 = vst [vmem:[%s11407_s29 + $0x10b8] sm:$0xff] %v2481_v23  ;;  %2484 = vst [vmem:[%s11407_s29 + $0x10c0] sm:$0xff] %v2483_v24  ;;  %v2491_v28 = vld [vmem:[%s11399_s28 + $0x7620] sm:$0xff]  ;;  %v2493_v29 = vld [vmem:[%s11399_s28 + $0x7658] sm:$0xff] }
 0x11f   : > { %2486 = vst [vmem:[%s11407_s29 + $0x10c8] sm:$0xff] %v2485_v25  ;;  %2488 = vst [vmem:[%s11407_s29 + $0x10d0] sm:$0xff] %v2487_v26  ;;  %v2495_v30 = vld [vmem:[%s11399_s28 + $0x7690] sm:$0xff]  ;;  %v2497_v31 = vld [vmem:[%s11399_s28 + $0x76c8] sm:$0xff] }
 0x120   : > { %2490 = vst [vmem:[%s11407_s29 + $0x10d8] sm:$0xff] %v2489_v27  ;;  %2492 = vst [vmem:[%s11407_s29 + $0x10e0] sm:$0xff] %v2491_v28  ;;  %v2499_v32 = vld [vmem:[%s11399_s28 + $0x7700] sm:$0xff]  ;;  %v2501_v33 = vld [vmem:[%s11399_s28 + $0x7738] sm:$0xff] }
 0x121   : > { %2494 = vst [vmem:[%s11407_s29 + $0x10e8] sm:$0xff] %v2493_v29  ;;  %2496 = vst [vmem:[%s11407_s29 + $0x10f0] sm:$0xff] %v2495_v30  ;;  %v2503_v34 = vld [vmem:[%s11399_s28 + $0x7770] sm:$0xff]  ;;  %v2505_v35 = vld [vmem:[%s11399_s28 + $0x77a8] sm:$0xff] }
 0x122   : > { %2498 = vst [vmem:[%s11407_s29 + $0x10f8] sm:$0xff] %v2497_v31  ;;  %2500 = vst [vmem:[%s11407_s29 + $0x1100] sm:$0xff] %v2499_v32  ;;  %v2507_v36 = vld [vmem:[%s11399_s28 + $0x77e0] sm:$0xff]  ;;  %v2509_v37 = vld [vmem:[%s11399_s28 + $0x7818] sm:$0xff] }
 0x123   : > { %2502 = vst [vmem:[%s11407_s29 + $0x1108] sm:$0xff] %v2501_v33  ;;  %2504 = vst [vmem:[%s11407_s29 + $0x1110] sm:$0xff] %v2503_v34  ;;  %v2511_v38 = vld [vmem:[%s11399_s28 + $0x7850] sm:$0xff]  ;;  %v2513_v39 = vld [vmem:[%s11399_s28 + $0x7888] sm:$0xff] }
 0x124   : > { %2506 = vst [vmem:[%s11407_s29 + $0x1118] sm:$0xff] %v2505_v35  ;;  %2508 = vst [vmem:[%s11407_s29 + $0x1120] sm:$0xff] %v2507_v36  ;;  %v2515_v40 = vld [vmem:[%s11399_s28 + $0x78c0] sm:$0xff]  ;;  %v2517_v41 = vld [vmem:[%s11399_s28 + $0x78f8] sm:$0xff] }
 0x125   : > { %2510 = vst [vmem:[%s11407_s29 + $0x1128] sm:$0xff] %v2509_v37  ;;  %2512 = vst [vmem:[%s11407_s29 + $0x1130] sm:$0xff] %v2511_v38  ;;  %v2519_v42 = vld [vmem:[%s11399_s28 + $0x7930] sm:$0xff]  ;;  %v2521_v43 = vld [vmem:[%s11399_s28 + $0x7968] sm:$0xff] }
 0x126   : > { %2514 = vst [vmem:[%s11407_s29 + $0x1138] sm:$0xff] %v2513_v39  ;;  %2516 = vst [vmem:[%s11407_s29 + $0x1140] sm:$0xff] %v2515_v40  ;;  %v2523_v44 = vld [vmem:[%s11399_s28 + $0x79a0] sm:$0xff]  ;;  %v2525_v45 = vld [vmem:[%s11399_s28 + $0x79d8] sm:$0xff] }
 0x127   : > { %2518 = vst [vmem:[%s11407_s29 + $0x1148] sm:$0xff] %v2517_v41  ;;  %2520 = vst [vmem:[%s11407_s29 + $0x1150] sm:$0xff] %v2519_v42  ;;  %v2527_v46 = vld [vmem:[%s11399_s28 + $0x7a10] sm:$0xff]  ;;  %v2529_v47 = vld [vmem:[%s11399_s28 + $0x7a48] sm:$0xff] }
 0x128   : > { %2522 = vst [vmem:[%s11407_s29 + $0x1158] sm:$0xff] %v2521_v43  ;;  %2524 = vst [vmem:[%s11407_s29 + $0x1160] sm:$0xff] %v2523_v44  ;;  %v2531_v48 = vld [vmem:[%s11399_s28 + $0x7a80] sm:$0xff]  ;;  %v2533_v49 = vld [vmem:[%s11399_s28 + $0x7ab8] sm:$0xff] }
 0x129   : > { %2526 = vst [vmem:[%s11407_s29 + $0x1168] sm:$0xff] %v2525_v45  ;;  %2528 = vst [vmem:[%s11407_s29 + $0x1170] sm:$0xff] %v2527_v46  ;;  %v2535_v50 = vld [vmem:[%s11399_s28 + $0x7af0] sm:$0xff]  ;;  %v2537_v51 = vld [vmem:[%s11399_s28 + $0x7b28] sm:$0xff] }
 0x12a   : > { %2530 = vst [vmem:[%s11407_s29 + $0x1178] sm:$0xff] %v2529_v47  ;;  %2532 = vst [vmem:[%s11407_s29 + $0x1180] sm:$0xff] %v2531_v48  ;;  %v2539_v52 = vld [vmem:[%s11399_s28 + $0x7b60] sm:$0xff]  ;;  %v2541_v53 = vld [vmem:[%s11399_s28 + $0x7b98] sm:$0xff] }
 0x12b   : > { %2534 = vst [vmem:[%s11407_s29 + $0x1188] sm:$0xff] %v2533_v49  ;;  %2536 = vst [vmem:[%s11407_s29 + $0x1190] sm:$0xff] %v2535_v50  ;;  %v2543_v54 = vld [vmem:[%s11399_s28 + $0x7bd0] sm:$0xff]  ;;  %v2545_v55 = vld [vmem:[%s11399_s28 + $0x7c08] sm:$0xff] }
 0x12c   : > { %2538 = vst [vmem:[%s11407_s29 + $0x1198] sm:$0xff] %v2537_v51  ;;  %2540 = vst [vmem:[%s11407_s29 + $0x11a0] sm:$0xff] %v2539_v52  ;;  %v2547_v56 = vld [vmem:[%s11399_s28 + $0x7c40] sm:$0xff]  ;;  %v2549_v57 = vld [vmem:[%s11399_s28 + $0x7c78] sm:$0xff] }
 0x12d   : > { %2542 = vst [vmem:[%s11407_s29 + $0x11a8] sm:$0xff] %v2541_v53  ;;  %2544 = vst [vmem:[%s11407_s29 + $0x11b0] sm:$0xff] %v2543_v54  ;;  %v2551_v58 = vld [vmem:[%s11399_s28 + $0x7cb0] sm:$0xff]  ;;  %v2553_v59 = vld [vmem:[%s11399_s28 + $0x7ce8] sm:$0xff] }
 0x12e   : > { %2546 = vst [vmem:[%s11407_s29 + $0x11b8] sm:$0xff] %v2545_v55  ;;  %2548 = vst [vmem:[%s11407_s29 + $0x11c0] sm:$0xff] %v2547_v56  ;;  %v2555_v60 = vld [vmem:[%s11399_s28 + $0x7d20] sm:$0xff]  ;;  %v2557_v61 = vld [vmem:[%s11399_s28 + $0x7d58] sm:$0xff] }
 0x12f   : > { %2550 = vst [vmem:[%s11407_s29 + $0x11c8] sm:$0xff] %v2549_v57  ;;  %2552 = vst [vmem:[%s11407_s29 + $0x11d0] sm:$0xff] %v2551_v58  ;;  %v2559_v62 = vld [vmem:[%s11399_s28 + $0x7d90] sm:$0xff]  ;;  %v2561_v63 = vld [vmem:[%s11399_s28 + $0x7dc8] sm:$0xff] }
 0x130   : > { %2554 = vst [vmem:[%s11407_s29 + $0x11d8] sm:$0xff] %v2553_v59  ;;  %2556 = vst [vmem:[%s11407_s29 + $0x11e0] sm:$0xff] %v2555_v60  ;;  %v2563_v0 = vld [vmem:[%s11399_s28 + $0x7e00] sm:$0xff]  ;;  %v2565_v1 = vld [vmem:[%s11399_s28 + $0x7e38] sm:$0xff] }
 0x131   : > { %2558 = vst [vmem:[%s11407_s29 + $0x11e8] sm:$0xff] %v2557_v61  ;;  %2560 = vst [vmem:[%s11407_s29 + $0x11f0] sm:$0xff] %v2559_v62  ;;  %v2567_v2 = vld [vmem:[%s11399_s28 + $0x7e70] sm:$0xff]  ;;  %v2569_v3 = vld [vmem:[%s11399_s28 + $0x7ea8] sm:$0xff] }
 0x132   : > { %2562 = vst [vmem:[%s11407_s29 + $0x11f8] sm:$0xff] %v2561_v63  ;;  %2564 = vst [vmem:[%s11407_s29 + $0x1200] sm:$0xff] %v2563_v0  ;;  %v2571_v4 = vld [vmem:[%s11399_s28 + $0x7ee0] sm:$0xff]  ;;  %v2573_v5 = vld [vmem:[%s11399_s28 + $0x7f18] sm:$0xff] }
 0x133   : > { %2566 = vst [vmem:[%s11407_s29 + $0x1208] sm:$0xff] %v2565_v1  ;;  %2568 = vst [vmem:[%s11407_s29 + $0x1210] sm:$0xff] %v2567_v2  ;;  %v2575_v6 = vld [vmem:[%s11399_s28 + $0x7f50] sm:$0xff]  ;;  %v2577_v7 = vld [vmem:[%s11399_s28 + $0x7f88] sm:$0xff] }
 0x134   : > { %2570 = vst [vmem:[%s11407_s29 + $0x1218] sm:$0xff] %v2569_v3  ;;  %2572 = vst [vmem:[%s11407_s29 + $0x1220] sm:$0xff] %v2571_v4  ;;  %v2579_v8 = vld [vmem:[%s11399_s28 + $0x7fc0] sm:$0xff]  ;;  %v2581_v9 = vld [vmem:[%s11399_s28 + $0x7ff8] sm:$0xff] }
 0x135   : > { %2574 = vst [vmem:[%s11407_s29 + $0x1228] sm:$0xff] %v2573_v5  ;;  %2576 = vst [vmem:[%s11407_s29 + $0x1230] sm:$0xff] %v2575_v6  ;;  %v2583_v10 = vld [vmem:[%s11399_s28 + $0x8030] sm:$0xff]  ;;  %v2585_v11 = vld [vmem:[%s11399_s28 + $0x8068] sm:$0xff] }
 0x136   : > { %2578 = vst [vmem:[%s11407_s29 + $0x1238] sm:$0xff] %v2577_v7  ;;  %2580 = vst [vmem:[%s11407_s29 + $0x1240] sm:$0xff] %v2579_v8  ;;  %v2587_v12 = vld [vmem:[%s11399_s28 + $0x80a0] sm:$0xff]  ;;  %v2589_v13 = vld [vmem:[%s11399_s28 + $0x80d8] sm:$0xff] }
 0x137   : > { %2582 = vst [vmem:[%s11407_s29 + $0x1248] sm:$0xff] %v2581_v9  ;;  %2584 = vst [vmem:[%s11407_s29 + $0x1250] sm:$0xff] %v2583_v10  ;;  %v2591_v14 = vld [vmem:[%s11399_s28 + $0x8110] sm:$0xff]  ;;  %v2593_v15 = vld [vmem:[%s11399_s28 + $0x8148] sm:$0xff] }
 0x138   : > { %2586 = vst [vmem:[%s11407_s29 + $0x1258] sm:$0xff] %v2585_v11  ;;  %2588 = vst [vmem:[%s11407_s29 + $0x1260] sm:$0xff] %v2587_v12  ;;  %v2595_v16 = vld [vmem:[%s11399_s28 + $0x8180] sm:$0xff]  ;;  %v2597_v17 = vld [vmem:[%s11399_s28 + $0x81b8] sm:$0xff] }
 0x139   : > { %2590 = vst [vmem:[%s11407_s29 + $0x1268] sm:$0xff] %v2589_v13  ;;  %2592 = vst [vmem:[%s11407_s29 + $0x1270] sm:$0xff] %v2591_v14  ;;  %v2599_v18 = vld [vmem:[%s11399_s28 + $0x81f0] sm:$0xff]  ;;  %v2601_v19 = vld [vmem:[%s11399_s28 + $0x8228] sm:$0xff] }
 0x13a   : > { %2594 = vst [vmem:[%s11407_s29 + $0x1278] sm:$0xff] %v2593_v15  ;;  %2596 = vst [vmem:[%s11407_s29 + $0x1280] sm:$0xff] %v2595_v16  ;;  %v2603_v20 = vld [vmem:[%s11399_s28 + $0x8260] sm:$0xff]  ;;  %v2605_v21 = vld [vmem:[%s11399_s28 + $0x8298] sm:$0xff] }
 0x13b   : > { %2598 = vst [vmem:[%s11407_s29 + $0x1288] sm:$0xff] %v2597_v17  ;;  %2600 = vst [vmem:[%s11407_s29 + $0x1290] sm:$0xff] %v2599_v18  ;;  %v2607_v22 = vld [vmem:[%s11399_s28 + $0x82d0] sm:$0xff]  ;;  %v2609_v23 = vld [vmem:[%s11399_s28 + $0x8308] sm:$0xff] }
 0x13c   : > { %2602 = vst [vmem:[%s11407_s29 + $0x1298] sm:$0xff] %v2601_v19  ;;  %2604 = vst [vmem:[%s11407_s29 + $0x12a0] sm:$0xff] %v2603_v20  ;;  %v2611_v24 = vld [vmem:[%s11399_s28 + $0x8340] sm:$0xff]  ;;  %v2613_v25 = vld [vmem:[%s11399_s28 + $0x8378] sm:$0xff] }
 0x13d   : > { %2606 = vst [vmem:[%s11407_s29 + $0x12a8] sm:$0xff] %v2605_v21  ;;  %2608 = vst [vmem:[%s11407_s29 + $0x12b0] sm:$0xff] %v2607_v22  ;;  %v2615_v26 = vld [vmem:[%s11399_s28 + $0x83b0] sm:$0xff]  ;;  %v2617_v27 = vld [vmem:[%s11399_s28 + $0x83e8] sm:$0xff] }
 0x13e   : > { %2610 = vst [vmem:[%s11407_s29 + $0x12b8] sm:$0xff] %v2609_v23  ;;  %2612 = vst [vmem:[%s11407_s29 + $0x12c0] sm:$0xff] %v2611_v24  ;;  %v2619_v28 = vld [vmem:[%s11399_s28 + $0x8420] sm:$0xff]  ;;  %v2621_v29 = vld [vmem:[%s11399_s28 + $0x8458] sm:$0xff] }
 0x13f   : > { %2614 = vst [vmem:[%s11407_s29 + $0x12c8] sm:$0xff] %v2613_v25  ;;  %2616 = vst [vmem:[%s11407_s29 + $0x12d0] sm:$0xff] %v2615_v26  ;;  %v2623_v30 = vld [vmem:[%s11399_s28 + $0x8490] sm:$0xff]  ;;  %v2625_v31 = vld [vmem:[%s11399_s28 + $0x84c8] sm:$0xff] }
 0x140   : > { %2618 = vst [vmem:[%s11407_s29 + $0x12d8] sm:$0xff] %v2617_v27  ;;  %2620 = vst [vmem:[%s11407_s29 + $0x12e0] sm:$0xff] %v2619_v28 }
 0x141   : > { %2622 = vst [vmem:[%s11407_s29 + $0x12e8] sm:$0xff] %v2621_v29  ;;  %2624 = vst [vmem:[%s11407_s29 + $0x12f0] sm:$0xff] %v2623_v30 }
 0x142   : > { %2626 = vst [vmem:[%s11407_s29 + $0x12f8] sm:$0xff] %v2625_v31 }
 0x143 PF: > { %p8510_p5 = scmp.ge.s32.totalorder %s11338_s17, 1  ;;  %p5115_p6 = scmp.lt.s32.totalorder %s11338_s17, 8 }
 0x145   : > { %p5116_p7 = pnand %p8510_p5, %p5115_p6 }
 0x146   : > { %s5122_s30 = sand.u32 (!%p5116_p7), 1, %s11330_s15   ;;  %v5173_v32 = vld [vmem:[%s13367_s0 + $0x8] sm:$0xff] (!%p5116_p7)  ;;  %v5191_v33 = vld [vmem:[%s13367_s0 + $0x98] sm:$0xff] (!%p5116_p7)  ;;  %s8511_s28 = sshll.u32 (!%p5116_p7), %s8504_s18, 1 }
 0x147   : > { %5119 = sbr.rel (%p5116_p7) target bundleno = 1195 (0x4ab), region = 84  ;;  %7098 = vmatprep.mubr.f32.mxu1 (!%p5116_p7), %v5173_v32  ;;  %7737 = vmatprep.mubr.f32.mxu0 (!%p5116_p7), %v5191_v33  ;;  %p5157_p8 = scmp.lt.s32.totalorder (!%p5116_p7), %s8511_s28, 13 }
 0x148   : > { %s10379_s9 = smul.u32 (!%p5116_p7), 4864, %s5122_s30 }
 0x14a   : > { %s12628_s10 = scalar_lea.vmem (!%p5116_p7), [#allocation2], %s10379_s9 }
 0x14b   : > { %v10404_v34 = vld [vmem:[%s12628_s10 + $0x4] ss:$8 sps:$4 sm:$0xff] (!%p5116_p7)   ;;  %v10408_v36 = vld [vmem:[%s12628_s10] ss:$8 sps:$4 sm:$0xff] (!%p5116_p7)   ;;  %v10410_v38 = vld [vmem:[%s12628_s10 + $0x14] ss:$8 sps:$4 sm:$0xff] (!%p5116_p7)  }
 0x14c   : > { %v10406_v35 = vld [vmem:[%s12628_s10 + $0x904] ss:$8 sps:$4 sm:$0xff] (!%p5116_p7)   ;;  %8519 = vmatprep.subr.bf16.mxu1 (!%p5116_p7), %v10404_v34  ;;  %v10409_v37 = vld [vmem:[%s12628_s10 + $0x900] ss:$8 sps:$4 sm:$0xff] (!%p5116_p7)   ;;  %v10412_v39 = vld [vmem:[%s12628_s10 + $0x914] ss:$8 sps:$4 sm:$0xff] (!%p5116_p7)  }
 0x14d   : > { %9095 = vmatprep.subr.bf16.mxu0 (!%p5116_p7), %v10406_v35  ;;  %8521 = vmatpush1.bf16.msra.mxu1 (!%p5116_p7), %v10408_v36  ;;  %v10414_v40 = vld [vmem:[%s12628_s10 + $0x10] ss:$8 sps:$4 sm:$0xff] (!%p5116_p7)   ;;  %v10416_v42 = vld [vmem:[%s12628_s10 + $0x24] ss:$8 sps:$4 sm:$0xff] (!%p5116_p7)   ;;  %v10420_v44 = vld [vmem:[%s12628_s10 + $0x20] ss:$8 sps:$4 sm:$0xff] (!%p5116_p7)  }
 0x14e   : > { %9097 = vmatpush1.bf16.msra.mxu0 %v10409_v37  ;;  %8523 = vmatprep.subr.bf16.mxu1 %v10410_v38  ;;  %v10415_v41 = vld [vmem:[%s12628_s10 + $0x910] ss:$8 sps:$4 sm:$0xff]   ;;  %v10418_v43 = vld [vmem:[%s12628_s10 + $0x924] ss:$8 sps:$4 sm:$0xff]   ;;  %v10421_v45 = vld [vmem:[%s12628_s10 + $0x920] ss:$8 sps:$4 sm:$0xff]  }
 0x14f   : > { %9099 = vmatprep.subr.bf16.mxu0 %v10412_v39  ;;  %v10422_v46 = vld [vmem:[%s12628_s10 + $0x34] ss:$8 sps:$4 sm:$0xff]   ;;  %v10426_v48 = vld [vmem:[%s12628_s10 + $0x30] ss:$8 sps:$4 sm:$0xff]   ;;  %v10428_v50 = vld [vmem:[%s12628_s10 + $0x44] ss:$8 sps:$4 sm:$0xff]  }
 0x150   : > { %v10424_v47 = vld [vmem:[%s12628_s10 + $0x934] ss:$8 sps:$4 sm:$0xff]   ;;  %v10427_v49 = vld [vmem:[%s12628_s10 + $0x930] ss:$8 sps:$4 sm:$0xff]   ;;  %v10430_v51 = vld [vmem:[%s12628_s10 + $0x944] ss:$8 sps:$4 sm:$0xff]  }
 0x151   : > { %8525 = vmatpush1.bf16.msra.mxu1 %v10414_v40  ;;  %v10432_v52 = vld [vmem:[%s12628_s10 + $0x40] ss:$8 sps:$4 sm:$0xff]   ;;  %v10434_v54 = vld [vmem:[%s12628_s10 + $0x54] ss:$8 sps:$4 sm:$0xff]   ;;  %v10438_v56 = vld [vmem:[%s12628_s10 + $0x50] ss:$8 sps:$4 sm:$0xff]  }
 0x152   : > { %9101 = vmatpush1.bf16.msra.mxu0 %v10415_v41  ;;  %8527 = vmatprep.subr.bf16.mxu1 %v10416_v42  ;;  %v10433_v53 = vld [vmem:[%s12628_s10 + $0x940] ss:$8 sps:$4 sm:$0xff]   ;;  %v10436_v55 = vld [vmem:[%s12628_s10 + $0x954] ss:$8 sps:$4 sm:$0xff]   ;;  %v10439_v57 = vld [vmem:[%s12628_s10 + $0x950] ss:$8 sps:$4 sm:$0xff]  }
 0x153   : > { %9103 = vmatprep.subr.bf16.mxu0 %v10418_v43  ;;  %v10440_v58 = vld [vmem:[%s12628_s10 + $0x64] ss:$8 sps:$4 sm:$0xff]   ;;  %v10444_v60 = vld [vmem:[%s12628_s10 + $0x60] ss:$8 sps:$4 sm:$0xff]   ;;  %v10446_v62 = vld [vmem:[%s12628_s10 + $0x74] ss:$8 sps:$4 sm:$0xff]  }
 0x154   : > { %v10442_v59 = vld [vmem:[%s12628_s10 + $0x964] ss:$8 sps:$4 sm:$0xff]   ;;  %v10445_v61 = vld [vmem:[%s12628_s10 + $0x960] ss:$8 sps:$4 sm:$0xff]   ;;  %v10448_v63 = vld [vmem:[%s12628_s10 + $0x974] ss:$8 sps:$4 sm:$0xff]  }
 0x155   : > { %8529 = vmatpush1.bf16.msra.mxu1 %v10420_v44  ;;  %v10450_v0 = vld [vmem:[%s12628_s10 + $0x70] ss:$8 sps:$4 sm:$0xff]   ;;  %v10452_v2 = vld [vmem:[%s12628_s10 + $0x84] ss:$8 sps:$4 sm:$0xff]   ;;  %v10456_v4 = vld [vmem:[%s12628_s10 + $0x80] ss:$8 sps:$4 sm:$0xff]  }
 0x156   : > { %9105 = vmatpush1.bf16.msra.mxu0 %v10421_v45  ;;  %8531 = vmatprep.subr.bf16.mxu1 %v10422_v46  ;;  %v10451_v1 = vld [vmem:[%s12628_s10 + $0x970] ss:$8 sps:$4 sm:$0xff]   ;;  %v10454_v3 = vld [vmem:[%s12628_s10 + $0x984] ss:$8 sps:$4 sm:$0xff]   ;;  %v10457_v5 = vld [vmem:[%s12628_s10 + $0x980] ss:$8 sps:$4 sm:$0xff]  }
 0x157   : > { %9107 = vmatprep.subr.bf16.mxu0 %v10424_v47  ;;  %v10458_v6 = vld [vmem:[%s12628_s10 + $0x94] ss:$8 sps:$4 sm:$0xff]   ;;  %v10462_v8 = vld [vmem:[%s12628_s10 + $0x90] ss:$8 sps:$4 sm:$0xff]   ;;  %v10464_v10 = vld [vmem:[%s12628_s10 + $0xa4] ss:$8 sps:$4 sm:$0xff]  }
 0x158   : > { %v10460_v7 = vld [vmem:[%s12628_s10 + $0x994] ss:$8 sps:$4 sm:$0xff]   ;;  %v10463_v9 = vld [vmem:[%s12628_s10 + $0x990] ss:$8 sps:$4 sm:$0xff]   ;;  %v10466_v11 = vld [vmem:[%s12628_s10 + $0x9a4] ss:$8 sps:$4 sm:$0xff]  }
 0x159   : > { %8533 = vmatpush1.bf16.msra.mxu1 %v10426_v48  ;;  %v10468_v12 = vld [vmem:[%s12628_s10 + $0xa0] ss:$8 sps:$4 sm:$0xff]   ;;  %v10470_v14 = vld [vmem:[%s12628_s10 + $0xb4] ss:$8 sps:$4 sm:$0xff]   ;;  %v10474_v16 = vld [vmem:[%s12628_s10 + $0xb0] ss:$8 sps:$4 sm:$0xff]  }
 0x15a   : > { %9109 = vmatpush1.bf16.msra.mxu0 %v10427_v49  ;;  %8535 = vmatprep.subr.bf16.mxu1 %v10428_v50  ;;  %v10469_v13 = vld [vmem:[%s12628_s10 + $0x9a0] ss:$8 sps:$4 sm:$0xff]   ;;  %v10472_v15 = vld [vmem:[%s12628_s10 + $0x9b4] ss:$8 sps:$4 sm:$0xff]   ;;  %v10475_v17 = vld [vmem:[%s12628_s10 + $0x9b0] ss:$8 sps:$4 sm:$0xff]  }
 0x15b   : > { %9111 = vmatprep.subr.bf16.mxu0 %v10430_v51  ;;  %v10476_v18 = vld [vmem:[%s12628_s10 + $0xc4] ss:$8 sps:$4 sm:$0xff]   ;;  %v10480_v20 = vld [vmem:[%s12628_s10 + $0xc0] ss:$8 sps:$4 sm:$0xff]   ;;  %v10482_v22 = vld [vmem:[%s12628_s10 + $0xd4] ss:$8 sps:$4 sm:$0xff]  }
 0x15c   : > { %v10478_v19 = vld [vmem:[%s12628_s10 + $0x9c4] ss:$8 sps:$4 sm:$0xff]   ;;  %v10481_v21 = vld [vmem:[%s12628_s10 + $0x9c0] ss:$8 sps:$4 sm:$0xff]   ;;  %v10484_v23 = vld [vmem:[%s12628_s10 + $0x9d4] ss:$8 sps:$4 sm:$0xff]  }
 0x15d   : > { %8537 = vmatpush1.bf16.msra.mxu1 %v10432_v52  ;;  %v10486_v24 = vld [vmem:[%s12628_s10 + $0xd0] ss:$8 sps:$4 sm:$0xff]   ;;  %v10488_v26 = vld [vmem:[%s12628_s10 + $0xe4] ss:$8 sps:$4 sm:$0xff]   ;;  %v10492_v28 = vld [vmem:[%s12628_s10 + $0xe0] ss:$8 sps:$4 sm:$0xff]  }
 0x15e   : > { %9113 = vmatpush1.bf16.msra.mxu0 %v10433_v53  ;;  %8539 = vmatprep.subr.bf16.mxu1 %v10434_v54  ;;  %v10487_v25 = vld [vmem:[%s12628_s10 + $0x9d0] ss:$8 sps:$4 sm:$0xff]   ;;  %v10490_v27 = vld [vmem:[%s12628_s10 + $0x9e4] ss:$8 sps:$4 sm:$0xff]   ;;  %v10493_v29 = vld [vmem:[%s12628_s10 + $0x9e0] ss:$8 sps:$4 sm:$0xff]  }
 0x15f   : > { %9115 = vmatprep.subr.bf16.mxu0 %v10436_v55  ;;  %v10494_v30 = vld [vmem:[%s12628_s10 + $0xf4] ss:$8 sps:$4 sm:$0xff]   ;;  %v10498_v32 = vld [vmem:[%s12628_s10 + $0xf0] ss:$8 sps:$4 sm:$0xff]   ;;  %v10500_v34 = vld [vmem:[%s12628_s10 + $0x104] ss:$8 sps:$4 sm:$0xff]  }
 0x160   : > { %v10496_v31 = vld [vmem:[%s12628_s10 + $0x9f4] ss:$8 sps:$4 sm:$0xff]   ;;  %v10499_v33 = vld [vmem:[%s12628_s10 + $0x9f0] ss:$8 sps:$4 sm:$0xff]   ;;  %v10503_v35 = vld [vmem:[%s12628_s10 + $0xa04] ss:$8 sps:$4 sm:$0xff]  }
 0x161   : > { %8541 = vmatpush1.bf16.msra.mxu1 %v10438_v56  ;;  %v5172_v36 = vld [vmem:[%s13367_s0] sm:$0xff]  ;;  %v5190_v37 = vld [vmem:[%s13367_s0 + $0x90] sm:$0xff]  ;;  %s13376_s28 = smov (!%p5157_p8, %s8511_s28), 13 }
 0x162   : > { %9117 = vmatpush1.bf16.msra.mxu0 %v10439_v57  ;;  %8543 = vmatprep.subr.bf16.mxu1 %v10440_v58  ;;  %v10502_v38 = vld [vmem:[%s12628_s10 + $0x100] ss:$8 sps:$4 sm:$0xff]   ;;  %v10506_v40 = vld [vmem:[%s12628_s10 + $0x114] ss:$8 sps:$4 sm:$0xff]   ;;  %v10508_v42 = vld [vmem:[%s12628_s10 + $0x110] ss:$8 sps:$4 sm:$0xff]   ;;  %s5159_s5 = scalar_lea.vmem %s13369_s2, %s13376_s28  ;;  %s5164_s7 = scalar_lea.vmem %s13370_s3, %s13376_s28 }
 0x163   : > { %9119 = vmatprep.subr.bf16.mxu0 %v10442_v59  ;;  %v10505_v39 = vld [vmem:[%s12628_s10 + $0xa00] ss:$8 sps:$4 sm:$0xff]   ;;  %v10509_v41 = vld [vmem:[%s12628_s10 + $0xa14] ss:$8 sps:$4 sm:$0xff]   ;;  %v10511_v43 = vld [vmem:[%s12628_s10 + $0xa10] ss:$8 sps:$4 sm:$0xff]  }
 0x164   : > { %v10512_v44 = vld [vmem:[%s12628_s10 + $0x124] ss:$8 sps:$4 sm:$0xff]   ;;  %v10514_v46 = vld [vmem:[%s12628_s10 + $0x120] ss:$8 sps:$4 sm:$0xff]   ;;  %v10518_v48 = vld [vmem:[%s12628_s10 + $0x134] ss:$8 sps:$4 sm:$0xff]  }
 0x165   : > { %8545 = vmatpush1.bf16.msra.mxu1 %v10444_v60  ;;  %v10515_v45 = vld [vmem:[%s12628_s10 + $0xa24] ss:$8 sps:$4 sm:$0xff]   ;;  %v10517_v47 = vld [vmem:[%s12628_s10 + $0xa20] ss:$8 sps:$4 sm:$0xff]   ;;  %v10521_v49 = vld [vmem:[%s12628_s10 + $0xa34] ss:$8 sps:$4 sm:$0xff]  }
 0x166   : > { %9121 = vmatpush1.bf16.msra.mxu0 %v10445_v61  ;;  %8547 = vmatprep.subr.bf16.mxu1 %v10446_v62  ;;  %v10520_v50 = vld [vmem:[%s12628_s10 + $0x130] ss:$8 sps:$4 sm:$0xff]   ;;  %v10524_v52 = vld [vmem:[%s12628_s10 + $0x144] ss:$8 sps:$4 sm:$0xff]   ;;  %v10526_v54 = vld [vmem:[%s12628_s10 + $0x140] ss:$8 sps:$4 sm:$0xff]  }
 0x167   : > { %9123 = vmatprep.subr.bf16.mxu0 %v10448_v63  ;;  %v10523_v51 = vld [vmem:[%s12628_s10 + $0xa30] ss:$8 sps:$4 sm:$0xff]   ;;  %v10527_v53 = vld [vmem:[%s12628_s10 + $0xa44] ss:$8 sps:$4 sm:$0xff]   ;;  %v10529_v55 = vld [vmem:[%s12628_s10 + $0xa40] ss:$8 sps:$4 sm:$0xff]  }
 0x168   : > { %v10530_v56 = vld [vmem:[%s12628_s10 + $0x154] ss:$8 sps:$4 sm:$0xff]   ;;  %v10532_v58 = vld [vmem:[%s12628_s10 + $0x150] ss:$8 sps:$4 sm:$0xff]   ;;  %v10536_v60 = vld [vmem:[%s12628_s10 + $0x164] ss:$8 sps:$4 sm:$0xff]  }
 0x169   : > { %8549 = vmatpush1.bf16.msra.mxu1 %v10450_v0  ;;  %v10533_v57 = vld [vmem:[%s12628_s10 + $0xa54] ss:$8 sps:$4 sm:$0xff]   ;;  %v10535_v59 = vld [vmem:[%s12628_s10 + $0xa50] ss:$8 sps:$4 sm:$0xff]   ;;  %v10539_v61 = vld [vmem:[%s12628_s10 + $0xa64] ss:$8 sps:$4 sm:$0xff]  }
 0x16a   : > { %9125 = vmatpush1.bf16.msra.mxu0 %v10451_v1  ;;  %8551 = vmatprep.subr.bf16.mxu1 %v10452_v2  ;;  %v5175_v62 = vld [vmem:[%s13367_s0 + $0x18] sm:$0xff]  ;;  %v5193_v63 = vld [vmem:[%s13367_s0 + $0xa8] sm:$0xff]  ;;  %s8514_s17 = sshll.u32 %s13376_s28, 3 }
 0x16b   : > { %9127 = vmatprep.subr.bf16.mxu0 %v10454_v3  ;;  %v10538_v0 = vld [vmem:[%s12628_s10 + $0x160] ss:$8 sps:$4 sm:$0xff]   ;;  %v10542_v2 = vld [vmem:[%s12628_s10 + $0x174] ss:$8 sps:$4 sm:$0xff]   ;;  %s5170_s9 = scalar_lea.vmem %s13371_s4, %s8514_s17 }
 0x16c   : > { %v10541_v1 = vld [vmem:[%s12628_s10 + $0xa60] ss:$8 sps:$4 sm:$0xff]   ;;  %v10545_v3 = vld [vmem:[%s12628_s10 + $0xa74] ss:$8 sps:$4 sm:$0xff]  }
 0x16d   : > { %8553 = vmatpush1.bf16.msra.mxu1 %v10456_v4  ;;  %v10544_v4 = vld [vmem:[%s12628_s10 + $0x170] ss:$8 sps:$4 sm:$0xff]  }
 0x16e   : > { %9129 = vmatpush1.bf16.msra.mxu0 %v10457_v5  ;;  %8555 = vmatprep.subr.bf16.mxu1 %v10458_v6  ;;  %v10547_v5 = vld [vmem:[%s12628_s10 + $0xa70] ss:$8 sps:$4 sm:$0xff]   ;;  %v10548_v6 = vld [vmem:[%s12628_s10 + $0x184] ss:$8 sps:$4 sm:$0xff]  }
 0x16f   : > { %9131 = vmatprep.subr.bf16.mxu0 %v10460_v7  ;;  %v10551_v7 = vld [vmem:[%s12628_s10 + $0xa84] ss:$8 sps:$4 sm:$0xff]  }
 0x171   : > { %8557 = vmatpush1.bf16.msra.mxu1 %v10462_v8  ;;  %v10550_v8 = vld [vmem:[%s12628_s10 + $0x180] ss:$8 sps:$4 sm:$0xff]  }
 0x172   : > { %9133 = vmatpush1.bf16.msra.mxu0 %v10463_v9  ;;  %8559 = vmatprep.subr.bf16.mxu1 %v10464_v10  ;;  %v10553_v9 = vld [vmem:[%s12628_s10 + $0xa80] ss:$8 sps:$4 sm:$0xff]   ;;  %v10554_v10 = vld [vmem:[%s12628_s10 + $0x194] ss:$8 sps:$4 sm:$0xff]  }
 0x173   : > { %9135 = vmatprep.subr.bf16.mxu0 %v10466_v11  ;;  %v10557_v11 = vld [vmem:[%s12628_s10 + $0xa94] ss:$8 sps:$4 sm:$0xff]  }
 0x175   : > { %8561 = vmatpush1.bf16.msra.mxu1 %v10468_v12  ;;  %v10556_v12 = vld [vmem:[%s12628_s10 + $0x190] ss:$8 sps:$4 sm:$0xff]  }
 0x176   : > { %9137 = vmatpush1.bf16.msra.mxu0 %v10469_v13  ;;  %8563 = vmatprep.subr.bf16.mxu1 %v10470_v14  ;;  %v10559_v13 = vld [vmem:[%s12628_s10 + $0xa90] ss:$8 sps:$4 sm:$0xff]   ;;  %v10560_v14 = vld [vmem:[%s12628_s10 + $0x1a4] ss:$8 sps:$4 sm:$0xff]  }
 0x177   : > { %9139 = vmatprep.subr.bf16.mxu0 %v10472_v15  ;;  %v10563_v15 = vld [vmem:[%s12628_s10 + $0xaa4] ss:$8 sps:$4 sm:$0xff]  }
 0x179   : > { %8565 = vmatpush1.bf16.msra.mxu1 %v10474_v16  ;;  %v10562_v16 = vld [vmem:[%s12628_s10 + $0x1a0] ss:$8 sps:$4 sm:$0xff]  }
 0x17a   : > { %9141 = vmatpush1.bf16.msra.mxu0 %v10475_v17  ;;  %8567 = vmatprep.subr.bf16.mxu1 %v10476_v18  ;;  %v10565_v17 = vld [vmem:[%s12628_s10 + $0xaa0] ss:$8 sps:$4 sm:$0xff]   ;;  %v10566_v18 = vld [vmem:[%s12628_s10 + $0x1b4] ss:$8 sps:$4 sm:$0xff]  }
 0x17b   : > { %9143 = vmatprep.subr.bf16.mxu0 %v10478_v19  ;;  %v10569_v19 = vld [vmem:[%s12628_s10 + $0xab4] ss:$8 sps:$4 sm:$0xff]  }
 0x17d   : > { %8569 = vmatpush1.bf16.msra.mxu1 %v10480_v20  ;;  %v10568_v20 = vld [vmem:[%s12628_s10 + $0x1b0] ss:$8 sps:$4 sm:$0xff]  }
 0x17e   : > { %9145 = vmatpush1.bf16.msra.mxu0 %v10481_v21  ;;  %8571 = vmatprep.subr.bf16.mxu1 %v10482_v22  ;;  %v10571_v21 = vld [vmem:[%s12628_s10 + $0xab0] ss:$8 sps:$4 sm:$0xff]   ;;  %v10572_v22 = vld [vmem:[%s12628_s10 + $0x1c4] ss:$8 sps:$4 sm:$0xff]  }
 0x17f   : > { %9147 = vmatprep.subr.bf16.mxu0 %v10484_v23  ;;  %v10575_v23 = vld [vmem:[%s12628_s10 + $0xac4] ss:$8 sps:$4 sm:$0xff]  }
 0x181   : > { %8573 = vmatpush1.bf16.msra.mxu1 %v10486_v24  ;;  %v10574_v24 = vld [vmem:[%s12628_s10 + $0x1c0] ss:$8 sps:$4 sm:$0xff]  }
 0x182   : > { %9149 = vmatpush1.bf16.msra.mxu0 %v10487_v25  ;;  %8575 = vmatprep.subr.bf16.mxu1 %v10488_v26  ;;  %v10577_v25 = vld [vmem:[%s12628_s10 + $0xac0] ss:$8 sps:$4 sm:$0xff]   ;;  %v10578_v26 = vld [vmem:[%s12628_s10 + $0x1d4] ss:$8 sps:$4 sm:$0xff]  }
 0x183   : > { %9151 = vmatprep.subr.bf16.mxu0 %v10490_v27  ;;  %v10581_v27 = vld [vmem:[%s12628_s10 + $0xad4] ss:$8 sps:$4 sm:$0xff]  }
 0x185   : > { %8577 = vmatpush1.bf16.msra.mxu1 %v10492_v28  ;;  %v10580_v28 = vld [vmem:[%s12628_s10 + $0x1d0] ss:$8 sps:$4 sm:$0xff]  }
 0x186   : > { %9153 = vmatpush1.bf16.msra.mxu0 %v10493_v29  ;;  %8579 = vmatprep.subr.bf16.mxu1 %v10494_v30  ;;  %v10583_v29 = vld [vmem:[%s12628_s10 + $0xad0] ss:$8 sps:$4 sm:$0xff]   ;;  %v10584_v30 = vld [vmem:[%s12628_s10 + $0x1e4] ss:$8 sps:$4 sm:$0xff]  }
 0x187   : > { %9155 = vmatprep.subr.bf16.mxu0 %v10496_v31  ;;  %v10587_v31 = vld [vmem:[%s12628_s10 + $0xae4] ss:$8 sps:$4 sm:$0xff]  }
 0x189   : > { %8581 = vmatpush1.bf16.msra.mxu1 %v10498_v32  ;;  %v10586_v32 = vld [vmem:[%s12628_s10 + $0x1e0] ss:$8 sps:$4 sm:$0xff]  }
 0x18a   : > { %9157 = vmatpush1.bf16.msra.mxu0 %v10499_v33  ;;  %8583 = vmatprep.subr.bf16.mxu1 %v10500_v34  ;;  %v10589_v33 = vld [vmem:[%s12628_s10 + $0xae0] ss:$8 sps:$4 sm:$0xff]   ;;  %v10590_v34 = vld [vmem:[%s12628_s10 + $0x1f4] ss:$8 sps:$4 sm:$0xff]  }
 0x18b   : > { %9159 = vmatprep.subr.bf16.mxu0 %v10503_v35  ;;  %v10593_v35 = vld [vmem:[%s12628_s10 + $0xaf4] ss:$8 sps:$4 sm:$0xff]  }
 0x18c   : > { %7099 = vmatmul.mubr.f32.vlgmr.msra.gmra.mrb[0].mxu1 %v5172_v36  ;;  %v10592_v36 = vld [vmem:[%s12628_s10 + $0x1f0] ss:$8 sps:$4 sm:$0xff]  }
 0x18d   : > { %7738 = vmatmul.mubr.f32.vlgmr.msra.gmra.mrb[0].mxu0 %v5190_v37  ;;  %8585 = vmatpush1.bf16.msra.mxu1 %v10502_v38  ;;  %v10595_v37 = vld [vmem:[%s12628_s10 + $0xaf0] ss:$8 sps:$4 sm:$0xff]   ;;  %v10596_v38 = vld [vmem:[%s12628_s10 + $0x204] ss:$8 sps:$4 sm:$0xff]  }
 0x18e   : > { %9161 = vmatpush1.bf16.msra.mxu0 %v10505_v39  ;;  %8587 = vmatprep.subr.bf16.mxu1 %v10506_v40  ;;  %v10599_v39 = vld [vmem:[%s12628_s10 + $0xb04] ss:$8 sps:$4 sm:$0xff]   ;;  %v10598_v40 = vld [vmem:[%s12628_s10 + $0x200] ss:$8 sps:$4 sm:$0xff]  }
 0x18f   : > { %9163 = vmatprep.subr.bf16.mxu0 %v10509_v41  ;;  %7169 = vmatprep.mubr.f32.mxu1 %v5175_v62  ;;  %v10601_v41 = vld [vmem:[%s12628_s10 + $0xb00] ss:$8 sps:$4 sm:$0xff]   ;;  %v10626_v62 = vld [vmem:[%s12628_s10 + $0x254] ss:$8 sps:$4 sm:$0xff]  }
 0x190   : > { %7808 = vmatprep.mubr.f32.mxu0 %v5193_v63  ;;  %v10629_v63 = vld [vmem:[%s12628_s10 + $0xb54] ss:$8 sps:$4 sm:$0xff]  }
 0x191   : > { %8589 = vmatpush1.bf16.msra.mxu1 %v10508_v42  ;;  %v5174_v42 = vld [vmem:[%s13367_s0 + $0x10] sm:$0xff] }
 0x192   : > { %9165 = vmatpush1.bf16.msra.mxu0 %v10511_v43  ;;  %8591 = vmatprep.subr.bf16.mxu1 %v10512_v44  ;;  %v5192_v43 = vld [vmem:[%s13367_s0 + $0xa0] sm:$0xff]  ;;  %v10602_v44 = vld [vmem:[%s12628_s10 + $0x214] ss:$8 sps:$4 sm:$0xff]  }
 0x193   : > { %9167 = vmatprep.subr.bf16.mxu0 %v10515_v45  ;;  %v10605_v45 = vld [vmem:[%s12628_s10 + $0xb14] ss:$8 sps:$4 sm:$0xff]  }
 0x195   : > { %8593 = vmatpush1.bf16.msra.mxu1 %v10514_v46  ;;  %v5177_v46 = vld [vmem:[%s13367_s0 + $0x28] sm:$0xff] }
 0x196   : > { %9169 = vmatpush1.bf16.msra.mxu0 %v10517_v47  ;;  %8595 = vmatprep.subr.bf16.mxu1 %v10518_v48  ;;  %v5195_v47 = vld [vmem:[%s13367_s0 + $0xb8] sm:$0xff] }
 0x197   : > { %9171 = vmatprep.subr.bf16.mxu0 %v10521_v49  ;;  %v10604_v48 = vld [vmem:[%s12628_s10 + $0x210] ss:$8 sps:$4 sm:$0xff]  }
 0x198   : > { %v10607_v49 = vld [vmem:[%s12628_s10 + $0xb10] ss:$8 sps:$4 sm:$0xff]  }
 0x199   : > { %8597 = vmatpush1.bf16.msra.mxu1 %v10520_v50  ;;  %v10608_v50 = vld [vmem:[%s12628_s10 + $0x224] ss:$8 sps:$4 sm:$0xff]  }
 0x19a   : > { %9173 = vmatpush1.bf16.msra.mxu0 %v10523_v51  ;;  %8599 = vmatprep.subr.bf16.mxu1 %v10524_v52  ;;  %v10611_v51 = vld [vmem:[%s12628_s10 + $0xb24] ss:$8 sps:$4 sm:$0xff]   ;;  %v10610_v52 = vld [vmem:[%s12628_s10 + $0x220] ss:$8 sps:$4 sm:$0xff]  }
 0x19b   : > { %9175 = vmatprep.subr.bf16.mxu0 %v10527_v53  ;;  %v10613_v53 = vld [vmem:[%s12628_s10 + $0xb20] ss:$8 sps:$4 sm:$0xff]  }
 0x19d   : > { %8601 = vmatpush1.bf16.msra.mxu1 %v10526_v54  ;;  %v10614_v54 = vld [vmem:[%s12628_s10 + $0x234] ss:$8 sps:$4 sm:$0xff]  }
 0x19e   : > { %9177 = vmatpush1.bf16.msra.mxu0 %v10529_v55  ;;  %8603 = vmatprep.subr.bf16.mxu1 %v10530_v56  ;;  %v10617_v55 = vld [vmem:[%s12628_s10 + $0xb34] ss:$8 sps:$4 sm:$0xff]   ;;  %v10616_v56 = vld [vmem:[%s12628_s10 + $0x230] ss:$8 sps:$4 sm:$0xff]  }
 0x19f   : > { %9179 = vmatprep.subr.bf16.mxu0 %v10533_v57  ;;  %v10619_v57 = vld [vmem:[%s12628_s10 + $0xb30] ss:$8 sps:$4 sm:$0xff]  }
 0x1a1   : > { %8605 = vmatpush1.bf16.msra.mxu1 %v10532_v58  ;;  %v10620_v58 = vld [vmem:[%s12628_s10 + $0x244] ss:$8 sps:$4 sm:$0xff]  }
 0x1a2   : > { %9181 = vmatpush1.bf16.msra.mxu0 %v10535_v59  ;;  %8607 = vmatprep.subr.bf16.mxu1 %v10536_v60  ;;  %v10623_v59 = vld [vmem:[%s12628_s10 + $0xb44] ss:$8 sps:$4 sm:$0xff]   ;;  %v10622_v60 = vld [vmem:[%s12628_s10 + $0x240] ss:$8 sps:$4 sm:$0xff]  }
 0x1a3   : > { %9183 = vmatprep.subr.bf16.mxu0 %v10539_v61  ;;  %v10625_v61 = vld [vmem:[%s12628_s10 + $0xb40] ss:$8 sps:$4 sm:$0xff]  }
 0x1a5   : > { %8609 = vmatpush1.bf16.msra.mxu1 %v10538_v0  ;;  %v10628_v0 = vld [vmem:[%s12628_s10 + $0x250] ss:$8 sps:$4 sm:$0xff]  }
 0x1a6   : > { %9185 = vmatpush1.bf16.msra.mxu0 %v10541_v1  ;;  %8611 = vmatprep.subr.bf16.mxu1 %v10542_v2  ;;  %v10631_v1 = vld [vmem:[%s12628_s10 + $0xb50] ss:$8 sps:$4 sm:$0xff]   ;;  %v10632_v2 = vld [vmem:[%s12628_s10 + $0x264] ss:$8 sps:$4 sm:$0xff]  }
 0x1a7   : > { %9187 = vmatprep.subr.bf16.mxu0 %v10545_v3  ;;  %v10635_v3 = vld [vmem:[%s12628_s10 + $0xb64] ss:$8 sps:$4 sm:$0xff]  }
 0x1a9   : > { %8613 = vmatpush1.bf16.msra.mxu1 %v10544_v4  ;;  %v10634_v4 = vld [vmem:[%s12628_s10 + $0x260] ss:$8 sps:$4 sm:$0xff]  }
 0x1aa   : > { %9189 = vmatpush1.bf16.msra.mxu0 %v10547_v5  ;;  %8615 = vmatprep.subr.bf16.mxu1 %v10548_v6  ;;  %v10637_v5 = vld [vmem:[%s12628_s10 + $0xb60] ss:$8 sps:$4 sm:$0xff]   ;;  %v10638_v6 = vld [vmem:[%s12628_s10 + $0x274] ss:$8 sps:$4 sm:$0xff]  }
 0x1ab   : > { %9191 = vmatprep.subr.bf16.mxu0 %v10551_v7  ;;  %v10641_v7 = vld [vmem:[%s12628_s10 + $0xb74] ss:$8 sps:$4 sm:$0xff]  }
 0x1ad   : > { %8617 = vmatpush1.bf16.msra.mxu1 %v10550_v8  ;;  %v10640_v8 = vld [vmem:[%s12628_s10 + $0x270] ss:$8 sps:$4 sm:$0xff]  }
 0x1ae   : > { %9193 = vmatpush1.bf16.msra.mxu0 %v10553_v9  ;;  %8619 = vmatprep.subr.bf16.mxu1 %v10554_v10  ;;  %v10643_v9 = vld [vmem:[%s12628_s10 + $0xb70] ss:$8 sps:$4 sm:$0xff]   ;;  %v10644_v10 = vld [vmem:[%s12628_s10 + $0x284] ss:$8 sps:$4 sm:$0xff]  }
 0x1af   : > { %9195 = vmatprep.subr.bf16.mxu0 %v10557_v11  ;;  %v10647_v11 = vld [vmem:[%s12628_s10 + $0xb84] ss:$8 sps:$4 sm:$0xff]  }
 0x1b1   : > { %8621 = vmatpush1.bf16.msra.mxu1 %v10556_v12  ;;  %v10646_v12 = vld [vmem:[%s12628_s10 + $0x280] ss:$8 sps:$4 sm:$0xff]  }
 0x1b2   : > { %9197 = vmatpush1.bf16.msra.mxu0 %v10559_v13  ;;  %8623 = vmatprep.subr.bf16.mxu1 %v10560_v14  ;;  %v10649_v13 = vld [vmem:[%s12628_s10 + $0xb80] ss:$8 sps:$4 sm:$0xff]   ;;  %v10650_v14 = vld [vmem:[%s12628_s10 + $0x294] ss:$8 sps:$4 sm:$0xff]  }
 0x1b3   : > { %9199 = vmatprep.subr.bf16.mxu0 %v10563_v15  ;;  %v10653_v15 = vld [vmem:[%s12628_s10 + $0xb94] ss:$8 sps:$4 sm:$0xff]  }
 0x1b5   : > { %8625 = vmatpush1.bf16.msra.mxu1 %v10562_v16  ;;  %v10652_v16 = vld [vmem:[%s12628_s10 + $0x290] ss:$8 sps:$4 sm:$0xff]  }
 0x1b6   : > { %9201 = vmatpush1.bf16.msra.mxu0 %v10565_v17  ;;  %8627 = vmatprep.subr.bf16.mxu1 %v10566_v18  ;;  %v10655_v17 = vld [vmem:[%s12628_s10 + $0xb90] ss:$8 sps:$4 sm:$0xff]   ;;  %v10656_v18 = vld [vmem:[%s12628_s10 + $0x2a4] ss:$8 sps:$4 sm:$0xff]  }
 0x1b7   : > { %9203 = vmatprep.subr.bf16.mxu0 %v10569_v19  ;;  %v10659_v19 = vld [vmem:[%s12628_s10 + $0xba4] ss:$8 sps:$4 sm:$0xff]  }
 0x1b9   : > { %8629 = vmatpush1.bf16.msra.mxu1 %v10568_v20  ;;  %v10658_v20 = vld [vmem:[%s12628_s10 + $0x2a0] ss:$8 sps:$4 sm:$0xff]  }
 0x1ba   : > { %9205 = vmatpush1.bf16.msra.mxu0 %v10571_v21  ;;  %8631 = vmatprep.subr.bf16.mxu1 %v10572_v22  ;;  %v10661_v21 = vld [vmem:[%s12628_s10 + $0xba0] ss:$8 sps:$4 sm:$0xff]   ;;  %v10662_v22 = vld [vmem:[%s12628_s10 + $0x2b4] ss:$8 sps:$4 sm:$0xff]  }
 0x1bb   : > { %9207 = vmatprep.subr.bf16.mxu0 %v10575_v23  ;;  %v10665_v23 = vld [vmem:[%s12628_s10 + $0xbb4] ss:$8 sps:$4 sm:$0xff]  }
 0x1bd   : > { %8633 = vmatpush1.bf16.msra.mxu1 %v10574_v24  ;;  %v10664_v24 = vld [vmem:[%s12628_s10 + $0x2b0] ss:$8 sps:$4 sm:$0xff]  }
 0x1be   : > { %9209 = vmatpush1.bf16.msra.mxu0 %v10577_v25  ;;  %8635 = vmatprep.subr.bf16.mxu1 %v10578_v26  ;;  %v10667_v25 = vld [vmem:[%s12628_s10 + $0xbb0] ss:$8 sps:$4 sm:$0xff]   ;;  %v10668_v26 = vld [vmem:[%s12628_s10 + $0x2c4] ss:$8 sps:$4 sm:$0xff]  }
 0x1bf   : > { %9211 = vmatprep.subr.bf16.mxu0 %v10581_v27  ;;  %v10671_v27 = vld [vmem:[%s12628_s10 + $0xbc4] ss:$8 sps:$4 sm:$0xff]  }
 0x1c1   : > { %8637 = vmatpush1.bf16.msra.mxu1 %v10580_v28  ;;  %v10670_v28 = vld [vmem:[%s12628_s10 + $0x2c0] ss:$8 sps:$4 sm:$0xff]  }
 0x1c2   : > { %9213 = vmatpush1.bf16.msra.mxu0 %v10583_v29  ;;  %8639 = vmatprep.subr.bf16.mxu1 %v10584_v30  ;;  %v10673_v29 = vld [vmem:[%s12628_s10 + $0xbc0] ss:$8 sps:$4 sm:$0xff]   ;;  %v10674_v30 = vld [vmem:[%s12628_s10 + $0x2d4] ss:$8 sps:$4 sm:$0xff]  }
 0x1c3   : > { %9215 = vmatprep.subr.bf16.mxu0 %v10587_v31  ;;  %v10677_v31 = vld [vmem:[%s12628_s10 + $0xbd4] ss:$8 sps:$4 sm:$0xff]  }
 0x1c5   : > { %8641 = vmatpush1.bf16.msra.mxu1 %v10586_v32  ;;  %v10676_v32 = vld [vmem:[%s12628_s10 + $0x2d0] ss:$8 sps:$4 sm:$0xff]  }
 0x1c6   : > { %9217 = vmatpush1.bf16.msra.mxu0 %v10589_v33  ;;  %8643 = vmatprep.subr.bf16.mxu1 %v10590_v34  ;;  %v10679_v33 = vld [vmem:[%s12628_s10 + $0xbd0] ss:$8 sps:$4 sm:$0xff]   ;;  %v10680_v34 = vld [vmem:[%s12628_s10 + $0x2e4] ss:$8 sps:$4 sm:$0xff]  }
 0x1c7   : > { %9219 = vmatprep.subr.bf16.mxu0 %v10593_v35  ;;  %v10683_v35 = vld [vmem:[%s12628_s10 + $0xbe4] ss:$8 sps:$4 sm:$0xff]  }
 0x1c9   : > { %8645 = vmatpush1.bf16.msra.mxu1 %v10592_v36  ;;  %v10682_v36 = vld [vmem:[%s12628_s10 + $0x2e0] ss:$8 sps:$4 sm:$0xff]  }
 0x1ca   : > { %9221 = vmatpush1.bf16.msra.mxu0 %v10595_v37  ;;  %8647 = vmatprep.subr.bf16.mxu1 %v10596_v38  ;;  %v10685_v37 = vld [vmem:[%s12628_s10 + $0xbe0] ss:$8 sps:$4 sm:$0xff]   ;;  %v10686_v38 = vld [vmem:[%s12628_s10 + $0x2f4] ss:$8 sps:$4 sm:$0xff]  }
 0x1cb   : > { %9223 = vmatprep.subr.bf16.mxu0 %v10599_v39  ;;  %v10689_v39 = vld [vmem:[%s12628_s10 + $0xbf4] ss:$8 sps:$4 sm:$0xff]  }
 0x1cc   : > { %7170 = vmatmul.mubr.f32.vlgmr.msra.gmra.mrb[0].mxu1 %v5174_v42  ;;  %v10692_v42 = vld [vmem:[%s12628_s10 + $0x304] ss:$8 sps:$4 sm:$0xff]  }
 0x1cd   : > { %7809 = vmatmul.mubr.f32.vlgmr.msra.gmra.mrb[0].mxu0 %v5192_v43  ;;  %8649 = vmatpush1.bf16.msra.mxu1 %v10598_v40  ;;  %v10688_v40 = vld [vmem:[%s12628_s10 + $0x2f0] ss:$8 sps:$4 sm:$0xff]   ;;  %v10695_v43 = vld [vmem:[%s12628_s10 + $0xc04] ss:$8 sps:$4 sm:$0xff]  }
 0x1ce   : > { %9225 = vmatpush1.bf16.msra.mxu0 %v10601_v41  ;;  %8651 = vmatprep.subr.bf16.mxu1 %v10602_v44  ;;  %v10691_v41 = vld [vmem:[%s12628_s10 + $0xbf0] ss:$8 sps:$4 sm:$0xff]   ;;  %v10694_v44 = vld [vmem:[%s12628_s10 + $0x300] ss:$8 sps:$4 sm:$0xff]  }
 0x1cf   : > { %9227 = vmatprep.subr.bf16.mxu0 %v10605_v45  ;;  %7240 = vmatprep.mubr.f32.mxu1 %v5177_v46  ;;  %v10697_v45 = vld [vmem:[%s12628_s10 + $0xc00] ss:$8 sps:$4 sm:$0xff]  }
 0x1d0   : > { %7879 = vmatprep.mubr.f32.mxu0 %v5195_v47  ;;  %v5176_v46 = vld [vmem:[%s13367_s0 + $0x20] sm:$0xff]  ;;  %v5194_v47 = vld [vmem:[%s13367_s0 + $0xb0] sm:$0xff] }
 0x1d1   : > { %8653 = vmatpush1.bf16.msra.mxu1 %v10604_v48  ;;  %v10698_v48 = vld [vmem:[%s12628_s10 + $0x314] ss:$8 sps:$4 sm:$0xff]  }
 0x1d2   : > { %9229 = vmatpush1.bf16.msra.mxu0 %v10607_v49  ;;  %8655 = vmatprep.subr.bf16.mxu1 %v10608_v50  ;;  %v10701_v49 = vld [vmem:[%s12628_s10 + $0xc14] ss:$8 sps:$4 sm:$0xff]   ;;  %v10700_v50 = vld [vmem:[%s12628_s10 + $0x310] ss:$8 sps:$4 sm:$0xff]  }
 0x1d3   : > { %9231 = vmatprep.subr.bf16.mxu0 %v10611_v51  ;;  %v10703_v51 = vld [vmem:[%s12628_s10 + $0xc10] ss:$8 sps:$4 sm:$0xff]  }
 0x1d5   : > { %8657 = vmatpush1.bf16.msra.mxu1 %v10610_v52  ;;  %v5179_v52 = vld [vmem:[%s13367_s0 + $0x38] sm:$0xff] }
 0x1d6   : > { %9233 = vmatpush1.bf16.msra.mxu0 %v10613_v53  ;;  %8659 = vmatprep.subr.bf16.mxu1 %v10614_v54  ;;  %v5197_v53 = vld [vmem:[%s13367_s0 + $0xc8] sm:$0xff] }
 0x1d7   : > { %9235 = vmatprep.subr.bf16.mxu0 %v10617_v55  ;;  %v10704_v54 = vld [vmem:[%s12628_s10 + $0x324] ss:$8 sps:$4 sm:$0xff]  }
 0x1d8   : > { %v10707_v55 = vld [vmem:[%s12628_s10 + $0xc24] ss:$8 sps:$4 sm:$0xff]  }
 0x1d9   : > { %8661 = vmatpush1.bf16.msra.mxu1 %v10616_v56  ;;  %v10706_v56 = vld [vmem:[%s12628_s10 + $0x320] ss:$8 sps:$4 sm:$0xff]  }
 0x1da   : > { %9237 = vmatpush1.bf16.msra.mxu0 %v10619_v57  ;;  %8663 = vmatprep.subr.bf16.mxu1 %v10620_v58  ;;  %v10709_v57 = vld [vmem:[%s12628_s10 + $0xc20] ss:$8 sps:$4 sm:$0xff]   ;;  %v10710_v58 = vld [vmem:[%s12628_s10 + $0x334] ss:$8 sps:$4 sm:$0xff]  }
 0x1db   : > { %9239 = vmatprep.subr.bf16.mxu0 %v10623_v59  ;;  %v10713_v59 = vld [vmem:[%s12628_s10 + $0xc34] ss:$8 sps:$4 sm:$0xff]  }
 0x1dd   : > { %8665 = vmatpush1.bf16.msra.mxu1 %v10622_v60  ;;  %v10712_v60 = vld [vmem:[%s12628_s10 + $0x330] ss:$8 sps:$4 sm:$0xff]  }
 0x1de   : > { %9241 = vmatpush1.bf16.msra.mxu0 %v10625_v61  ;;  %8667 = vmatprep.subr.bf16.mxu1 %v10626_v62  ;;  %v10715_v61 = vld [vmem:[%s12628_s10 + $0xc30] ss:$8 sps:$4 sm:$0xff]   ;;  %v10716_v62 = vld [vmem:[%s12628_s10 + $0x344] ss:$8 sps:$4 sm:$0xff]  }
 0x1df   : > { %9243 = vmatprep.subr.bf16.mxu0 %v10629_v63  ;;  %v10719_v63 = vld [vmem:[%s12628_s10 + $0xc44] ss:$8 sps:$4 sm:$0xff]  }
 0x1e1   : > { %8669 = vmatpush1.bf16.msra.mxu1 %v10628_v0  ;;  %v10718_v0 = vld [vmem:[%s12628_s10 + $0x340] ss:$8 sps:$4 sm:$0xff]  }
 0x1e2   : > { %9245 = vmatpush1.bf16.msra.mxu0 %v10631_v1  ;;  %8671 = vmatprep.subr.bf16.mxu1 %v10632_v2  ;;  %v10721_v1 = vld [vmem:[%s12628_s10 + $0xc40] ss:$8 sps:$4 sm:$0xff]   ;;  %v10722_v2 = vld [vmem:[%s12628_s10 + $0x354] ss:$8 sps:$4 sm:$0xff]  }
 0x1e3   : > { %9247 = vmatprep.subr.bf16.mxu0 %v10635_v3  ;;  %v10725_v3 = vld [vmem:[%s12628_s10 + $0xc54] ss:$8 sps:$4 sm:$0xff]  }
 0x1e5   : > { %8673 = vmatpush1.bf16.msra.mxu1 %v10634_v4  ;;  %v10724_v4 = vld [vmem:[%s12628_s10 + $0x350] ss:$8 sps:$4 sm:$0xff]  }
 0x1e6   : > { %9249 = vmatpush1.bf16.msra.mxu0 %v10637_v5  ;;  %8675 = vmatprep.subr.bf16.mxu1 %v10638_v6  ;;  %v10727_v5 = vld [vmem:[%s12628_s10 + $0xc50] ss:$8 sps:$4 sm:$0xff]   ;;  %v10728_v6 = vld [vmem:[%s12628_s10 + $0x364] ss:$8 sps:$4 sm:$0xff]  }
 0x1e7   : > { %9251 = vmatprep.subr.bf16.mxu0 %v10641_v7  ;;  %v10731_v7 = vld [vmem:[%s12628_s10 + $0xc64] ss:$8 sps:$4 sm:$0xff]  }
 0x1e9   : > { %8677 = vmatpush1.bf16.msra.mxu1 %v10640_v8  ;;  %v10730_v8 = vld [vmem:[%s12628_s10 + $0x360] ss:$8 sps:$4 sm:$0xff]  }
 0x1ea   : > { %9253 = vmatpush1.bf16.msra.mxu0 %v10643_v9  ;;  %8679 = vmatprep.subr.bf16.mxu1 %v10644_v10  ;;  %v10733_v9 = vld [vmem:[%s12628_s10 + $0xc60] ss:$8 sps:$4 sm:$0xff]   ;;  %v10734_v10 = vld [vmem:[%s12628_s10 + $0x374] ss:$8 sps:$4 sm:$0xff]  }
 0x1eb   : > { %9255 = vmatprep.subr.bf16.mxu0 %v10647_v11  ;;  %v10737_v11 = vld [vmem:[%s12628_s10 + $0xc74] ss:$8 sps:$4 sm:$0xff]  }
 0x1ed   : > { %8681 = vmatpush1.bf16.msra.mxu1 %v10646_v12  ;;  %v10736_v12 = vld [vmem:[%s12628_s10 + $0x370] ss:$8 sps:$4 sm:$0xff]  }
 0x1ee   : > { %9257 = vmatpush1.bf16.msra.mxu0 %v10649_v13  ;;  %8683 = vmatprep.subr.bf16.mxu1 %v10650_v14  ;;  %v10739_v13 = vld [vmem:[%s12628_s10 + $0xc70] ss:$8 sps:$4 sm:$0xff]   ;;  %v10740_v14 = vld [vmem:[%s12628_s10 + $0x384] ss:$8 sps:$4 sm:$0xff]  }
 0x1ef   : > { %9259 = vmatprep.subr.bf16.mxu0 %v10653_v15  ;;  %v10743_v15 = vld [vmem:[%s12628_s10 + $0xc84] ss:$8 sps:$4 sm:$0xff]  }
 0x1f1   : > { %8685 = vmatpush1.bf16.msra.mxu1 %v10652_v16  ;;  %v10742_v16 = vld [vmem:[%s12628_s10 + $0x380] ss:$8 sps:$4 sm:$0xff]  }
 0x1f2   : > { %9261 = vmatpush1.bf16.msra.mxu0 %v10655_v17  ;;  %8687 = vmatprep.subr.bf16.mxu1 %v10656_v18  ;;  %v10745_v17 = vld [vmem:[%s12628_s10 + $0xc80] ss:$8 sps:$4 sm:$0xff]   ;;  %v10746_v18 = vld [vmem:[%s12628_s10 + $0x394] ss:$8 sps:$4 sm:$0xff]  }
 0x1f3   : > { %9263 = vmatprep.subr.bf16.mxu0 %v10659_v19  ;;  %v10749_v19 = vld [vmem:[%s12628_s10 + $0xc94] ss:$8 sps:$4 sm:$0xff]  }
 0x1f5   : > { %8689 = vmatpush1.bf16.msra.mxu1 %v10658_v20  ;;  %v10748_v20 = vld [vmem:[%s12628_s10 + $0x390] ss:$8 sps:$4 sm:$0xff]  }
 0x1f6   : > { %9265 = vmatpush1.bf16.msra.mxu0 %v10661_v21  ;;  %8691 = vmatprep.subr.bf16.mxu1 %v10662_v22  ;;  %v10751_v21 = vld [vmem:[%s12628_s10 + $0xc90] ss:$8 sps:$4 sm:$0xff]   ;;  %v10752_v22 = vld [vmem:[%s12628_s10 + $0x3a4] ss:$8 sps:$4 sm:$0xff]  }
 0x1f7   : > { %9267 = vmatprep.subr.bf16.mxu0 %v10665_v23  ;;  %v10755_v23 = vld [vmem:[%s12628_s10 + $0xca4] ss:$8 sps:$4 sm:$0xff]  }
 0x1f9   : > { %8693 = vmatpush1.bf16.msra.mxu1 %v10664_v24  ;;  %v10754_v24 = vld [vmem:[%s12628_s10 + $0x3a0] ss:$8 sps:$4 sm:$0xff]  }
 0x1fa   : > { %9269 = vmatpush1.bf16.msra.mxu0 %v10667_v25  ;;  %8695 = vmatprep.subr.bf16.mxu1 %v10668_v26  ;;  %v10757_v25 = vld [vmem:[%s12628_s10 + $0xca0] ss:$8 sps:$4 sm:$0xff]   ;;  %v10758_v26 = vld [vmem:[%s12628_s10 + $0x3b4] ss:$8 sps:$4 sm:$0xff]  }
 0x1fb   : > { %9271 = vmatprep.subr.bf16.mxu0 %v10671_v27  ;;  %v10761_v27 = vld [vmem:[%s12628_s10 + $0xcb4] ss:$8 sps:$4 sm:$0xff]  }
 0x1fd   : > { %8697 = vmatpush1.bf16.msra.mxu1 %v10670_v28  ;;  %v10760_v28 = vld [vmem:[%s12628_s10 + $0x3b0] ss:$8 sps:$4 sm:$0xff]  }
 0x1fe   : > { %9273 = vmatpush1.bf16.msra.mxu0 %v10673_v29  ;;  %8699 = vmatprep.subr.bf16.mxu1 %v10674_v30  ;;  %v10763_v29 = vld [vmem:[%s12628_s10 + $0xcb0] ss:$8 sps:$4 sm:$0xff]   ;;  %v10764_v30 = vld [vmem:[%s12628_s10 + $0x3c4] ss:$8 sps:$4 sm:$0xff]  }
 0x1ff   : > { %9275 = vmatprep.subr.bf16.mxu0 %v10677_v31  ;;  %v10767_v31 = vld [vmem:[%s12628_s10 + $0xcc4] ss:$8 sps:$4 sm:$0xff]  }
 0x201   : > { %8701 = vmatpush1.bf16.msra.mxu1 %v10676_v32  ;;  %v10766_v32 = vld [vmem:[%s12628_s10 + $0x3c0] ss:$8 sps:$4 sm:$0xff]  }
 0x202   : > { %9277 = vmatpush1.bf16.msra.mxu0 %v10679_v33  ;;  %8703 = vmatprep.subr.bf16.mxu1 %v10680_v34  ;;  %v10769_v33 = vld [vmem:[%s12628_s10 + $0xcc0] ss:$8 sps:$4 sm:$0xff]   ;;  %v10770_v34 = vld [vmem:[%s12628_s10 + $0x3d4] ss:$8 sps:$4 sm:$0xff]  }
 0x203   : > { %9279 = vmatprep.subr.bf16.mxu0 %v10683_v35  ;;  %v10773_v35 = vld [vmem:[%s12628_s10 + $0xcd4] ss:$8 sps:$4 sm:$0xff]  }
 0x205   : > { %8705 = vmatpush1.bf16.msra.mxu1 %v10682_v36  ;;  %v10772_v36 = vld [vmem:[%s12628_s10 + $0x3d0] ss:$8 sps:$4 sm:$0xff]  }
 0x206   : > { %9281 = vmatpush1.bf16.msra.mxu0 %v10685_v37  ;;  %8707 = vmatprep.subr.bf16.mxu1 %v10686_v38  ;;  %v10775_v37 = vld [vmem:[%s12628_s10 + $0xcd0] ss:$8 sps:$4 sm:$0xff]   ;;  %v10776_v38 = vld [vmem:[%s12628_s10 + $0x3e4] ss:$8 sps:$4 sm:$0xff]  }
 0x207   : > { %9283 = vmatprep.subr.bf16.mxu0 %v10689_v39  ;;  %v10779_v39 = vld [vmem:[%s12628_s10 + $0xce4] ss:$8 sps:$4 sm:$0xff]  }
 0x209   : > { %8709 = vmatpush1.bf16.msra.mxu1 %v10688_v40  ;;  %v10778_v40 = vld [vmem:[%s12628_s10 + $0x3e0] ss:$8 sps:$4 sm:$0xff]  }
 0x20a   : > { %9285 = vmatpush1.bf16.msra.mxu0 %v10691_v41  ;;  %8711 = vmatprep.subr.bf16.mxu1 %v10692_v42  ;;  %v10781_v41 = vld [vmem:[%s12628_s10 + $0xce0] ss:$8 sps:$4 sm:$0xff]   ;;  %v10782_v42 = vld [vmem:[%s12628_s10 + $0x3f4] ss:$8 sps:$4 sm:$0xff]  }
 0x20b   : > { %9287 = vmatprep.subr.bf16.mxu0 %v10695_v43  ;;  %v10785_v43 = vld [vmem:[%s12628_s10 + $0xcf4] ss:$8 sps:$4 sm:$0xff]  }
 0x20c   : > { %7241 = vmatmul.mubr.f32.vlgmr.msra.gmra.mrb[0].mxu1 %v5176_v46  ;;  %v10788_v46 = vld [vmem:[%s12628_s10 + $0x404] ss:$8 sps:$4 sm:$0xff]  }
 0x20d   : > { %7880 = vmatmul.mubr.f32.vlgmr.msra.gmra.mrb[0].mxu0 %v5194_v47  ;;  %8713 = vmatpush1.bf16.msra.mxu1 %v10694_v44  ;;  %v10784_v44 = vld [vmem:[%s12628_s10 + $0x3f0] ss:$8 sps:$4 sm:$0xff]   ;;  %v10791_v47 = vld [vmem:[%s12628_s10 + $0xd04] ss:$8 sps:$4 sm:$0xff]  }
 0x20e   : > { %9289 = vmatpush1.bf16.msra.mxu0 %v10697_v45  ;;  %8715 = vmatprep.subr.bf16.mxu1 %v10698_v48  ;;  %v10787_v45 = vld [vmem:[%s12628_s10 + $0xcf0] ss:$8 sps:$4 sm:$0xff]   ;;  %v10790_v48 = vld [vmem:[%s12628_s10 + $0x400] ss:$8 sps:$4 sm:$0xff]  }
 0x20f   : > { %9291 = vmatprep.subr.bf16.mxu0 %v10701_v49  ;;  %7311 = vmatprep.mubr.f32.mxu1 %v5179_v52  ;;  %v10793_v49 = vld [vmem:[%s12628_s10 + $0xd00] ss:$8 sps:$4 sm:$0xff]   ;;  %v10794_v52 = vld [vmem:[%s12628_s10 + $0x414] ss:$8 sps:$4 sm:$0xff]  }
 0x210   : > { %7950 = vmatprep.mubr.f32.mxu0 %v5197_v53  ;;  %v10797_v53 = vld [vmem:[%s12628_s10 + $0xd14] ss:$8 sps:$4 sm:$0xff]  }
 0x211   : > { %8717 = vmatpush1.bf16.msra.mxu1 %v10700_v50  ;;  %v5178_v50 = vld [vmem:[%s13367_s0 + $0x30] sm:$0xff] }
 0x212   : > { %9293 = vmatpush1.bf16.msra.mxu0 %v10703_v51  ;;  %8719 = vmatprep.subr.bf16.mxu1 %v10704_v54  ;;  %v5196_v51 = vld [vmem:[%s13367_s0 + $0xc0] sm:$0xff]  ;;  %v10796_v54 = vld [vmem:[%s12628_s10 + $0x410] ss:$8 sps:$4 sm:$0xff]  }
 0x213   : > { %9295 = vmatprep.subr.bf16.mxu0 %v10707_v55  ;;  %v5181_v55 = vld [vmem:[%s13367_s0 + $0x48] sm:$0xff] }
 0x215   : > { %8721 = vmatpush1.bf16.msra.mxu1 %v10706_v56  ;;  %v5199_v56 = vld [vmem:[%s13367_s0 + $0xd8] sm:$0xff] }
 0x216   : > { %9297 = vmatpush1.bf16.msra.mxu0 %v10709_v57  ;;  %8723 = vmatprep.subr.bf16.mxu1 %v10710_v58  ;;  %v10799_v57 = vld [vmem:[%s12628_s10 + $0xd10] ss:$8 sps:$4 sm:$0xff]   ;;  %v10800_v58 = vld [vmem:[%s12628_s10 + $0x424] ss:$8 sps:$4 sm:$0xff]  }
 0x217   : > { %9299 = vmatprep.subr.bf16.mxu0 %v10713_v59  ;;  %v10803_v59 = vld [vmem:[%s12628_s10 + $0xd24] ss:$8 sps:$4 sm:$0xff]  }
 0x219   : > { %8725 = vmatpush1.bf16.msra.mxu1 %v10712_v60  ;;  %v10802_v60 = vld [vmem:[%s12628_s10 + $0x420] ss:$8 sps:$4 sm:$0xff]  }
 0x21a   : > { %9301 = vmatpush1.bf16.msra.mxu0 %v10715_v61  ;;  %8727 = vmatprep.subr.bf16.mxu1 %v10716_v62  ;;  %v10805_v61 = vld [vmem:[%s12628_s10 + $0xd20] ss:$8 sps:$4 sm:$0xff]   ;;  %v10806_v62 = vld [vmem:[%s12628_s10 + $0x434] ss:$8 sps:$4 sm:$0xff]  }
 0x21b   : > { %9303 = vmatprep.subr.bf16.mxu0 %v10719_v63  ;;  %v10809_v63 = vld [vmem:[%s12628_s10 + $0xd34] ss:$8 sps:$4 sm:$0xff]  }
 0x21d   : > { %8729 = vmatpush1.bf16.msra.mxu1 %v10718_v0  ;;  %v10808_v0 = vld [vmem:[%s12628_s10 + $0x430] ss:$8 sps:$4 sm:$0xff]  }
 0x21e   : > { %9305 = vmatpush1.bf16.msra.mxu0 %v10721_v1  ;;  %8731 = vmatprep.subr.bf16.mxu1 %v10722_v2  ;;  %v10811_v1 = vld [vmem:[%s12628_s10 + $0xd30] ss:$8 sps:$4 sm:$0xff]   ;;  %v10812_v2 = vld [vmem:[%s12628_s10 + $0x444] ss:$8 sps:$4 sm:$0xff]  }
 0x21f   : > { %9307 = vmatprep.subr.bf16.mxu0 %v10725_v3  ;;  %v10815_v3 = vld [vmem:[%s12628_s10 + $0xd44] ss:$8 sps:$4 sm:$0xff]  }
 0x221   : > { %8733 = vmatpush1.bf16.msra.mxu1 %v10724_v4  ;;  %v10814_v4 = vld [vmem:[%s12628_s10 + $0x440] ss:$8 sps:$4 sm:$0xff]  }
 0x222   : > { %9309 = vmatpush1.bf16.msra.mxu0 %v10727_v5  ;;  %8735 = vmatprep.subr.bf16.mxu1 %v10728_v6  ;;  %v10817_v5 = vld [vmem:[%s12628_s10 + $0xd40] ss:$8 sps:$4 sm:$0xff]   ;;  %v10818_v6 = vld [vmem:[%s12628_s10 + $0x454] ss:$8 sps:$4 sm:$0xff]  }
 0x223   : > { %9311 = vmatprep.subr.bf16.mxu0 %v10731_v7  ;;  %v10821_v7 = vld [vmem:[%s12628_s10 + $0xd54] ss:$8 sps:$4 sm:$0xff]  }
 0x225   : > { %8737 = vmatpush1.bf16.msra.mxu1 %v10730_v8  ;;  %v10820_v8 = vld [vmem:[%s12628_s10 + $0x450] ss:$8 sps:$4 sm:$0xff]  }
 0x226   : > { %9313 = vmatpush1.bf16.msra.mxu0 %v10733_v9  ;;  %8739 = vmatprep.subr.bf16.mxu1 %v10734_v10  ;;  %v10823_v9 = vld [vmem:[%s12628_s10 + $0xd50] ss:$8 sps:$4 sm:$0xff]   ;;  %v10824_v10 = vld [vmem:[%s12628_s10 + $0x464] ss:$8 sps:$4 sm:$0xff]  }
 0x227   : > { %9315 = vmatprep.subr.bf16.mxu0 %v10737_v11  ;;  %v10827_v11 = vld [vmem:[%s12628_s10 + $0xd64] ss:$8 sps:$4 sm:$0xff]  }
 0x229   : > { %8741 = vmatpush1.bf16.msra.mxu1 %v10736_v12  ;;  %v10826_v12 = vld [vmem:[%s12628_s10 + $0x460] ss:$8 sps:$4 sm:$0xff]  }
 0x22a   : > { %9317 = vmatpush1.bf16.msra.mxu0 %v10739_v13  ;;  %8743 = vmatprep.subr.bf16.mxu1 %v10740_v14  ;;  %v10829_v13 = vld [vmem:[%s12628_s10 + $0xd60] ss:$8 sps:$4 sm:$0xff]   ;;  %v10830_v14 = vld [vmem:[%s12628_s10 + $0x474] ss:$8 sps:$4 sm:$0xff]  }
 0x22b   : > { %9319 = vmatprep.subr.bf16.mxu0 %v10743_v15  ;;  %v10833_v15 = vld [vmem:[%s12628_s10 + $0xd74] ss:$8 sps:$4 sm:$0xff]  }
 0x22d   : > { %8745 = vmatpush1.bf16.msra.mxu1 %v10742_v16  ;;  %v10832_v16 = vld [vmem:[%s12628_s10 + $0x470] ss:$8 sps:$4 sm:$0xff]  }
 0x22e   : > { %9321 = vmatpush1.bf16.msra.mxu0 %v10745_v17  ;;  %8747 = vmatprep.subr.bf16.mxu1 %v10746_v18  ;;  %v10835_v17 = vld [vmem:[%s12628_s10 + $0xd70] ss:$8 sps:$4 sm:$0xff]   ;;  %v10836_v18 = vld [vmem:[%s12628_s10 + $0x484] ss:$8 sps:$4 sm:$0xff]  }
 0x22f   : > { %9323 = vmatprep.subr.bf16.mxu0 %v10749_v19  ;;  %v10839_v19 = vld [vmem:[%s12628_s10 + $0xd84] ss:$8 sps:$4 sm:$0xff]  }
 0x231   : > { %8749 = vmatpush1.bf16.msra.mxu1 %v10748_v20  ;;  %v10838_v20 = vld [vmem:[%s12628_s10 + $0x480] ss:$8 sps:$4 sm:$0xff]  }
 0x232   : > { %9325 = vmatpush1.bf16.msra.mxu0 %v10751_v21  ;;  %8751 = vmatprep.subr.bf16.mxu1 %v10752_v22  ;;  %v10841_v21 = vld [vmem:[%s12628_s10 + $0xd80] ss:$8 sps:$4 sm:$0xff]   ;;  %v10842_v22 = vld [vmem:[%s12628_s10 + $0x494] ss:$8 sps:$4 sm:$0xff]  }
 0x233   : > { %9327 = vmatprep.subr.bf16.mxu0 %v10755_v23  ;;  %v10845_v23 = vld [vmem:[%s12628_s10 + $0xd94] ss:$8 sps:$4 sm:$0xff]  }
 0x235   : > { %8753 = vmatpush1.bf16.msra.mxu1 %v10754_v24  ;;  %v10844_v24 = vld [vmem:[%s12628_s10 + $0x490] ss:$8 sps:$4 sm:$0xff]  }
 0x236   : > { %9329 = vmatpush1.bf16.msra.mxu0 %v10757_v25  ;;  %8755 = vmatprep.subr.bf16.mxu1 %v10758_v26  ;;  %v10847_v25 = vld [vmem:[%s12628_s10 + $0xd90] ss:$8 sps:$4 sm:$0xff]   ;;  %v10848_v26 = vld [vmem:[%s12628_s10 + $0x4a4] ss:$8 sps:$4 sm:$0xff]  }
 0x237   : > { %9331 = vmatprep.subr.bf16.mxu0 %v10761_v27  ;;  %v10851_v27 = vld [vmem:[%s12628_s10 + $0xda4] ss:$8 sps:$4 sm:$0xff]  }
 0x239   : > { %8757 = vmatpush1.bf16.msra.mxu1 %v10760_v28  ;;  %v10850_v28 = vld [vmem:[%s12628_s10 + $0x4a0] ss:$8 sps:$4 sm:$0xff]  }
 0x23a   : > { %9333 = vmatpush1.bf16.msra.mxu0 %v10763_v29  ;;  %8759 = vmatprep.subr.bf16.mxu1 %v10764_v30  ;;  %v10853_v29 = vld [vmem:[%s12628_s10 + $0xda0] ss:$8 sps:$4 sm:$0xff]   ;;  %v10854_v30 = vld [vmem:[%s12628_s10 + $0x4b4] ss:$8 sps:$4 sm:$0xff]  }
 0x23b   : > { %9335 = vmatprep.subr.bf16.mxu0 %v10767_v31  ;;  %v10857_v31 = vld [vmem:[%s12628_s10 + $0xdb4] ss:$8 sps:$4 sm:$0xff]  }
 0x23d   : > { %8761 = vmatpush1.bf16.msra.mxu1 %v10766_v32  ;;  %v10856_v32 = vld [vmem:[%s12628_s10 + $0x4b0] ss:$8 sps:$4 sm:$0xff]  }
 0x23e   : > { %9337 = vmatpush1.bf16.msra.mxu0 %v10769_v33  ;;  %8763 = vmatprep.subr.bf16.mxu1 %v10770_v34  ;;  %v10859_v33 = vld [vmem:[%s12628_s10 + $0xdb0] ss:$8 sps:$4 sm:$0xff]   ;;  %v10860_v34 = vld [vmem:[%s12628_s10 + $0x4c4] ss:$8 sps:$4 sm:$0xff]  }
 0x23f   : > { %9339 = vmatprep.subr.bf16.mxu0 %v10773_v35  ;;  %v10863_v35 = vld [vmem:[%s12628_s10 + $0xdc4] ss:$8 sps:$4 sm:$0xff]  }
 0x241   : > { %8765 = vmatpush1.bf16.msra.mxu1 %v10772_v36  ;;  %v10862_v36 = vld [vmem:[%s12628_s10 + $0x4c0] ss:$8 sps:$4 sm:$0xff]  }
 0x242   : > { %9341 = vmatpush1.bf16.msra.mxu0 %v10775_v37  ;;  %8767 = vmatprep.subr.bf16.mxu1 %v10776_v38  ;;  %v10865_v37 = vld [vmem:[%s12628_s10 + $0xdc0] ss:$8 sps:$4 sm:$0xff]   ;;  %v10866_v38 = vld [vmem:[%s12628_s10 + $0x4d4] ss:$8 sps:$4 sm:$0xff]  }
 0x243   : > { %9343 = vmatprep.subr.bf16.mxu0 %v10779_v39  ;;  %v10869_v39 = vld [vmem:[%s12628_s10 + $0xdd4] ss:$8 sps:$4 sm:$0xff]  }
 0x245   : > { %8769 = vmatpush1.bf16.msra.mxu1 %v10778_v40  ;;  %v10868_v40 = vld [vmem:[%s12628_s10 + $0x4d0] ss:$8 sps:$4 sm:$0xff]  }
 0x246   : > { %9345 = vmatpush1.bf16.msra.mxu0 %v10781_v41  ;;  %8771 = vmatprep.subr.bf16.mxu1 %v10782_v42  ;;  %v10871_v41 = vld [vmem:[%s12628_s10 + $0xdd0] ss:$8 sps:$4 sm:$0xff]   ;;  %v10872_v42 = vld [vmem:[%s12628_s10 + $0x4e4] ss:$8 sps:$4 sm:$0xff]  }
 0x247   : > { %9347 = vmatprep.subr.bf16.mxu0 %v10785_v43  ;;  %v10875_v43 = vld [vmem:[%s12628_s10 + $0xde4] ss:$8 sps:$4 sm:$0xff]  }
 0x249   : > { %8773 = vmatpush1.bf16.msra.mxu1 %v10784_v44  ;;  %v10874_v44 = vld [vmem:[%s12628_s10 + $0x4e0] ss:$8 sps:$4 sm:$0xff]  }
 0x24a   : > { %9349 = vmatpush1.bf16.msra.mxu0 %v10787_v45  ;;  %8775 = vmatprep.subr.bf16.mxu1 %v10788_v46  ;;  %v10877_v45 = vld [vmem:[%s12628_s10 + $0xde0] ss:$8 sps:$4 sm:$0xff]   ;;  %v10878_v46 = vld [vmem:[%s12628_s10 + $0x4f4] ss:$8 sps:$4 sm:$0xff]  }
 0x24b   : > { %9351 = vmatprep.subr.bf16.mxu0 %v10791_v47  ;;  %v10881_v47 = vld [vmem:[%s12628_s10 + $0xdf4] ss:$8 sps:$4 sm:$0xff]  }
 0x24c   : > { %7312 = vmatmul.mubr.f32.vlgmr.msra.gmra.mrb[0].mxu1 %v5178_v50  ;;  %v10884_v50 = vld [vmem:[%s12628_s10 + $0x504] ss:$8 sps:$4 sm:$0xff]  }
 0x24d   : > { %7951 = vmatmul.mubr.f32.vlgmr.msra.gmra.mrb[0].mxu0 %v5196_v51  ;;  %8777 = vmatpush1.bf16.msra.mxu1 %v10790_v48  ;;  %v10880_v48 = vld [vmem:[%s12628_s10 + $0x4f0] ss:$8 sps:$4 sm:$0xff]   ;;  %v10887_v51 = vld [vmem:[%s12628_s10 + $0xe04] ss:$8 sps:$4 sm:$0xff]  }
 0x24e   : > { %9353 = vmatpush1.bf16.msra.mxu0 %v10793_v49  ;;  %8779 = vmatprep.subr.bf16.mxu1 %v10794_v52  ;;  %v10883_v49 = vld [vmem:[%s12628_s10 + $0xdf0] ss:$8 sps:$4 sm:$0xff]   ;;  %v10886_v52 = vld [vmem:[%s12628_s10 + $0x500] ss:$8 sps:$4 sm:$0xff]  }
 0x24f   : > { %9355 = vmatprep.subr.bf16.mxu0 %v10797_v53  ;;  %7382 = vmatprep.mubr.f32.mxu1 %v5181_v55  ;;  %v10889_v53 = vld [vmem:[%s12628_s10 + $0xe00] ss:$8 sps:$4 sm:$0xff]   ;;  %v5198_v55 = vld [vmem:[%s13367_s0 + $0xd0] sm:$0xff] }
 0x250   : > { %8021 = vmatprep.mubr.f32.mxu0 %v5199_v56  ;;  %v10890_v56 = vld [vmem:[%s12628_s10 + $0x514] ss:$8 sps:$4 sm:$0xff]  }
 0x251   : > { %8781 = vmatpush1.bf16.msra.mxu1 %v10796_v54  ;;  %v5180_v54 = vld [vmem:[%s13367_s0 + $0x40] sm:$0xff] }
 0x252   : > { %9357 = vmatpush1.bf16.msra.mxu0 %v10799_v57  ;;  %8783 = vmatprep.subr.bf16.mxu1 %v10800_v58  ;;  %v10893_v57 = vld [vmem:[%s12628_s10 + $0xe14] ss:$8 sps:$4 sm:$0xff]   ;;  %v10892_v58 = vld [vmem:[%s12628_s10 + $0x510] ss:$8 sps:$4 sm:$0xff]  }
 0x253   : > { %9359 = vmatprep.subr.bf16.mxu0 %v10803_v59  ;;  %v5183_v59 = vld [vmem:[%s13367_s0 + $0x58] sm:$0xff] }
 0x255   : > { %8785 = vmatpush1.bf16.msra.mxu1 %v10802_v60  ;;  %v5201_v60 = vld [vmem:[%s13367_s0 + $0xe8] sm:$0xff] }
 0x256   : > { %9361 = vmatpush1.bf16.msra.mxu0 %v10805_v61  ;;  %8787 = vmatprep.subr.bf16.mxu1 %v10806_v62  ;;  %v10895_v61 = vld [vmem:[%s12628_s10 + $0xe10] ss:$8 sps:$4 sm:$0xff]   ;;  %v10896_v62 = vld [vmem:[%s12628_s10 + $0x524] ss:$8 sps:$4 sm:$0xff]  }
 0x257   : > { %9363 = vmatprep.subr.bf16.mxu0 %v10809_v63  ;;  %v10899_v63 = vld [vmem:[%s12628_s10 + $0xe24] ss:$8 sps:$4 sm:$0xff]  }
 0x259   : > { %8789 = vmatpush1.bf16.msra.mxu1 %v10808_v0  ;;  %v10898_v0 = vld [vmem:[%s12628_s10 + $0x520] ss:$8 sps:$4 sm:$0xff]  }
 0x25a   : > { %9365 = vmatpush1.bf16.msra.mxu0 %v10811_v1  ;;  %8791 = vmatprep.subr.bf16.mxu1 %v10812_v2  ;;  %v10901_v1 = vld [vmem:[%s12628_s10 + $0xe20] ss:$8 sps:$4 sm:$0xff]   ;;  %v10902_v2 = vld [vmem:[%s12628_s10 + $0x534] ss:$8 sps:$4 sm:$0xff]  }
 0x25b   : > { %9367 = vmatprep.subr.bf16.mxu0 %v10815_v3  ;;  %v10905_v3 = vld [vmem:[%s12628_s10 + $0xe34] ss:$8 sps:$4 sm:$0xff]  }
 0x25d   : > { %8793 = vmatpush1.bf16.msra.mxu1 %v10814_v4  ;;  %v10904_v4 = vld [vmem:[%s12628_s10 + $0x530] ss:$8 sps:$4 sm:$0xff]  }
 0x25e   : > { %9369 = vmatpush1.bf16.msra.mxu0 %v10817_v5  ;;  %8795 = vmatprep.subr.bf16.mxu1 %v10818_v6  ;;  %v10907_v5 = vld [vmem:[%s12628_s10 + $0xe30] ss:$8 sps:$4 sm:$0xff]   ;;  %v10908_v6 = vld [vmem:[%s12628_s10 + $0x544] ss:$8 sps:$4 sm:$0xff]  }
 0x25f   : > { %9371 = vmatprep.subr.bf16.mxu0 %v10821_v7  ;;  %v10911_v7 = vld [vmem:[%s12628_s10 + $0xe44] ss:$8 sps:$4 sm:$0xff]  }
 0x261   : > { %8797 = vmatpush1.bf16.msra.mxu1 %v10820_v8  ;;  %v10910_v8 = vld [vmem:[%s12628_s10 + $0x540] ss:$8 sps:$4 sm:$0xff]  }
 0x262   : > { %9373 = vmatpush1.bf16.msra.mxu0 %v10823_v9  ;;  %8799 = vmatprep.subr.bf16.mxu1 %v10824_v10  ;;  %v10913_v9 = vld [vmem:[%s12628_s10 + $0xe40] ss:$8 sps:$4 sm:$0xff]   ;;  %v10914_v10 = vld [vmem:[%s12628_s10 + $0x554] ss:$8 sps:$4 sm:$0xff]  }
 0x263   : > { %9375 = vmatprep.subr.bf16.mxu0 %v10827_v11  ;;  %v10917_v11 = vld [vmem:[%s12628_s10 + $0xe54] ss:$8 sps:$4 sm:$0xff]  }
 0x265   : > { %8801 = vmatpush1.bf16.msra.mxu1 %v10826_v12  ;;  %v10916_v12 = vld [vmem:[%s12628_s10 + $0x550] ss:$8 sps:$4 sm:$0xff]  }
 0x266   : > { %9377 = vmatpush1.bf16.msra.mxu0 %v10829_v13  ;;  %8803 = vmatprep.subr.bf16.mxu1 %v10830_v14  ;;  %v10919_v13 = vld [vmem:[%s12628_s10 + $0xe50] ss:$8 sps:$4 sm:$0xff]   ;;  %v10920_v14 = vld [vmem:[%s12628_s10 + $0x564] ss:$8 sps:$4 sm:$0xff]  }
 0x267   : > { %9379 = vmatprep.subr.bf16.mxu0 %v10833_v15  ;;  %v10923_v15 = vld [vmem:[%s12628_s10 + $0xe64] ss:$8 sps:$4 sm:$0xff]  }
 0x269   : > { %8805 = vmatpush1.bf16.msra.mxu1 %v10832_v16  ;;  %v10922_v16 = vld [vmem:[%s12628_s10 + $0x560] ss:$8 sps:$4 sm:$0xff]  }
 0x26a   : > { %9381 = vmatpush1.bf16.msra.mxu0 %v10835_v17  ;;  %8807 = vmatprep.subr.bf16.mxu1 %v10836_v18  ;;  %v10925_v17 = vld [vmem:[%s12628_s10 + $0xe60] ss:$8 sps:$4 sm:$0xff]   ;;  %v10926_v18 = vld [vmem:[%s12628_s10 + $0x574] ss:$8 sps:$4 sm:$0xff]  }
 0x26b   : > { %9383 = vmatprep.subr.bf16.mxu0 %v10839_v19  ;;  %v10929_v19 = vld [vmem:[%s12628_s10 + $0xe74] ss:$8 sps:$4 sm:$0xff]  }
 0x26d   : > { %8809 = vmatpush1.bf16.msra.mxu1 %v10838_v20  ;;  %v10928_v20 = vld [vmem:[%s12628_s10 + $0x570] ss:$8 sps:$4 sm:$0xff]  }
 0x26e   : > { %9385 = vmatpush1.bf16.msra.mxu0 %v10841_v21  ;;  %8811 = vmatprep.subr.bf16.mxu1 %v10842_v22  ;;  %v10931_v21 = vld [vmem:[%s12628_s10 + $0xe70] ss:$8 sps:$4 sm:$0xff]   ;;  %v10932_v22 = vld [vmem:[%s12628_s10 + $0x584] ss:$8 sps:$4 sm:$0xff]  }
 0x26f   : > { %9387 = vmatprep.subr.bf16.mxu0 %v10845_v23  ;;  %v10935_v23 = vld [vmem:[%s12628_s10 + $0xe84] ss:$8 sps:$4 sm:$0xff]  }
 0x271   : > { %8813 = vmatpush1.bf16.msra.mxu1 %v10844_v24  ;;  %v10934_v24 = vld [vmem:[%s12628_s10 + $0x580] ss:$8 sps:$4 sm:$0xff]  }
 0x272   : > { %9389 = vmatpush1.bf16.msra.mxu0 %v10847_v25  ;;  %8815 = vmatprep.subr.bf16.mxu1 %v10848_v26  ;;  %v10937_v25 = vld [vmem:[%s12628_s10 + $0xe80] ss:$8 sps:$4 sm:$0xff]   ;;  %v10938_v26 = vld [vmem:[%s12628_s10 + $0x594] ss:$8 sps:$4 sm:$0xff]  }
 0x273   : > { %9391 = vmatprep.subr.bf16.mxu0 %v10851_v27  ;;  %v10941_v27 = vld [vmem:[%s12628_s10 + $0xe94] ss:$8 sps:$4 sm:$0xff]  }
 0x275   : > { %8817 = vmatpush1.bf16.msra.mxu1 %v10850_v28  ;;  %v10940_v28 = vld [vmem:[%s12628_s10 + $0x590] ss:$8 sps:$4 sm:$0xff]  }
 0x276   : > { %9393 = vmatpush1.bf16.msra.mxu0 %v10853_v29  ;;  %8819 = vmatprep.subr.bf16.mxu1 %v10854_v30  ;;  %v10943_v29 = vld [vmem:[%s12628_s10 + $0xe90] ss:$8 sps:$4 sm:$0xff]   ;;  %v10944_v30 = vld [vmem:[%s12628_s10 + $0x5a4] ss:$8 sps:$4 sm:$0xff]  }
 0x277   : > { %9395 = vmatprep.subr.bf16.mxu0 %v10857_v31  ;;  %v10947_v31 = vld [vmem:[%s12628_s10 + $0xea4] ss:$8 sps:$4 sm:$0xff]  }
 0x279   : > { %8821 = vmatpush1.bf16.msra.mxu1 %v10856_v32  ;;  %v10946_v32 = vld [vmem:[%s12628_s10 + $0x5a0] ss:$8 sps:$4 sm:$0xff]  }
 0x27a   : > { %9397 = vmatpush1.bf16.msra.mxu0 %v10859_v33  ;;  %8823 = vmatprep.subr.bf16.mxu1 %v10860_v34  ;;  %v10949_v33 = vld [vmem:[%s12628_s10 + $0xea0] ss:$8 sps:$4 sm:$0xff]   ;;  %v10950_v34 = vld [vmem:[%s12628_s10 + $0x5b4] ss:$8 sps:$4 sm:$0xff]  }
 0x27b   : > { %9399 = vmatprep.subr.bf16.mxu0 %v10863_v35  ;;  %v10953_v35 = vld [vmem:[%s12628_s10 + $0xeb4] ss:$8 sps:$4 sm:$0xff]  }
 0x27d   : > { %8825 = vmatpush1.bf16.msra.mxu1 %v10862_v36  ;;  %v10952_v36 = vld [vmem:[%s12628_s10 + $0x5b0] ss:$8 sps:$4 sm:$0xff]  }
 0x27e   : > { %9401 = vmatpush1.bf16.msra.mxu0 %v10865_v37  ;;  %8827 = vmatprep.subr.bf16.mxu1 %v10866_v38  ;;  %v10955_v37 = vld [vmem:[%s12628_s10 + $0xeb0] ss:$8 sps:$4 sm:$0xff]   ;;  %v10956_v38 = vld [vmem:[%s12628_s10 + $0x5c4] ss:$8 sps:$4 sm:$0xff]  }
 0x27f   : > { %9403 = vmatprep.subr.bf16.mxu0 %v10869_v39  ;;  %v10959_v39 = vld [vmem:[%s12628_s10 + $0xec4] ss:$8 sps:$4 sm:$0xff]  }
 0x281   : > { %8829 = vmatpush1.bf16.msra.mxu1 %v10868_v40  ;;  %v10958_v40 = vld [vmem:[%s12628_s10 + $0x5c0] ss:$8 sps:$4 sm:$0xff]  }
 0x282   : > { %9405 = vmatpush1.bf16.msra.mxu0 %v10871_v41  ;;  %8831 = vmatprep.subr.bf16.mxu1 %v10872_v42  ;;  %v10961_v41 = vld [vmem:[%s12628_s10 + $0xec0] ss:$8 sps:$4 sm:$0xff]   ;;  %v10962_v42 = vld [vmem:[%s12628_s10 + $0x5d4] ss:$8 sps:$4 sm:$0xff]  }
 0x283   : > { %9407 = vmatprep.subr.bf16.mxu0 %v10875_v43  ;;  %v10965_v43 = vld [vmem:[%s12628_s10 + $0xed4] ss:$8 sps:$4 sm:$0xff]  }
 0x285   : > { %8833 = vmatpush1.bf16.msra.mxu1 %v10874_v44  ;;  %v10964_v44 = vld [vmem:[%s12628_s10 + $0x5d0] ss:$8 sps:$4 sm:$0xff]  }
 0x286   : > { %9409 = vmatpush1.bf16.msra.mxu0 %v10877_v45  ;;  %8835 = vmatprep.subr.bf16.mxu1 %v10878_v46  ;;  %v10967_v45 = vld [vmem:[%s12628_s10 + $0xed0] ss:$8 sps:$4 sm:$0xff]   ;;  %v10968_v46 = vld [vmem:[%s12628_s10 + $0x5e4] ss:$8 sps:$4 sm:$0xff]  }
 0x287   : > { %9411 = vmatprep.subr.bf16.mxu0 %v10881_v47  ;;  %v10971_v47 = vld [vmem:[%s12628_s10 + $0xee4] ss:$8 sps:$4 sm:$0xff]  }
 0x289   : > { %8837 = vmatpush1.bf16.msra.mxu1 %v10880_v48  ;;  %v10970_v48 = vld [vmem:[%s12628_s10 + $0x5e0] ss:$8 sps:$4 sm:$0xff]  }
 0x28a   : > { %9413 = vmatpush1.bf16.msra.mxu0 %v10883_v49  ;;  %8839 = vmatprep.subr.bf16.mxu1 %v10884_v50  ;;  %v10973_v49 = vld [vmem:[%s12628_s10 + $0xee0] ss:$8 sps:$4 sm:$0xff]   ;;  %v10974_v50 = vld [vmem:[%s12628_s10 + $0x5f4] ss:$8 sps:$4 sm:$0xff]  }
 0x28b   : > { %9415 = vmatprep.subr.bf16.mxu0 %v10887_v51  ;;  %v10977_v51 = vld [vmem:[%s12628_s10 + $0xef4] ss:$8 sps:$4 sm:$0xff]  }
 0x28c   : > { %7383 = vmatmul.mubr.f32.vlgmr.msra.gmra.mrb[0].mxu1 %v5180_v54  ;;  %v10980_v54 = vld [vmem:[%s12628_s10 + $0x604] ss:$8 sps:$4 sm:$0xff]  }
 0x28d   : > { %8022 = vmatmul.mubr.f32.vlgmr.msra.gmra.mrb[0].mxu0 %v5198_v55  ;;  %8841 = vmatpush1.bf16.msra.mxu1 %v10886_v52  ;;  %v10976_v52 = vld [vmem:[%s12628_s10 + $0x5f0] ss:$8 sps:$4 sm:$0xff]   ;;  %v10983_v55 = vld [vmem:[%s12628_s10 + $0xf04] ss:$8 sps:$4 sm:$0xff]  }
 0x28e   : > { %9417 = vmatpush1.bf16.msra.mxu0 %v10889_v53  ;;  %8843 = vmatprep.subr.bf16.mxu1 %v10890_v56  ;;  %v10979_v53 = vld [vmem:[%s12628_s10 + $0xef0] ss:$8 sps:$4 sm:$0xff]   ;;  %v10982_v56 = vld [vmem:[%s12628_s10 + $0x600] ss:$8 sps:$4 sm:$0xff]  }
 0x28f   : > { %9419 = vmatprep.subr.bf16.mxu0 %v10893_v57  ;;  %7453 = vmatprep.mubr.f32.mxu1 %v5183_v59  ;;  %v10985_v57 = vld [vmem:[%s12628_s10 + $0xf00] ss:$8 sps:$4 sm:$0xff]  }
 0x290   : > { %8092 = vmatprep.mubr.f32.mxu0 %v5201_v60  ;;  %v5200_v59 = vld [vmem:[%s13367_s0 + $0xe0] sm:$0xff]  ;;  %v10986_v60 = vld [vmem:[%s12628_s10 + $0x614] ss:$8 sps:$4 sm:$0xff]  }
 0x291   : > { %8845 = vmatpush1.bf16.msra.mxu1 %v10892_v58  ;;  %v5182_v58 = vld [vmem:[%s13367_s0 + $0x50] sm:$0xff] }
 0x292   : > { %9421 = vmatpush1.bf16.msra.mxu0 %v10895_v61  ;;  %8847 = vmatprep.subr.bf16.mxu1 %v10896_v62  ;;  %v10989_v61 = vld [vmem:[%s12628_s10 + $0xf14] ss:$8 sps:$4 sm:$0xff]   ;;  %v5185_v62 = vld [vmem:[%s13367_s0 + $0x68] sm:$0xff] }
 0x293   : > { %9423 = vmatprep.subr.bf16.mxu0 %v10899_v63  ;;  %v5203_v63 = vld [vmem:[%s13367_s0 + $0xf8] sm:$0xff] }
 0x295   : > { %8849 = vmatpush1.bf16.msra.mxu1 %v10898_v0  ;;  %v10988_v0 = vld [vmem:[%s12628_s10 + $0x610] ss:$8 sps:$4 sm:$0xff]  }
 0x296   : > { %9425 = vmatpush1.bf16.msra.mxu0 %v10901_v1  ;;  %8851 = vmatprep.subr.bf16.mxu1 %v10902_v2  ;;  %v10991_v1 = vld [vmem:[%s12628_s10 + $0xf10] ss:$8 sps:$4 sm:$0xff]   ;;  %v10992_v2 = vld [vmem:[%s12628_s10 + $0x624] ss:$8 sps:$4 sm:$0xff]  }
 0x297   : > { %9427 = vmatprep.subr.bf16.mxu0 %v10905_v3  ;;  %v10995_v3 = vld [vmem:[%s12628_s10 + $0xf24] ss:$8 sps:$4 sm:$0xff]  }
 0x299   : > { %8853 = vmatpush1.bf16.msra.mxu1 %v10904_v4  ;;  %v10994_v4 = vld [vmem:[%s12628_s10 + $0x620] ss:$8 sps:$4 sm:$0xff]  }
 0x29a   : > { %9429 = vmatpush1.bf16.msra.mxu0 %v10907_v5  ;;  %8855 = vmatprep.subr.bf16.mxu1 %v10908_v6  ;;  %v10997_v5 = vld [vmem:[%s12628_s10 + $0xf20] ss:$8 sps:$4 sm:$0xff]   ;;  %v10998_v6 = vld [vmem:[%s12628_s10 + $0x634] ss:$8 sps:$4 sm:$0xff]  }
 0x29b   : > { %9431 = vmatprep.subr.bf16.mxu0 %v10911_v7  ;;  %v11001_v7 = vld [vmem:[%s12628_s10 + $0xf34] ss:$8 sps:$4 sm:$0xff]  }
 0x29d   : > { %8857 = vmatpush1.bf16.msra.mxu1 %v10910_v8  ;;  %v11000_v8 = vld [vmem:[%s12628_s10 + $0x630] ss:$8 sps:$4 sm:$0xff]  }
 0x29e   : > { %9433 = vmatpush1.bf16.msra.mxu0 %v10913_v9  ;;  %8859 = vmatprep.subr.bf16.mxu1 %v10914_v10  ;;  %v11003_v9 = vld [vmem:[%s12628_s10 + $0xf30] ss:$8 sps:$4 sm:$0xff]   ;;  %v11004_v10 = vld [vmem:[%s12628_s10 + $0x644] ss:$8 sps:$4 sm:$0xff]  }
 0x29f   : > { %9435 = vmatprep.subr.bf16.mxu0 %v10917_v11  ;;  %v11007_v11 = vld [vmem:[%s12628_s10 + $0xf44] ss:$8 sps:$4 sm:$0xff]  }
 0x2a1   : > { %8861 = vmatpush1.bf16.msra.mxu1 %v10916_v12  ;;  %v11006_v12 = vld [vmem:[%s12628_s10 + $0x640] ss:$8 sps:$4 sm:$0xff]  }
 0x2a2   : > { %9437 = vmatpush1.bf16.msra.mxu0 %v10919_v13  ;;  %8863 = vmatprep.subr.bf16.mxu1 %v10920_v14  ;;  %v11009_v13 = vld [vmem:[%s12628_s10 + $0xf40] ss:$8 sps:$4 sm:$0xff]   ;;  %v11010_v14 = vld [vmem:[%s12628_s10 + $0x654] ss:$8 sps:$4 sm:$0xff]  }
 0x2a3   : > { %9439 = vmatprep.subr.bf16.mxu0 %v10923_v15  ;;  %v11013_v15 = vld [vmem:[%s12628_s10 + $0xf54] ss:$8 sps:$4 sm:$0xff]  }
 0x2a5   : > { %8865 = vmatpush1.bf16.msra.mxu1 %v10922_v16  ;;  %v11012_v16 = vld [vmem:[%s12628_s10 + $0x650] ss:$8 sps:$4 sm:$0xff]  }
 0x2a6   : > { %9441 = vmatpush1.bf16.msra.mxu0 %v10925_v17  ;;  %8867 = vmatprep.subr.bf16.mxu1 %v10926_v18  ;;  %v11015_v17 = vld [vmem:[%s12628_s10 + $0xf50] ss:$8 sps:$4 sm:$0xff]   ;;  %v11016_v18 = vld [vmem:[%s12628_s10 + $0x664] ss:$8 sps:$4 sm:$0xff]  }
 0x2a7   : > { %9443 = vmatprep.subr.bf16.mxu0 %v10929_v19  ;;  %v11019_v19 = vld [vmem:[%s12628_s10 + $0xf64] ss:$8 sps:$4 sm:$0xff]  }
 0x2a9   : > { %8869 = vmatpush1.bf16.msra.mxu1 %v10928_v20  ;;  %v11018_v20 = vld [vmem:[%s12628_s10 + $0x660] ss:$8 sps:$4 sm:$0xff]  }
 0x2aa   : > { %9445 = vmatpush1.bf16.msra.mxu0 %v10931_v21  ;;  %8871 = vmatprep.subr.bf16.mxu1 %v10932_v22  ;;  %v11021_v21 = vld [vmem:[%s12628_s10 + $0xf60] ss:$8 sps:$4 sm:$0xff]   ;;  %v11022_v22 = vld [vmem:[%s12628_s10 + $0x674] ss:$8 sps:$4 sm:$0xff]  }
 0x2ab   : > { %9447 = vmatprep.subr.bf16.mxu0 %v10935_v23  ;;  %v11025_v23 = vld [vmem:[%s12628_s10 + $0xf74] ss:$8 sps:$4 sm:$0xff]  }
 0x2ad   : > { %8873 = vmatpush1.bf16.msra.mxu1 %v10934_v24  ;;  %v11024_v24 = vld [vmem:[%s12628_s10 + $0x670] ss:$8 sps:$4 sm:$0xff]  }
 0x2ae   : > { %9449 = vmatpush1.bf16.msra.mxu0 %v10937_v25  ;;  %8875 = vmatprep.subr.bf16.mxu1 %v10938_v26  ;;  %v11027_v25 = vld [vmem:[%s12628_s10 + $0xf70] ss:$8 sps:$4 sm:$0xff]   ;;  %v11028_v26 = vld [vmem:[%s12628_s10 + $0x684] ss:$8 sps:$4 sm:$0xff]  }
 0x2af   : > { %9451 = vmatprep.subr.bf16.mxu0 %v10941_v27  ;;  %v11031_v27 = vld [vmem:[%s12628_s10 + $0xf84] ss:$8 sps:$4 sm:$0xff]  }
 0x2b1   : > { %8877 = vmatpush1.bf16.msra.mxu1 %v10940_v28  ;;  %v11030_v28 = vld [vmem:[%s12628_s10 + $0x680] ss:$8 sps:$4 sm:$0xff]  }
 0x2b2   : > { %9453 = vmatpush1.bf16.msra.mxu0 %v10943_v29  ;;  %8879 = vmatprep.subr.bf16.mxu1 %v10944_v30  ;;  %v11033_v29 = vld [vmem:[%s12628_s10 + $0xf80] ss:$8 sps:$4 sm:$0xff]   ;;  %v11034_v30 = vld [vmem:[%s12628_s10 + $0x694] ss:$8 sps:$4 sm:$0xff]  }
 0x2b3   : > { %9455 = vmatprep.subr.bf16.mxu0 %v10947_v31  ;;  %v11037_v31 = vld [vmem:[%s12628_s10 + $0xf94] ss:$8 sps:$4 sm:$0xff]  }
 0x2b5   : > { %8881 = vmatpush1.bf16.msra.mxu1 %v10946_v32  ;;  %v11036_v32 = vld [vmem:[%s12628_s10 + $0x690] ss:$8 sps:$4 sm:$0xff]  }
 0x2b6   : > { %9457 = vmatpush1.bf16.msra.mxu0 %v10949_v33  ;;  %8883 = vmatprep.subr.bf16.mxu1 %v10950_v34  ;;  %v11039_v33 = vld [vmem:[%s12628_s10 + $0xf90] ss:$8 sps:$4 sm:$0xff]   ;;  %v11040_v34 = vld [vmem:[%s12628_s10 + $0x6a4] ss:$8 sps:$4 sm:$0xff]  }
 0x2b7   : > { %9459 = vmatprep.subr.bf16.mxu0 %v10953_v35  ;;  %v11043_v35 = vld [vmem:[%s12628_s10 + $0xfa4] ss:$8 sps:$4 sm:$0xff]  }
 0x2b9   : > { %8885 = vmatpush1.bf16.msra.mxu1 %v10952_v36  ;;  %v11042_v36 = vld [vmem:[%s12628_s10 + $0x6a0] ss:$8 sps:$4 sm:$0xff]  }
 0x2ba   : > { %9461 = vmatpush1.bf16.msra.mxu0 %v10955_v37  ;;  %8887 = vmatprep.subr.bf16.mxu1 %v10956_v38  ;;  %v11045_v37 = vld [vmem:[%s12628_s10 + $0xfa0] ss:$8 sps:$4 sm:$0xff]   ;;  %v11046_v38 = vld [vmem:[%s12628_s10 + $0x6b4] ss:$8 sps:$4 sm:$0xff]  }
 0x2bb   : > { %9463 = vmatprep.subr.bf16.mxu0 %v10959_v39  ;;  %v11049_v39 = vld [vmem:[%s12628_s10 + $0xfb4] ss:$8 sps:$4 sm:$0xff]  }
 0x2bd   : > { %8889 = vmatpush1.bf16.msra.mxu1 %v10958_v40  ;;  %v11048_v40 = vld [vmem:[%s12628_s10 + $0x6b0] ss:$8 sps:$4 sm:$0xff]  }
 0x2be   : > { %9465 = vmatpush1.bf16.msra.mxu0 %v10961_v41  ;;  %8891 = vmatprep.subr.bf16.mxu1 %v10962_v42  ;;  %v11051_v41 = vld [vmem:[%s12628_s10 + $0xfb0] ss:$8 sps:$4 sm:$0xff]   ;;  %v11052_v42 = vld [vmem:[%s12628_s10 + $0x6c4] ss:$8 sps:$4 sm:$0xff]  }
 0x2bf   : > { %9467 = vmatprep.subr.bf16.mxu0 %v10965_v43  ;;  %v11055_v43 = vld [vmem:[%s12628_s10 + $0xfc4] ss:$8 sps:$4 sm:$0xff]  }
 0x2c1   : > { %8893 = vmatpush1.bf16.msra.mxu1 %v10964_v44  ;;  %v11054_v44 = vld [vmem:[%s12628_s10 + $0x6c0] ss:$8 sps:$4 sm:$0xff]  }
 0x2c2   : > { %9469 = vmatpush1.bf16.msra.mxu0 %v10967_v45  ;;  %8895 = vmatprep.subr.bf16.mxu1 %v10968_v46  ;;  %v11057_v45 = vld [vmem:[%s12628_s10 + $0xfc0] ss:$8 sps:$4 sm:$0xff]   ;;  %v11058_v46 = vld [vmem:[%s12628_s10 + $0x6d4] ss:$8 sps:$4 sm:$0xff]  }
 0x2c3   : > { %9471 = vmatprep.subr.bf16.mxu0 %v10971_v47  ;;  %v11061_v47 = vld [vmem:[%s12628_s10 + $0xfd4] ss:$8 sps:$4 sm:$0xff]  }
 0x2c5   : > { %8897 = vmatpush1.bf16.msra.mxu1 %v10970_v48  ;;  %v11060_v48 = vld [vmem:[%s12628_s10 + $0x6d0] ss:$8 sps:$4 sm:$0xff]  }
 0x2c6   : > { %9473 = vmatpush1.bf16.msra.mxu0 %v10973_v49  ;;  %8899 = vmatprep.subr.bf16.mxu1 %v10974_v50  ;;  %v11063_v49 = vld [vmem:[%s12628_s10 + $0xfd0] ss:$8 sps:$4 sm:$0xff]   ;;  %v11064_v50 = vld [vmem:[%s12628_s10 + $0x6e4] ss:$8 sps:$4 sm:$0xff]  }
 0x2c7   : > { %9475 = vmatprep.subr.bf16.mxu0 %v10977_v51  ;;  %v11067_v51 = vld [vmem:[%s12628_s10 + $0xfe4] ss:$8 sps:$4 sm:$0xff]  }
 0x2c9   : > { %8901 = vmatpush1.bf16.msra.mxu1 %v10976_v52  ;;  %v11066_v52 = vld [vmem:[%s12628_s10 + $0x6e0] ss:$8 sps:$4 sm:$0xff]  }
 0x2ca   : > { %9477 = vmatpush1.bf16.msra.mxu0 %v10979_v53  ;;  %8903 = vmatprep.subr.bf16.mxu1 %v10980_v54  ;;  %v11069_v53 = vld [vmem:[%s12628_s10 + $0xfe0] ss:$8 sps:$4 sm:$0xff]   ;;  %v11070_v54 = vld [vmem:[%s12628_s10 + $0x6f4] ss:$8 sps:$4 sm:$0xff]  }
 0x2cb   : > { %9479 = vmatprep.subr.bf16.mxu0 %v10983_v55  ;;  %v11073_v55 = vld [vmem:[%s12628_s10 + $0xff4] ss:$8 sps:$4 sm:$0xff]  }
 0x2cc   : > { %7454 = vmatmul.mubr.f32.vlgmr.msra.gmra.mrb[0].mxu1 %v5182_v58  ;;  %v11076_v58 = vld [vmem:[%s12628_s10 + $0x704] ss:$8 sps:$4 sm:$0xff]  }
 0x2cd   : > { %8093 = vmatmul.mubr.f32.vlgmr.msra.gmra.mrb[0].mxu0 %v5200_v59  ;;  %8905 = vmatpush1.bf16.msra.mxu1 %v10982_v56  ;;  %v11072_v56 = vld [vmem:[%s12628_s10 + $0x6f0] ss:$8 sps:$4 sm:$0xff]   ;;  %v11079_v59 = vld [vmem:[%s12628_s10 + $0x1004] ss:$8 sps:$4 sm:$0xff]  }
 0x2ce   : > { %9481 = vmatpush1.bf16.msra.mxu0 %v10985_v57  ;;  %8907 = vmatprep.subr.bf16.mxu1 %v10986_v60  ;;  %v11075_v57 = vld [vmem:[%s12628_s10 + $0xff0] ss:$8 sps:$4 sm:$0xff]   ;;  %v11078_v60 = vld [vmem:[%s12628_s10 + $0x700] ss:$8 sps:$4 sm:$0xff]  }
 0x2cf   : > { %9483 = vmatprep.subr.bf16.mxu0 %v10989_v61  ;;  %7524 = vmatprep.mubr.f32.mxu1 %v5185_v62  ;;  %v11081_v61 = vld [vmem:[%s12628_s10 + $0x1000] ss:$8 sps:$4 sm:$0xff]  }
 0x2d0   : > { %8163 = vmatprep.mubr.f32.mxu0 %v5203_v63  ;;  %v5184_v62 = vld [vmem:[%s13367_s0 + $0x60] sm:$0xff]  ;;  %v5202_v63 = vld [vmem:[%s13367_s0 + $0xf0] sm:$0xff] }
 0x2d1   : > { %8909 = vmatpush1.bf16.msra.mxu1 %v10988_v0  ;;  %v11082_v0 = vld [vmem:[%s12628_s10 + $0x714] ss:$8 sps:$4 sm:$0xff]  }
 0x2d2   : > { %9485 = vmatpush1.bf16.msra.mxu0 %v10991_v1  ;;  %8911 = vmatprep.subr.bf16.mxu1 %v10992_v2  ;;  %v11085_v1 = vld [vmem:[%s12628_s10 + $0x1014] ss:$8 sps:$4 sm:$0xff]  }
 0x2d3   : > { %9487 = vmatprep.subr.bf16.mxu0 %v10995_v3  ;;  %v5187_v2 = vld [vmem:[%s13367_s0 + $0x78] sm:$0xff]  ;;  %v5205_v3 = vld [vmem:[%s13367_s0 + $0x108] sm:$0xff] }
 0x2d5   : > { %8913 = vmatpush1.bf16.msra.mxu1 %v10994_v4  ;;  %v11084_v4 = vld [vmem:[%s12628_s10 + $0x710] ss:$8 sps:$4 sm:$0xff]  }
 0x2d6   : > { %9489 = vmatpush1.bf16.msra.mxu0 %v10997_v5  ;;  %8915 = vmatprep.subr.bf16.mxu1 %v10998_v6  ;;  %v11087_v5 = vld [vmem:[%s12628_s10 + $0x1010] ss:$8 sps:$4 sm:$0xff]   ;;  %v11088_v6 = vld [vmem:[%s12628_s10 + $0x724] ss:$8 sps:$4 sm:$0xff]  }
 0x2d7   : > { %9491 = vmatprep.subr.bf16.mxu0 %v11001_v7  ;;  %v11091_v7 = vld [vmem:[%s12628_s10 + $0x1024] ss:$8 sps:$4 sm:$0xff]  }
 0x2d9   : > { %8917 = vmatpush1.bf16.msra.mxu1 %v11000_v8  ;;  %v11090_v8 = vld [vmem:[%s12628_s10 + $0x720] ss:$8 sps:$4 sm:$0xff]  }
 0x2da   : > { %9493 = vmatpush1.bf16.msra.mxu0 %v11003_v9  ;;  %8919 = vmatprep.subr.bf16.mxu1 %v11004_v10  ;;  %v11093_v9 = vld [vmem:[%s12628_s10 + $0x1020] ss:$8 sps:$4 sm:$0xff]   ;;  %v11094_v10 = vld [vmem:[%s12628_s10 + $0x734] ss:$8 sps:$4 sm:$0xff]  }
 0x2db   : > { %9495 = vmatprep.subr.bf16.mxu0 %v11007_v11  ;;  %v11097_v11 = vld [vmem:[%s12628_s10 + $0x1034] ss:$8 sps:$4 sm:$0xff]  }
 0x2dd   : > { %8921 = vmatpush1.bf16.msra.mxu1 %v11006_v12  ;;  %v11096_v12 = vld [vmem:[%s12628_s10 + $0x730] ss:$8 sps:$4 sm:$0xff]  }
 0x2de   : > { %9497 = vmatpush1.bf16.msra.mxu0 %v11009_v13  ;;  %8923 = vmatprep.subr.bf16.mxu1 %v11010_v14  ;;  %v11099_v13 = vld [vmem:[%s12628_s10 + $0x1030] ss:$8 sps:$4 sm:$0xff]   ;;  %v11100_v14 = vld [vmem:[%s12628_s10 + $0x744] ss:$8 sps:$4 sm:$0xff]  }
 0x2df   : > { %9499 = vmatprep.subr.bf16.mxu0 %v11013_v15  ;;  %v11103_v15 = vld [vmem:[%s12628_s10 + $0x1044] ss:$8 sps:$4 sm:$0xff]  }
 0x2e1   : > { %8925 = vmatpush1.bf16.msra.mxu1 %v11012_v16  ;;  %v11102_v16 = vld [vmem:[%s12628_s10 + $0x740] ss:$8 sps:$4 sm:$0xff]  }
 0x2e2   : > { %9501 = vmatpush1.bf16.msra.mxu0 %v11015_v17  ;;  %8927 = vmatprep.subr.bf16.mxu1 %v11016_v18  ;;  %v11105_v17 = vld [vmem:[%s12628_s10 + $0x1040] ss:$8 sps:$4 sm:$0xff]   ;;  %v11106_v18 = vld [vmem:[%s12628_s10 + $0x754] ss:$8 sps:$4 sm:$0xff]  }
 0x2e3   : > { %9503 = vmatprep.subr.bf16.mxu0 %v11019_v19  ;;  %v11109_v19 = vld [vmem:[%s12628_s10 + $0x1054] ss:$8 sps:$4 sm:$0xff]  }
 0x2e5   : > { %8929 = vmatpush1.bf16.msra.mxu1 %v11018_v20  ;;  %v11108_v20 = vld [vmem:[%s12628_s10 + $0x750] ss:$8 sps:$4 sm:$0xff]  }
 0x2e6   : > { %9505 = vmatpush1.bf16.msra.mxu0 %v11021_v21  ;;  %8931 = vmatprep.subr.bf16.mxu1 %v11022_v22  ;;  %v11111_v21 = vld [vmem:[%s12628_s10 + $0x1050] ss:$8 sps:$4 sm:$0xff]   ;;  %v11112_v22 = vld [vmem:[%s12628_s10 + $0x764] ss:$8 sps:$4 sm:$0xff]  }
 0x2e7   : > { %9507 = vmatprep.subr.bf16.mxu0 %v11025_v23  ;;  %v11115_v23 = vld [vmem:[%s12628_s10 + $0x1064] ss:$8 sps:$4 sm:$0xff]  }
 0x2e9   : > { %8933 = vmatpush1.bf16.msra.mxu1 %v11024_v24  ;;  %v11114_v24 = vld [vmem:[%s12628_s10 + $0x760] ss:$8 sps:$4 sm:$0xff]  }
 0x2ea   : > { %9509 = vmatpush1.bf16.msra.mxu0 %v11027_v25  ;;  %8935 = vmatprep.subr.bf16.mxu1 %v11028_v26  ;;  %v11117_v25 = vld [vmem:[%s12628_s10 + $0x1060] ss:$8 sps:$4 sm:$0xff]   ;;  %v11118_v26 = vld [vmem:[%s12628_s10 + $0x774] ss:$8 sps:$4 sm:$0xff]  }
 0x2eb   : > { %9511 = vmatprep.subr.bf16.mxu0 %v11031_v27  ;;  %v11121_v27 = vld [vmem:[%s12628_s10 + $0x1074] ss:$8 sps:$4 sm:$0xff]  }
 0x2ed   : > { %8937 = vmatpush1.bf16.msra.mxu1 %v11030_v28  ;;  %v11120_v28 = vld [vmem:[%s12628_s10 + $0x770] ss:$8 sps:$4 sm:$0xff]  }
 0x2ee   : > { %9513 = vmatpush1.bf16.msra.mxu0 %v11033_v29  ;;  %8939 = vmatprep.subr.bf16.mxu1 %v11034_v30  ;;  %v11123_v29 = vld [vmem:[%s12628_s10 + $0x1070] ss:$8 sps:$4 sm:$0xff]   ;;  %v11124_v30 = vld [vmem:[%s12628_s10 + $0x784] ss:$8 sps:$4 sm:$0xff]  }
 0x2ef   : > { %9515 = vmatprep.subr.bf16.mxu0 %v11037_v31  ;;  %v11127_v31 = vld [vmem:[%s12628_s10 + $0x1084] ss:$8 sps:$4 sm:$0xff]  }
 0x2f1   : > { %8941 = vmatpush1.bf16.msra.mxu1 %v11036_v32  ;;  %v11126_v32 = vld [vmem:[%s12628_s10 + $0x780] ss:$8 sps:$4 sm:$0xff]  }
 0x2f2   : > { %9517 = vmatpush1.bf16.msra.mxu0 %v11039_v33  ;;  %8943 = vmatprep.subr.bf16.mxu1 %v11040_v34  ;;  %v11129_v33 = vld [vmem:[%s12628_s10 + $0x1080] ss:$8 sps:$4 sm:$0xff]   ;;  %v11130_v34 = vld [vmem:[%s12628_s10 + $0x794] ss:$8 sps:$4 sm:$0xff]  }
 0x2f3   : > { %9519 = vmatprep.subr.bf16.mxu0 %v11043_v35  ;;  %v11133_v35 = vld [vmem:[%s12628_s10 + $0x1094] ss:$8 sps:$4 sm:$0xff]  }
 0x2f5   : > { %8945 = vmatpush1.bf16.msra.mxu1 %v11042_v36  ;;  %v11132_v36 = vld [vmem:[%s12628_s10 + $0x790] ss:$8 sps:$4 sm:$0xff]  }
 0x2f6   : > { %9521 = vmatpush1.bf16.msra.mxu0 %v11045_v37  ;;  %8947 = vmatprep.subr.bf16.mxu1 %v11046_v38  ;;  %v11135_v37 = vld [vmem:[%s12628_s10 + $0x1090] ss:$8 sps:$4 sm:$0xff]   ;;  %v11136_v38 = vld [vmem:[%s12628_s10 + $0x7a4] ss:$8 sps:$4 sm:$0xff]  }
 0x2f7   : > { %9523 = vmatprep.subr.bf16.mxu0 %v11049_v39  ;;  %v11139_v39 = vld [vmem:[%s12628_s10 + $0x10a4] ss:$8 sps:$4 sm:$0xff]  }
 0x2f9   : > { %8949 = vmatpush1.bf16.msra.mxu1 %v11048_v40  ;;  %v11138_v40 = vld [vmem:[%s12628_s10 + $0x7a0] ss:$8 sps:$4 sm:$0xff]  }
 0x2fa   : > { %9525 = vmatpush1.bf16.msra.mxu0 %v11051_v41  ;;  %8951 = vmatprep.subr.bf16.mxu1 %v11052_v42  ;;  %v11141_v41 = vld [vmem:[%s12628_s10 + $0x10a0] ss:$8 sps:$4 sm:$0xff]   ;;  %v11142_v42 = vld [vmem:[%s12628_s10 + $0x7b4] ss:$8 sps:$4 sm:$0xff]  }
 0x2fb   : > { %9527 = vmatprep.subr.bf16.mxu0 %v11055_v43  ;;  %v11145_v43 = vld [vmem:[%s12628_s10 + $0x10b4] ss:$8 sps:$4 sm:$0xff]  }
 0x2fd   : > { %8953 = vmatpush1.bf16.msra.mxu1 %v11054_v44  ;;  %v11144_v44 = vld [vmem:[%s12628_s10 + $0x7b0] ss:$8 sps:$4 sm:$0xff]  }
 0x2fe   : > { %9529 = vmatpush1.bf16.msra.mxu0 %v11057_v45  ;;  %8955 = vmatprep.subr.bf16.mxu1 %v11058_v46  ;;  %v11147_v45 = vld [vmem:[%s12628_s10 + $0x10b0] ss:$8 sps:$4 sm:$0xff]   ;;  %v11148_v46 = vld [vmem:[%s12628_s10 + $0x7c4] ss:$8 sps:$4 sm:$0xff]  }
 0x2ff   : > { %9531 = vmatprep.subr.bf16.mxu0 %v11061_v47  ;;  %v11151_v47 = vld [vmem:[%s12628_s10 + $0x10c4] ss:$8 sps:$4 sm:$0xff]  }
 0x301   : > { %8957 = vmatpush1.bf16.msra.mxu1 %v11060_v48  ;;  %v11150_v48 = vld [vmem:[%s12628_s10 + $0x7c0] ss:$8 sps:$4 sm:$0xff]  }
 0x302   : > { %9533 = vmatpush1.bf16.msra.mxu0 %v11063_v49  ;;  %8959 = vmatprep.subr.bf16.mxu1 %v11064_v50  ;;  %v11153_v49 = vld [vmem:[%s12628_s10 + $0x10c0] ss:$8 sps:$4 sm:$0xff]   ;;  %v11154_v50 = vld [vmem:[%s12628_s10 + $0x7d4] ss:$8 sps:$4 sm:$0xff]  }
 0x303   : > { %9535 = vmatprep.subr.bf16.mxu0 %v11067_v51  ;;  %v11157_v51 = vld [vmem:[%s12628_s10 + $0x10d4] ss:$8 sps:$4 sm:$0xff]  }
 0x305   : > { %8961 = vmatpush1.bf16.msra.mxu1 %v11066_v52  ;;  %v11156_v52 = vld [vmem:[%s12628_s10 + $0x7d0] ss:$8 sps:$4 sm:$0xff]  }
 0x306   : > { %9537 = vmatpush1.bf16.msra.mxu0 %v11069_v53  ;;  %8963 = vmatprep.subr.bf16.mxu1 %v11070_v54  ;;  %v11159_v53 = vld [vmem:[%s12628_s10 + $0x10d0] ss:$8 sps:$4 sm:$0xff]   ;;  %v11160_v54 = vld [vmem:[%s12628_s10 + $0x7e4] ss:$8 sps:$4 sm:$0xff]  }
 0x307   : > { %9539 = vmatprep.subr.bf16.mxu0 %v11073_v55  ;;  %v11163_v55 = vld [vmem:[%s12628_s10 + $0x10e4] ss:$8 sps:$4 sm:$0xff]  }
 0x309   : > { %8965 = vmatpush1.bf16.msra.mxu1 %v11072_v56  ;;  %v11162_v56 = vld [vmem:[%s12628_s10 + $0x7e0] ss:$8 sps:$4 sm:$0xff]  }
 0x30a   : > { %9541 = vmatpush1.bf16.msra.mxu0 %v11075_v57  ;;  %8967 = vmatprep.subr.bf16.mxu1 %v11076_v58  ;;  %v11165_v57 = vld [vmem:[%s12628_s10 + $0x10e0] ss:$8 sps:$4 sm:$0xff]   ;;  %v11166_v58 = vld [vmem:[%s12628_s10 + $0x7f4] ss:$8 sps:$4 sm:$0xff]  }
 0x30b   : > { %9543 = vmatprep.subr.bf16.mxu0 %v11079_v59  ;;  %v11169_v59 = vld [vmem:[%s12628_s10 + $0x10f4] ss:$8 sps:$4 sm:$0xff]  }
 0x30c   : > { %7525 = vmatmul.mubr.f32.vlgmr.msra.gmra.mrb[0].mxu1 %v5184_v62  ;;  %v11172_v62 = vld [vmem:[%s12628_s10 + $0x804] ss:$8 sps:$4 sm:$0xff]  }
 0x30d   : > { %8164 = vmatmul.mubr.f32.vlgmr.msra.gmra.mrb[0].mxu0 %v5202_v63  ;;  %8969 = vmatpush1.bf16.msra.mxu1 %v11078_v60  ;;  %v11168_v60 = vld [vmem:[%s12628_s10 + $0x7f0] ss:$8 sps:$4 sm:$0xff]   ;;  %v11175_v63 = vld [vmem:[%s12628_s10 + $0x1104] ss:$8 sps:$4 sm:$0xff]  }
 0x30e   : > { %9545 = vmatpush1.bf16.msra.mxu0 %v11081_v61  ;;  %8971 = vmatprep.subr.bf16.mxu1 %v11082_v0  ;;  %v11171_v61 = vld [vmem:[%s12628_s10 + $0x10f0] ss:$8 sps:$4 sm:$0xff]   ;;  %v11174_v0 = vld [vmem:[%s12628_s10 + $0x800] ss:$8 sps:$4 sm:$0xff]  }
 0x30f   : > { %9547 = vmatprep.subr.bf16.mxu0 %v11085_v1  ;;  %7595 = vmatprep.mubr.f32.mxu1 %v5187_v2  ;;  %v11177_v1 = vld [vmem:[%s12628_s10 + $0x1100] ss:$8 sps:$4 sm:$0xff]   ;;  %v5186_v2 = vld [vmem:[%s13367_s0 + $0x70] sm:$0xff] }
 0x310   : > { %8234 = vmatprep.mubr.f32.mxu0 %v5205_v3  ;;  %v5204_v3 = vld [vmem:[%s13367_s0 + $0x100] sm:$0xff] }
 0x311   : > { %8973 = vmatpush1.bf16.msra.mxu1 %v11084_v4  ;;  %v11178_v4 = vld [vmem:[%s12628_s10 + $0x814] ss:$8 sps:$4 sm:$0xff]  }
 0x312   : > { %9549 = vmatpush1.bf16.msra.mxu0 %v11087_v5  ;;  %8975 = vmatprep.subr.bf16.mxu1 %v11088_v6  ;;  %v11181_v5 = vld [vmem:[%s12628_s10 + $0x1114] ss:$8 sps:$4 sm:$0xff]   ;;  %v5189_v6 = vld [vmem:[%s13367_s0 + $0x88] sm:$0xff] }
 0x313   : > { %9551 = vmatprep.subr.bf16.mxu0 %v11091_v7  ;;  %v5207_v7 = vld [vmem:[%s13367_s0 + $0x118] sm:$0xff] }
 0x315   : > { %8977 = vmatpush1.bf16.msra.mxu1 %v11090_v8  ;;  %v11180_v8 = vld [vmem:[%s12628_s10 + $0x810] ss:$8 sps:$4 sm:$0xff]  }
 0x316   : > { %9553 = vmatpush1.bf16.msra.mxu0 %v11093_v9  ;;  %8979 = vmatprep.subr.bf16.mxu1 %v11094_v10  ;;  %v11183_v9 = vld [vmem:[%s12628_s10 + $0x1110] ss:$8 sps:$4 sm:$0xff]   ;;  %v11184_v10 = vld [vmem:[%s12628_s10 + $0x824] ss:$8 sps:$4 sm:$0xff]  }
 0x317   : > { %9555 = vmatprep.subr.bf16.mxu0 %v11097_v11  ;;  %v11187_v11 = vld [vmem:[%s12628_s10 + $0x1124] ss:$8 sps:$4 sm:$0xff]  }
 0x319   : > { %8981 = vmatpush1.bf16.msra.mxu1 %v11096_v12  ;;  %v11186_v12 = vld [vmem:[%s12628_s10 + $0x820] ss:$8 sps:$4 sm:$0xff]  }
 0x31a   : > { %9557 = vmatpush1.bf16.msra.mxu0 %v11099_v13  ;;  %8983 = vmatprep.subr.bf16.mxu1 %v11100_v14  ;;  %v11189_v13 = vld [vmem:[%s12628_s10 + $0x1120] ss:$8 sps:$4 sm:$0xff]   ;;  %v11190_v14 = vld [vmem:[%s12628_s10 + $0x834] ss:$8 sps:$4 sm:$0xff]  }
 0x31b   : > { %9559 = vmatprep.subr.bf16.mxu0 %v11103_v15  ;;  %v11193_v15 = vld [vmem:[%s12628_s10 + $0x1134] ss:$8 sps:$4 sm:$0xff]  }
 0x31d   : > { %8985 = vmatpush1.bf16.msra.mxu1 %v11102_v16  ;;  %v11192_v16 = vld [vmem:[%s12628_s10 + $0x830] ss:$8 sps:$4 sm:$0xff]  }
 0x31e   : > { %9561 = vmatpush1.bf16.msra.mxu0 %v11105_v17  ;;  %8987 = vmatprep.subr.bf16.mxu1 %v11106_v18  ;;  %v11195_v17 = vld [vmem:[%s12628_s10 + $0x1130] ss:$8 sps:$4 sm:$0xff]   ;;  %v11196_v18 = vld [vmem:[%s12628_s10 + $0x844] ss:$8 sps:$4 sm:$0xff]  }
 0x31f   : > { %9563 = vmatprep.subr.bf16.mxu0 %v11109_v19  ;;  %v11199_v19 = vld [vmem:[%s12628_s10 + $0x1144] ss:$8 sps:$4 sm:$0xff]  }
 0x321   : > { %8989 = vmatpush1.bf16.msra.mxu1 %v11108_v20  ;;  %v11198_v20 = vld [vmem:[%s12628_s10 + $0x840] ss:$8 sps:$4 sm:$0xff]  }
 0x322   : > { %9565 = vmatpush1.bf16.msra.mxu0 %v11111_v21  ;;  %8991 = vmatprep.subr.bf16.mxu1 %v11112_v22  ;;  %v11201_v21 = vld [vmem:[%s12628_s10 + $0x1140] ss:$8 sps:$4 sm:$0xff]   ;;  %v11202_v22 = vld [vmem:[%s12628_s10 + $0x854] ss:$8 sps:$4 sm:$0xff]  }
 0x323   : > { %9567 = vmatprep.subr.bf16.mxu0 %v11115_v23  ;;  %v11205_v23 = vld [vmem:[%s12628_s10 + $0x1154] ss:$8 sps:$4 sm:$0xff]  }
 0x325   : > { %8993 = vmatpush1.bf16.msra.mxu1 %v11114_v24  ;;  %v11204_v24 = vld [vmem:[%s12628_s10 + $0x850] ss:$8 sps:$4 sm:$0xff]  }
 0x326   : > { %9569 = vmatpush1.bf16.msra.mxu0 %v11117_v25  ;;  %8995 = vmatprep.subr.bf16.mxu1 %v11118_v26  ;;  %v11207_v25 = vld [vmem:[%s12628_s10 + $0x1150] ss:$8 sps:$4 sm:$0xff]   ;;  %v11208_v26 = vld [vmem:[%s12628_s10 + $0x864] ss:$8 sps:$4 sm:$0xff]  }
 0x327   : > { %9571 = vmatprep.subr.bf16.mxu0 %v11121_v27  ;;  %v11211_v27 = vld [vmem:[%s12628_s10 + $0x1164] ss:$8 sps:$4 sm:$0xff]  }
 0x329   : > { %8997 = vmatpush1.bf16.msra.mxu1 %v11120_v28  ;;  %v11210_v28 = vld [vmem:[%s12628_s10 + $0x860] ss:$8 sps:$4 sm:$0xff]  }
 0x32a   : > { %9573 = vmatpush1.bf16.msra.mxu0 %v11123_v29  ;;  %8999 = vmatprep.subr.bf16.mxu1 %v11124_v30  ;;  %v11213_v29 = vld [vmem:[%s12628_s10 + $0x1160] ss:$8 sps:$4 sm:$0xff]   ;;  %v11214_v30 = vld [vmem:[%s12628_s10 + $0x874] ss:$8 sps:$4 sm:$0xff]  }
 0x32b   : > { %9575 = vmatprep.subr.bf16.mxu0 %v11127_v31  ;;  %v11217_v31 = vld [vmem:[%s12628_s10 + $0x1174] ss:$8 sps:$4 sm:$0xff]  }
 0x32d   : > { %9001 = vmatpush1.bf16.msra.mxu1 %v11126_v32  ;;  %v11216_v32 = vld [vmem:[%s12628_s10 + $0x870] ss:$8 sps:$4 sm:$0xff]  }
 0x32e   : > { %9577 = vmatpush1.bf16.msra.mxu0 %v11129_v33  ;;  %9003 = vmatprep.subr.bf16.mxu1 %v11130_v34  ;;  %v11219_v33 = vld [vmem:[%s12628_s10 + $0x1170] ss:$8 sps:$4 sm:$0xff]   ;;  %v11220_v34 = vld [vmem:[%s12628_s10 + $0x884] ss:$8 sps:$4 sm:$0xff]  }
 0x32f   : > { %9579 = vmatprep.subr.bf16.mxu0 %v11133_v35  ;;  %v11223_v35 = vld [vmem:[%s12628_s10 + $0x1184] ss:$8 sps:$4 sm:$0xff]  }
 0x331   : > { %9005 = vmatpush1.bf16.msra.mxu1 %v11132_v36  ;;  %v11222_v36 = vld [vmem:[%s12628_s10 + $0x880] ss:$8 sps:$4 sm:$0xff]  }
 0x332   : > { %9581 = vmatpush1.bf16.msra.mxu0 %v11135_v37  ;;  %9007 = vmatprep.subr.bf16.mxu1 %v11136_v38  ;;  %v11225_v37 = vld [vmem:[%s12628_s10 + $0x1180] ss:$8 sps:$4 sm:$0xff]   ;;  %v11226_v38 = vld [vmem:[%s12628_s10 + $0x894] ss:$8 sps:$4 sm:$0xff]  }
 0x333   : > { %9583 = vmatprep.subr.bf16.mxu0 %v11139_v39  ;;  %v11229_v39 = vld [vmem:[%s12628_s10 + $0x1194] ss:$8 sps:$4 sm:$0xff]  }
 0x335   : > { %9009 = vmatpush1.bf16.msra.mxu1 %v11138_v40  ;;  %v11228_v40 = vld [vmem:[%s12628_s10 + $0x890] ss:$8 sps:$4 sm:$0xff]  }
 0x336   : > { %9585 = vmatpush1.bf16.msra.mxu0 %v11141_v41  ;;  %9011 = vmatprep.subr.bf16.mxu1 %v11142_v42  ;;  %v11231_v41 = vld [vmem:[%s12628_s10 + $0x1190] ss:$8 sps:$4 sm:$0xff]   ;;  %v11232_v42 = vld [vmem:[%s12628_s10 + $0x8a4] ss:$8 sps:$4 sm:$0xff]  }
 0x337   : > { %9587 = vmatprep.subr.bf16.mxu0 %v11145_v43  ;;  %v11235_v43 = vld [vmem:[%s12628_s10 + $0x11a4] ss:$8 sps:$4 sm:$0xff]  }
 0x339   : > { %9013 = vmatpush1.bf16.msra.mxu1 %v11144_v44  ;;  %v11234_v44 = vld [vmem:[%s12628_s10 + $0x8a0] ss:$8 sps:$4 sm:$0xff]  }
 0x33a   : > { %9589 = vmatpush1.bf16.msra.mxu0 %v11147_v45  ;;  %9015 = vmatprep.subr.bf16.mxu1 %v11148_v46  ;;  %v11237_v45 = vld [vmem:[%s12628_s10 + $0x11a0] ss:$8 sps:$4 sm:$0xff]   ;;  %v11238_v46 = vld [vmem:[%s12628_s10 + $0x8b4] ss:$8 sps:$4 sm:$0xff]  }
 0x33b   : > { %9591 = vmatprep.subr.bf16.mxu0 %v11151_v47  ;;  %v11241_v47 = vld [vmem:[%s12628_s10 + $0x11b4] ss:$8 sps:$4 sm:$0xff]  }
 0x33d   : > { %9017 = vmatpush1.bf16.msra.mxu1 %v11150_v48  ;;  %v11240_v48 = vld [vmem:[%s12628_s10 + $0x8b0] ss:$8 sps:$4 sm:$0xff]  }
 0x33e   : > { %9593 = vmatpush1.bf16.msra.mxu0 %v11153_v49  ;;  %9019 = vmatprep.subr.bf16.mxu1 %v11154_v50  ;;  %v11243_v49 = vld [vmem:[%s12628_s10 + $0x11b0] ss:$8 sps:$4 sm:$0xff]   ;;  %v11244_v50 = vld [vmem:[%s12628_s10 + $0x8c4] ss:$8 sps:$4 sm:$0xff]  }
 0x33f   : > { %9595 = vmatprep.subr.bf16.mxu0 %v11157_v51  ;;  %v11247_v51 = vld [vmem:[%s12628_s10 + $0x11c4] ss:$8 sps:$4 sm:$0xff]  }
 0x341   : > { %9021 = vmatpush1.bf16.msra.mxu1 %v11156_v52  ;;  %v11246_v52 = vld [vmem:[%s12628_s10 + $0x8c0] ss:$8 sps:$4 sm:$0xff]  }
 0x342   : > { %9597 = vmatpush1.bf16.msra.mxu0 %v11159_v53  ;;  %9023 = vmatprep.subr.bf16.mxu1 %v11160_v54  ;;  %v11249_v53 = vld [vmem:[%s12628_s10 + $0x11c0] ss:$8 sps:$4 sm:$0xff]   ;;  %v11250_v54 = vld [vmem:[%s12628_s10 + $0x8d4] ss:$8 sps:$4 sm:$0xff]  }
 0x343   : > { %9599 = vmatprep.subr.bf16.mxu0 %v11163_v55  ;;  %v11253_v55 = vld [vmem:[%s12628_s10 + $0x11d4] ss:$8 sps:$4 sm:$0xff]  }
 0x345   : > { %9025 = vmatpush1.bf16.msra.mxu1 %v11162_v56  ;;  %v11252_v56 = vld [vmem:[%s12628_s10 + $0x8d0] ss:$8 sps:$4 sm:$0xff]  }
 0x346   : > { %9601 = vmatpush1.bf16.msra.mxu0 %v11165_v57  ;;  %9027 = vmatprep.subr.bf16.mxu1 %v11166_v58  ;;  %v11255_v57 = vld [vmem:[%s12628_s10 + $0x11d0] ss:$8 sps:$4 sm:$0xff]   ;;  %v11256_v58 = vld [vmem:[%s12628_s10 + $0x8e4] ss:$8 sps:$4 sm:$0xff]  }
 0x347   : > { %9603 = vmatprep.subr.bf16.mxu0 %v11169_v59  ;;  %v11259_v59 = vld [vmem:[%s12628_s10 + $0x11e4] ss:$8 sps:$4 sm:$0xff]  }
 0x349   : > { %9029 = vmatpush1.bf16.msra.mxu1 %v11168_v60  ;;  %v11258_v60 = vld [vmem:[%s12628_s10 + $0x8e0] ss:$8 sps:$4 sm:$0xff]  }
 0x34a   : > { %9605 = vmatpush1.bf16.msra.mxu0 %v11171_v61  ;;  %9031 = vmatprep.subr.bf16.mxu1 %v11172_v62  ;;  %v11261_v61 = vld [vmem:[%s12628_s10 + $0x11e0] ss:$8 sps:$4 sm:$0xff]   ;;  %v11262_v62 = vld [vmem:[%s12628_s10 + $0x8f4] ss:$8 sps:$4 sm:$0xff]  }
 0x34b   : > { %9607 = vmatprep.subr.bf16.mxu0 %v11175_v63  ;;  %v11265_v63 = vld [vmem:[%s12628_s10 + $0x11f4] ss:$8 sps:$4 sm:$0xff]  }
 0x34c   : > { %7596 = vmatmul.mubr.f32.vlgmr.msra.gmra.mrb[0].mxu1 %v5186_v2  ;;  %v11268_v2 = vld [vmem:[%s12628_s10 + $0x1204] ss:$8 sps:$4 sm:$0xff]  }
 0x34d   : > { %8235 = vmatmul.mubr.f32.vlgmr.msra.gmra.mrb[0].mxu0 %v5204_v3  ;;  %9033 = vmatpush1.bf16.msra.mxu1 %v11174_v0  ;;  %v11264_v0 = vld [vmem:[%s12628_s10 + $0x8f0] ss:$8 sps:$4 sm:$0xff]   ;;  %v5188_v3 = vld [vmem:[%s13367_s0 + $0x80] sm:$0xff] }
 0x34e   : > { %9609 = vmatpush1.bf16.msra.mxu0 %v11177_v1  ;;  %9035 = vmatprep.subr.bf16.mxu1 %v11178_v4  ;;  %v11267_v1 = vld [vmem:[%s12628_s10 + $0x11f0] ss:$8 sps:$4 sm:$0xff]   ;;  %v11270_v4 = vld [vmem:[%s12628_s10 + $0x1200] ss:$8 sps:$4 sm:$0xff]  }
 0x34f   : > { %9611 = vmatprep.subr.bf16.mxu0 %v11181_v5  ;;  %7666 = vmatprep.mubr.f32.mxu1 %v5189_v6  ;;  %v5206_v5 = vld [vmem:[%s13367_s0 + $0x110] sm:$0xff] }
 0x350   : > { %8305 = vmatprep.mubr.f32.mxu0 %v5207_v7  ;;  %v11271_v6 = vld [vmem:[%s12628_s10 + $0x1214] ss:$8 sps:$4 sm:$0xff]   ;;  %v5209_v7 = vld [vmem:[%s13367_s0 + $0x128] sm:$0xff] }
 0x351   : > { %9037 = vmatpush1.bf16.msra.mxu1 %v11180_v8  ;;  %v11273_v8 = vld [vmem:[%s12628_s10 + $0x1210] ss:$8 sps:$4 sm:$0xff]  }
 0x352   : > { %9613 = vmatpush1.bf16.msra.mxu0 %v11183_v9  ;;  %9039 = vmatprep.subr.bf16.mxu1 %v11184_v10  ;;  %v11274_v9 = vld [vmem:[%s12628_s10 + $0x1224] ss:$8 sps:$4 sm:$0xff]   ;;  %v11276_v10 = vld [vmem:[%s12628_s10 + $0x1220] ss:$8 sps:$4 sm:$0xff]  }
 0x353   : > { %9615 = vmatprep.subr.bf16.mxu0 %v11187_v11  ;;  %v11277_v11 = vld [vmem:[%s12628_s10 + $0x1234] ss:$8 sps:$4 sm:$0xff]  }
 0x355   : > { %9041 = vmatpush1.bf16.msra.mxu1 %v11186_v12  ;;  %v11279_v12 = vld [vmem:[%s12628_s10 + $0x1230] ss:$8 sps:$4 sm:$0xff]  }
 0x356   : > { %9617 = vmatpush1.bf16.msra.mxu0 %v11189_v13  ;;  %9043 = vmatprep.subr.bf16.mxu1 %v11190_v14  ;;  %v11280_v13 = vld [vmem:[%s12628_s10 + $0x1244] ss:$8 sps:$4 sm:$0xff]   ;;  %v11282_v14 = vld [vmem:[%s12628_s10 + $0x1240] ss:$8 sps:$4 sm:$0xff]  }
 0x357   : > { %9619 = vmatprep.subr.bf16.mxu0 %v11193_v15  ;;  %v11283_v15 = vld [vmem:[%s12628_s10 + $0x1254] ss:$8 sps:$4 sm:$0xff]  }
 0x359   : > { %9045 = vmatpush1.bf16.msra.mxu1 %v11192_v16  ;;  %v11285_v16 = vld [vmem:[%s12628_s10 + $0x1250] ss:$8 sps:$4 sm:$0xff]  }
 0x35a   : > { %9621 = vmatpush1.bf16.msra.mxu0 %v11195_v17  ;;  %9047 = vmatprep.subr.bf16.mxu1 %v11196_v18  ;;  %v11286_v17 = vld [vmem:[%s12628_s10 + $0x1264] ss:$8 sps:$4 sm:$0xff]   ;;  %v11288_v18 = vld [vmem:[%s12628_s10 + $0x1260] ss:$8 sps:$4 sm:$0xff]  }
 0x35b   : > { %9623 = vmatprep.subr.bf16.mxu0 %v11199_v19  ;;  %v11289_v19 = vld [vmem:[%s12628_s10 + $0x1274] ss:$8 sps:$4 sm:$0xff]  }
 0x35d   : > { %9049 = vmatpush1.bf16.msra.mxu1 %v11198_v20  ;;  %v11291_v20 = vld [vmem:[%s12628_s10 + $0x1270] ss:$8 sps:$4 sm:$0xff]  }
 0x35e   : > { %9625 = vmatpush1.bf16.msra.mxu0 %v11201_v21  ;;  %9051 = vmatprep.subr.bf16.mxu1 %v11202_v22  ;;  %v11292_v21 = vld [vmem:[%s12628_s10 + $0x1284] ss:$8 sps:$4 sm:$0xff]   ;;  %v11294_v22 = vld [vmem:[%s12628_s10 + $0x1280] ss:$8 sps:$4 sm:$0xff]  }
 0x35f   : > { %9627 = vmatprep.subr.bf16.mxu0 %v11205_v23  ;;  %v11295_v23 = vld [vmem:[%s12628_s10 + $0x1294] ss:$8 sps:$4 sm:$0xff]  }
 0x361   : > { %9053 = vmatpush1.bf16.msra.mxu1 %v11204_v24  ;;  %v11297_v24 = vld [vmem:[%s12628_s10 + $0x1290] ss:$8 sps:$4 sm:$0xff]  }
 0x362   : > { %9629 = vmatpush1.bf16.msra.mxu0 %v11207_v25  ;;  %9055 = vmatprep.subr.bf16.mxu1 %v11208_v26  ;;  %v11298_v25 = vld [vmem:[%s12628_s10 + $0x12a4] ss:$8 sps:$4 sm:$0xff]   ;;  %v11300_v26 = vld [vmem:[%s12628_s10 + $0x12a0] ss:$8 sps:$4 sm:$0xff]  }
 0x363   : > { %9631 = vmatprep.subr.bf16.mxu0 %v11211_v27  ;;  %v11301_v27 = vld [vmem:[%s12628_s10 + $0x12b4] ss:$8 sps:$4 sm:$0xff]  }
 0x365   : > { %9057 = vmatpush1.bf16.msra.mxu1 %v11210_v28  ;;  %v11303_v28 = vld [vmem:[%s12628_s10 + $0x12b0] ss:$8 sps:$4 sm:$0xff]  }
 0x366   : > { %9633 = vmatpush1.bf16.msra.mxu0 %v11213_v29  ;;  %9059 = vmatprep.subr.bf16.mxu1 %v11214_v30  ;;  %v11304_v29 = vld [vmem:[%s12628_s10 + $0x12c4] ss:$8 sps:$4 sm:$0xff]   ;;  %v11306_v30 = vld [vmem:[%s12628_s10 + $0x12c0] ss:$8 sps:$4 sm:$0xff]  }
 0x367   : > { %9635 = vmatprep.subr.bf16.mxu0 %v11217_v31  ;;  %v11307_v31 = vld [vmem:[%s12628_s10 + $0x12d4] ss:$8 sps:$4 sm:$0xff]  }
 0x369   : > { %9061 = vmatpush1.bf16.msra.mxu1 %v11216_v32  ;;  %v11309_v32 = vld [vmem:[%s12628_s10 + $0x12d0] ss:$8 sps:$4 sm:$0xff]  }
 0x36a   : > { %9637 = vmatpush1.bf16.msra.mxu0 %v11219_v33  ;;  %9063 = vmatprep.subr.bf16.mxu1 %v11220_v34  ;;  %v11310_v33 = vld [vmem:[%s12628_s10 + $0x12e4] ss:$8 sps:$4 sm:$0xff]   ;;  %v11312_v34 = vld [vmem:[%s12628_s10 + $0x12e0] ss:$8 sps:$4 sm:$0xff]  }
 0x36b   : > { %9639 = vmatprep.subr.bf16.mxu0 %v11223_v35  ;;  %v11313_v35 = vld [vmem:[%s12628_s10 + $0x12f4] ss:$8 sps:$4 sm:$0xff]  }
 0x36d   : > { %9065 = vmatpush1.bf16.msra.mxu1 %v11222_v36  ;;  %v11315_v36 = vld [vmem:[%s12628_s10 + $0x12f0] ss:$8 sps:$4 sm:$0xff]  }
 0x36e   : > { %9641 = vmatpush1.bf16.msra.mxu0 %v11225_v37  ;;  %9067 = vmatprep.subr.bf16.mxu1 %v11226_v38  ;;  %v5208_v37 = vld [vmem:[%s13367_s0 + $0x120] sm:$0xff] }
 0x36f   : > { %9643 = vmatprep.subr.bf16.mxu0 %v11229_v39 }
 0x371   : > { %9069 = vmatpush1.bf16.msra.mxu1 %v11228_v40  ;;  %v8385_v40 = vlaneseq }
 0x372   : > { %9645 = vmatpush1.bf16.msra.mxu0 %v11231_v41  ;;  %9071 = vmatprep.subr.bf16.mxu1 %v11232_v42 }
 0x373   : > { %9647 = vmatprep.subr.bf16.mxu0 %v11235_v43  ;;  %v8386_v41 = vshrl.u32 %v8385_v40, 7  ;;  %v8383_v43 = vld [vmem:[%s5159_s5] sm:$0x3] }
 0x375   : > { %9073 = vmatpush1.bf16.msra.mxu1 %v11234_v44  ;;  %v8387_v42 = vsub.s32 0, %v8386_v41  ;;  %v8391_v44 = vsub.s32 1, %v8386_v41 }
 0x376   : > { %9649 = vmatpush1.bf16.msra.mxu0 %v11237_v45  ;;  %9075 = vmatprep.subr.bf16.mxu1 %v11238_v46  ;;  %v8397_v45 = vld [vmem:[%s5164_s7] sm:$0x3] }
 0x377   : > { %9651 = vmatprep.subr.bf16.mxu0 %v11241_v47  ;;  %v8388_v46 = vrot.slane %v8383_v43, %v8387_v42 }
 0x379   : > { %9077 = vmatpush1.bf16.msra.mxu1 %v11240_v48  ;;  %v8392_v48 = vrot.slane %v8383_v43, %v8391_v44 }
 0x37a   : > { %9653 = vmatpush1.bf16.msra.mxu0 %v11243_v49  ;;  %9079 = vmatprep.subr.bf16.mxu1 %v11244_v50  ;;  %v8402_v50 = vrot.slane %v8397_v45, %v8387_v42 }
 0x37b   : > { %9655 = vmatprep.subr.bf16.mxu0 %v11247_v51 }
 0x37d   : > { %9081 = vmatpush1.bf16.msra.mxu1 %v11246_v52 }
 0x37e   : > { %9657 = vmatpush1.bf16.msra.mxu0 %v11249_v53  ;;  %9083 = vmatprep.subr.bf16.mxu1 %v11250_v54  ;;  %v8406_v53 = vrot.slane %v8397_v45, %v8391_v44 }
 0x37f   : > { %9659 = vmatprep.subr.bf16.mxu0 %v11253_v55 }
 0x381   : > { %9085 = vmatpush1.bf16.msra.mxu1 %v11252_v56 }
 0x382   : > { %9661 = vmatpush1.bf16.msra.mxu0 %v11255_v57  ;;  %9087 = vmatprep.subr.bf16.mxu1 %v11256_v58 }
 0x383   : > { %9663 = vmatprep.subr.bf16.mxu0 %v11259_v59 }
 0x385   : > { %9089 = vmatpush1.bf16.msra.mxu1 %v11258_v60 }
 0x386   : > { %9665 = vmatpush1.bf16.msra.mxu0 %v11261_v61  ;;  %9091 = vmatprep.subr.bf16.mxu1 %v11262_v62 }
 0x387   : > { %9667 = vmatprep.subr.bf16.mxu0 %v11265_v63 }
 0x389   : > { %9093 = vmatpush1.bf16.msra.mxu1 %v11264_v0 }
 0x38a   : > { %9669 = vmatpush1.bf16.msra.mxu0 %v11267_v1 }
 0x38b   : > { %9671 = vmatprep.subr.bf16.mxu0 %v11268_v2 }
 0x38c   : > { %7667 = vmatmul.mubr.f32.vlgmr.msra.gmra.mrb[0].mxu1 %v5188_v3 }
 0x38d   : > { %8306 = vmatmul.mubr.f32.vlgmr.msra.gmra.mrb[0].mxu0 %v5206_v5 }
 0x38e   : > { %9673 = vmatpush1.bf16.msra.mxu0 %v11270_v4  ;;  %8376 = vmatprep.mubr.f32.mxu0 %v5209_v7 }
 0x38f   : > { %9675 = vmatprep.subr.bf16.mxu0 %v11271_v6 }
 0x392   : > { %9677 = vmatpush1.bf16.msra.mxu0 %v11273_v8 }
 0x393   : > { %9679 = vmatprep.subr.bf16.mxu0 %v11274_v9 }
 0x396   : > { %9681 = vmatpush1.bf16.msra.mxu0 %v11276_v10 }
 0x397   : > { %9683 = vmatprep.subr.bf16.mxu0 %v11277_v11 }
 0x39a   : > { %9685 = vmatpush1.bf16.msra.mxu0 %v11279_v12 }
 0x39b   : > { %9687 = vmatprep.subr.bf16.mxu0 %v11280_v13 }
 0x39e   : > { %9689 = vmatpush1.bf16.msra.mxu0 %v11282_v14 }
 0x39f   : > { %9691 = vmatprep.subr.bf16.mxu0 %v11283_v15 }
 0x3a2   : > { %9693 = vmatpush1.bf16.msra.mxu0 %v11285_v16 }
 0x3a3   : > { %9695 = vmatprep.subr.bf16.mxu0 %v11286_v17 }
 0x3a6   : > { %9697 = vmatpush1.bf16.msra.mxu0 %v11288_v18 }
 0x3a7   : > { %9699 = vmatprep.subr.bf16.mxu0 %v11289_v19 }
 0x3aa   : > { %9701 = vmatpush1.bf16.msra.mxu0 %v11291_v20 }
 0x3ab   : > { %9703 = vmatprep.subr.bf16.mxu0 %v11292_v21 }
 0x3ae   : > { %9705 = vmatpush1.bf16.msra.mxu0 %v11294_v22 }
 0x3af   : > { %9707 = vmatprep.subr.bf16.mxu0 %v11295_v23 }
 0x3b2   : > { %9709 = vmatpush1.bf16.msra.mxu0 %v11297_v24 }
 0x3b3   : > { %9711 = vmatprep.subr.bf16.mxu0 %v11298_v25 }
 0x3b6   : > { %9713 = vmatpush1.bf16.msra.mxu0 %v11300_v26 }
 0x3b7   : > { %9715 = vmatprep.subr.bf16.mxu0 %v11301_v27 }
 0x3ba   : > { %9717 = vmatpush1.bf16.msra.mxu0 %v11303_v28 }
 0x3bb   : > { %9719 = vmatprep.subr.bf16.mxu0 %v11304_v29 }
 0x3be   : > { %9721 = vmatpush1.bf16.msra.mxu0 %v11306_v30 }
 0x3bf   : > { %9723 = vmatprep.subr.bf16.mxu0 %v11307_v31 }
 0x3c2   : > { %9725 = vmatpush1.bf16.msra.mxu0 %v11309_v32 }
 0x3c3   : > { %9727 = vmatprep.subr.bf16.mxu0 %v11310_v33 }
 0x3c6   : > { %9729 = vmatpush1.bf16.msra.mxu0 %v11312_v34 }
 0x3c7   : > { %9731 = vmatprep.subr.bf16.mxu0 %v11313_v35 }
 0x3ca   : > { %9733 = vmatpush1.bf16.msra.mxu0 %v11315_v36 }
 0x3cd   : > { %8377 = vmatmul.mubr.f32.vlgmr.msra.gmra.mrb[0].mxu0 %v5208_v37 }
 0x45f   : > { %v7668_v38 = vpop.f32.mrb[0].mxu1 }
 0x460   : > { %v7670_v39 = vpop.f32.mrb[1].mxu1 }
 0x4a0   : > { %v8378_v47 = vpop.f32.mrb[0].mxu0 }
 0x4a1   : > { %v9734_v49 = vadd.f32 %v8378_v47, %v7668_v38  ;;  %v8380_v51 = vpop.f32.mrb[1].mxu0 }
 0x4a2   : > { %v9735_v52 = vadd.f32 %v8380_v51, %v7670_v39 }
 0x4a3   : > { %v8395_v54 = vmul.f32 %v9734_v49, %v8388_v46 }
 0x4a4   : > { %v8396_v55 = vmul.f32 %v9735_v52, %v8392_v48 }
 0x4a5   : > { %v8409_v56 = vadd.f32 %v8402_v50, %v8395_v54 }
 0x4a6   : > { %v8410_v57 = vadd.f32 %v8406_v53, %v8396_v55 }
 0x4a7   : > { %v8411_v58 = vmax.f32 %v8409_v56, 0.0 }
 0x4a8   : > { %v8412_v59 = vmax.f32 %v8410_v57, 0.0 }
 0x4a9   : > { %8413 = vst [vmem:[%s5170_s9] sm:$0xff] %v8411_v58 }
 0x4aa   : > { %8414 = vst [vmem:[%s5170_s9 + $0x8] sm:$0xff] %v8412_v59 }
 0x4ab PF: > { %p11_p9 = scmp.ge.s32.totalorder %s11382_s19, 9   ;;  %s13372_s15 = smov %s11334_s16 }
 0x4ac   : > { %s13373_s16 = smov %s11391_s22  ;;  %s13374_s17 = smov %s11382_s19 }
 0x4ad   :  { %13 = sbr.rel (!%p11_p9) target bundleno = 2 (0x2), region = 135 }

</bundles_post_ra>
